<compile_context>
chip_gen: v5e
topology: v5e:2x2
jax: 0.10.0
libtpu: 0.0.40
codegen_flags: <defaults>
</compile_context>

<pallas_src>
import jax
import jax.numpy as jnp
from jax import lax
from jax.experimental import pallas as pl
from jax.experimental.pallas import tpu as pltpu

BN_EPS = 1e-5
HALO = 16    # left halo (>= max conv padding 4); 16 keeps bf16 stores aligned
TAIL = 16    # right slack (>= max overread K-1-P = 3); keeps L_BUF 16-aligned
MAXP = 4     # max conv padding across layers
MAXT = 3     # max right overread (K-1-P) across layers
C_SCR = 128  # scratch channel (lane) width = max Cout


def layer_cfg(num_inputs):
    # (name, Cin, Cout, kernel_size, padding) — matches the PyTorch module.
    return [
        ("1a", num_inputs, 64, 8, 4), ("1b", 64, 64, 8, 4),
        ("2a", 64, 128, 5, 2), ("2b", 128, 128, 5, 2),
        ("3a", 128, 64, 3, 1), ("3b", 64, 64, 3, 1),
        ("4a", 64, 64, 3, 1), ("4b", 64, 64, 3, 1),
    ]


def _round_up(x, m):
    return (x + m - 1) // m * m


# ------------------------------------------------------------ param folding --

def fold_bn_params(params, cfg):
    """Fold eval-mode BatchNorm into conv weights/biases.

    Weights -> bf16 (K, Cin, Cout) for the MXU; biases stay f32 (1, Cout) for
    the f32 epilogue.
    """
    folded = {}
    for name, _cin, cout, _ksz, _pad in cfg:
        w = params[f"conv_w{name}"]                    # (K, Cin, Cout)
        b = params[f"conv_b{name}"]                    # (Cout,)
        scale = params[f"gamma{name}"] * lax.rsqrt(params[f"var{name}"] + BN_EPS)
        folded[f"w{name}"] = (w * scale[None, None, :]).astype(jnp.bfloat16)
        folded[f"b{name}"] = ((b - params[f"mean{name}"]) * scale
                              + params[f"beta{name}"]
                              ).reshape(1, cout).astype(jnp.float32)
    return folded


# --------------------------------------------------------------- the kernel --

def _make_kernel(cfg, l_outs, l_comp, tb, nc_pad):
    n_conv = len(cfg)
    l_final = l_outs[-1]
    c_last = cfg[-1][2]
    m = tb * l_comp

    def kernel(*refs):
        x_ref = refs[0]
        conv_refs = refs[1:1 + 2 * n_conv]      # interleaved (w, b) per layer
        fcw_ref = refs[1 + 2 * n_conv]
        fcb_ref = refs[2 + 2 * n_conv]
        o_ref = refs[3 + 2 * n_conv]
        ping = refs[4 + 2 * n_conv]
        pong = refs[5 + 2 * n_conv]

        # Halo rows are only ever READ (they are Conv1d's zero padding), never
        # written by the layer stores.  Clear just those rows every step: cheap
        # (7 rows per buffer) and safe even if the "parallel" batch axis gets
        # split across TensorCores (pid==0 may never run on the 2nd core).
        for buf in (ping, pong):
            buf[:, HALO - MAXP:HALO, :] = jnp.zeros(
                (tb, MAXP, C_SCR), jnp.bfloat16)
            buf[:, HALO + l_comp:HALO + l_comp + MAXT, :] = jnp.zeros(
                (tb, MAXT, C_SCR), jnp.bfloat16)

        # Time-position index (built once) for the per-layer validity masks.
        t_idx = lax.broadcasted_iota(jnp.int32, (l_comp, C_SCR), 0)

        def conv_bn_relu(in_ref, out_ref, w_ref, b_ref, cin, cout, ksz, pad,
                         l_out):
            # Tap-accumulated Conv1d (BN folded into w/b) + ReLU.  One merged
            # (TB*L_COMP, Cin) x (Cin, Cout) bf16 MXU matmul per tap, f32 acc.
            acc = jnp.zeros((m, cout), jnp.float32)
            for k in range(ksz):
                s = HALO - pad + k
                lhs = in_ref[:, s:s + l_comp, :cin].reshape(m, cin)
                acc += lax.dot_general(
                    lhs, w_ref[k],
                    dimension_numbers=(((1,), (0,)), ((), ())),
                    preferred_element_type=jnp.float32)
            y = jnp.maximum(acc + b_ref[...], 0.0)         # f32 epilogue
            y = y.reshape(tb, l_comp, cout)
            # Zero rows past this layer's true output length so they act as
            # zero padding for the next layer's taps (and for the pool).
            y = jnp.where(t_idx[:, :cout] < l_out, y, 0.0)
            out_ref[:, HALO:HALO + l_comp, :cout] = y.astype(jnp.bfloat16)

        bufs = (ping, pong)
        in_ref = x_ref
        for li, (_name, cin, cout, ksz, pad) in enumerate(cfg):
            out_ref = bufs[li % 2]
            conv_bn_relu(in_ref, out_ref, conv_refs[2 * li],
                         conv_refs[2 * li + 1], cin, cout, ksz, pad,
                         l_outs[li])
            in_ref = out_ref
        # TODO(synk): training-mode Dropout (mask + 1/(1-p) scaling) and
        # batch-statistics BatchNorm are not implemented (inference only).

        # Global average pool over the true final length (masked rows are 0).
        h = in_ref[:, HALO:HALO + l_comp, :c_last].astype(jnp.float32)
        pooled = jnp.sum(h, axis=1) * (1.0 / float(l_final))   # (tb, 64)
        logits = jnp.dot(pooled, fcw_ref[...],
                         preferred_element_type=jnp.float32) + fcb_ref[...]
        o_ref[...] = logits[None].astype(o_ref.dtype)           # (1, tb, ncp)

    return kernel


# ------------------------------------------------------------ fused forward --

def tscnn_forward(x, params):
    """x: (B, T, num_inputs) -> logits (B, num_classes). Inference mode."""
    B, T, cin0 = x.shape
    cfg = layer_cfg(cin0)

    # Per-layer output lengths (PyTorch Conv1d: L_out = L + 2P - K + 1).
    l_outs, l = [], T
    for _n, _ci, _co, k, p in cfg:
        l = l + 2 * p - k + 1
        l_outs.append(l)
    l_comp = _round_up(max(max(l_outs), T), 16)   # 16-aligned compute length
    l_buf = HALO + l_comp + TAIL                  # halo'd buffer length

    num_classes = params["fc_w"].shape[1]
    nc_pad = _round_up(max(num_classes, 128), 128)   # lane-dense logit block

    # Batch tile: fill MXU rows (M = TB*L_COMP >= 256 for v6e/v7x, >=128 v5e).
    tb = min(B, int(pl.next_power_of_2(pl.cdiv(256, l_comp))))
    n_steps = int(pl.cdiv(B, tb))
    b_pad = n_steps * tb

    folded = fold_bn_params(params, cfg)

    # Channels-last, halo-padded bf16 input; halos/tail stay zero so the
    # kernel's tap reads see Conv1d's zero padding directly.
    xp = jnp.zeros((b_pad, l_buf, cin0), jnp.bfloat16)
    xp = xp.at[:B, HALO:HALO + T, :].set(x.astype(jnp.bfloat16))

    # FC weights padded to a 128-wide lane-dense output block (f32 head).
    fc_w = jnp.zeros((cfg[-1][2], nc_pad), jnp.float32)
    fc_w = fc_w.at[:, :num_classes].set(params["fc_w"].astype(jnp.float32))
    fc_b = jnp.zeros((1, nc_pad), jnp.float32)
    fc_b = fc_b.at[0, :num_classes].set(params["fc_b"].astype(jnp.float32))

    weight_args = []
    in_specs = [pl.BlockSpec((tb, l_buf, cin0), lambda b: (b, 0, 0))]
    for name, *_ in cfg:
        w = folded[f"w{name}"]          # (K, Cin, Cout) bf16
        bb = folded[f"b{name}"]         # (1, Cout) f32
        weight_args += [w, bb]
        in_specs += [pl.BlockSpec(w.shape, lambda b: (0, 0, 0)),
                     pl.BlockSpec(bb.shape, lambda b: (0, 0))]
    weight_args += [fc_w, fc_b]
    in_specs += [pl.BlockSpec(fc_w.shape, lambda b: (0, 0)),
                 pl.BlockSpec(fc_b.shape, lambda b: (0, 0))]

    kcc = sum(k * ci * co for _n, ci, co, k, _p in cfg)
    flops = 2 * b_pad * l_comp * kcc + 2 * b_pad * cfg[-1][2] * nc_pad
    bytes_accessed = (xp.size * xp.dtype.itemsize
                      + sum(a.size * a.dtype.itemsize for a in weight_args)
                      + b_pad * nc_pad * 4)

    out = pl.pallas_call(
        _make_kernel(cfg, l_outs, l_comp, tb, nc_pad),
        out_shape=jax.ShapeDtypeStruct((n_steps, tb, nc_pad), jnp.float32),
        grid=(n_steps,),
        in_specs=in_specs,
        out_specs=pl.BlockSpec((1, tb, nc_pad), lambda b: (b, 0, 0)),
        scratch_shapes=[pltpu.VMEM((tb, l_buf, C_SCR), jnp.bfloat16),  # ping
                        pltpu.VMEM((tb, l_buf, C_SCR), jnp.bfloat16)], # pong
        compiler_params=pltpu.CompilerParams(
            dimension_semantics=("parallel",),
            vmem_limit_bytes=32 * 1024 * 1024),
        cost_estimate=pl.CostEstimate(flops=int(flops), transcendentals=0,
                                      bytes_accessed=int(bytes_accessed)),
    )(xp, *weight_args)

    return out.reshape(b_pad, nc_pad)[:B, :num_classes]


# -------------------------------------------------------- pure-JAX reference --

def tscnn_reference(x, params):
    cfg = layer_cfg(x.shape[-1])
    h = x.astype(jnp.float32)
    for name, _cin, _cout, _ksz, pad in cfg:
        w = params[f"conv_w{name}"]                   # (K, Cin, Cout) == WIO
        h = lax.conv_general_dilated(
            h, w, window_strides=(1,), padding=[(pad, pad)],
            dimension_numbers=("NWC", "WIO", "NWC"),
            precision=lax.Precision.HIGHEST) + params[f"conv_b{name}"]
        h = ((h - params[f"mean{name}"])
             / jnp.sqrt(params[f"var{name}"] + BN_EPS)
             * params[f"gamma{name}"] + params[f"beta{name}"])
        h = jnp.maximum(h, 0.0)
    pooled = jnp.mean(h, axis=1)                      # (B, 64)
    return jnp.dot(pooled, params["fc_w"],
                   precision=lax.Precision.HIGHEST) + params["fc_b"]


# --------------------------------------------------------------------- setup --

def make_params(key, num_inputs, num_classes):
    cfg = layer_cfg(num_inputs)
    keys = jax.random.split(key, len(cfg) * 6 + 2)
    ki = 0
    params = {}

    def u(k, shape, fan_in):
        s = 1.0 / jnp.sqrt(jnp.float32(fan_in))
        return jax.random.uniform(k, shape, jnp.float32, -s, s)

    for name, cin, cout, ksz, _pad in cfg:
        fan_in = cin * ksz
        params[f"conv_w{name}"] = u(keys[ki], (ksz, cin, cout), fan_in); ki += 1
        params[f"conv_b{name}"] = u(keys[ki], (cout,), fan_in); ki += 1
        params[f"gamma{name}"] = jax.random.uniform(
            keys[ki], (cout,), jnp.float32, 0.5, 1.5); ki += 1
        params[f"beta{name}"] = jax.random.uniform(
            keys[ki], (cout,), jnp.float32, -0.5, 0.5); ki += 1
        params[f"mean{name}"] = 0.1 * jax.random.normal(
            keys[ki], (cout,), jnp.float32); ki += 1
        params[f"var{name}"] = jax.random.uniform(
            keys[ki], (cout,), jnp.float32, 0.5, 1.5); ki += 1
    params["fc_w"] = u(keys[ki], (64, num_classes), 64); ki += 1
    params["fc_b"] = u(keys[ki], (num_classes,), 64); ki += 1
    return params


if __name__ == "__main__":
    num_inputs = 4
    num_classes = 3
    B, T = 2, 16

    key = jax.random.PRNGKey(0)
    kx, kp = jax.random.split(key)
    x = jax.random.normal(kx, (B, T, num_inputs), jnp.float32)
    params = make_params(kp, num_inputs, num_classes)

    logits = jax.block_until_ready(tscnn_forward(x, params))
    ref = jax.block_until_ready(tscnn_reference(x, params))

    assert logits.shape == (B, num_classes)
    # The kernel feeds the MXU bf16 inputs (per the perf review) while the
    # reference runs f32/HIGHEST, so allow a bf16-sized tolerance.
    assert jnp.allclose(logits, ref, atol=5e-2, rtol=5e-2), (logits, ref)
    print("KERNEL_OK")
</pallas_src>

<mosaic_0001>
module attributes {stable_mosaic.version = 11 : i64} {
  func.func @kernel(%arg0: i32, %arg1: memref<2x64x4xbf16, #tpu.memory_space<vmem>>, %arg2: memref<8x4x64xbf16, #tpu.memory_space<vmem>>, %arg3: memref<1x64xf32, #tpu.memory_space<vmem>>, %arg4: memref<8x64x64xbf16, #tpu.memory_space<vmem>>, %arg5: memref<1x64xf32, #tpu.memory_space<vmem>>, %arg6: memref<5x64x128xbf16, #tpu.memory_space<vmem>>, %arg7: memref<1x128xf32, #tpu.memory_space<vmem>>, %arg8: memref<5x128x128xbf16, #tpu.memory_space<vmem>>, %arg9: memref<1x128xf32, #tpu.memory_space<vmem>>, %arg10: memref<3x128x64xbf16, #tpu.memory_space<vmem>>, %arg11: memref<1x64xf32, #tpu.memory_space<vmem>>, %arg12: memref<3x64x64xbf16, #tpu.memory_space<vmem>>, %arg13: memref<1x64xf32, #tpu.memory_space<vmem>>, %arg14: memref<3x64x64xbf16, #tpu.memory_space<vmem>>, %arg15: memref<1x64xf32, #tpu.memory_space<vmem>>, %arg16: memref<3x64x64xbf16, #tpu.memory_space<vmem>>, %arg17: memref<1x64xf32, #tpu.memory_space<vmem>>, %arg18: memref<64x128xf32, #tpu.memory_space<vmem>>, %arg19: memref<1x128xf32, #tpu.memory_space<vmem>>, %arg20: memref<1x2x128xf32, #tpu.memory_space<vmem>>, %arg21: memref<2x64x128xbf16, #tpu.memory_space<vmem>>, %arg22: memref<2x64x128xbf16, #tpu.memory_space<vmem>>) attributes {dimension_semantics = [#tpu.dimension_semantics<parallel>], iteration_bounds = array<i64: 1>, scalar_prefetch = 0 : i64, scratch_operands = 2 : i64, tpu.core_type = #tpu.core_type<tc>, window_params = [{transform_indices = @transform_0, window_bounds = array<i64: 2, 64, 4>}, {pipeline_mode = #tpu.pipeline_mode<synchronous>, transform_indices = @transform_1, window_bounds = array<i64: 8, 4, 64>}, {pipeline_mode = #tpu.pipeline_mode<synchronous>, transform_indices = @transform_2, window_bounds = array<i64: 1, 64>}, {pipeline_mode = #tpu.pipeline_mode<synchronous>, transform_indices = @transform_3, window_bounds = array<i64: 8, 64, 64>}, {pipeline_mode = #tpu.pipeline_mode<synchronous>, transform_indices = @transform_4, window_bounds = array<i64: 1, 64>}, {pipeline_mode = #tpu.pipeline_mode<synchronous>, transform_indices = @transform_5, window_bounds = array<i64: 5, 64, 128>}, {pipeline_mode = #tpu.pipeline_mode<synchronous>, transform_indices = @transform_6, window_bounds = array<i64: 1, 128>}, {pipeline_mode = #tpu.pipeline_mode<synchronous>, transform_indices = @transform_7, window_bounds = array<i64: 5, 128, 128>}, {pipeline_mode = #tpu.pipeline_mode<synchronous>, transform_indices = @transform_8, window_bounds = array<i64: 1, 128>}, {pipeline_mode = #tpu.pipeline_mode<synchronous>, transform_indices = @transform_9, window_bounds = array<i64: 3, 128, 64>}, {pipeline_mode = #tpu.pipeline_mode<synchronous>, transform_indices = @transform_10, window_bounds = array<i64: 1, 64>}, {pipeline_mode = #tpu.pipeline_mode<synchronous>, transform_indices = @transform_11, window_bounds = array<i64: 3, 64, 64>}, {pipeline_mode = #tpu.pipeline_mode<synchronous>, transform_indices = @transform_12, window_bounds = array<i64: 1, 64>}, {pipeline_mode = #tpu.pipeline_mode<synchronous>, transform_indices = @transform_13, window_bounds = array<i64: 3, 64, 64>}, {pipeline_mode = #tpu.pipeline_mode<synchronous>, transform_indices = @transform_14, window_bounds = array<i64: 1, 64>}, {pipeline_mode = #tpu.pipeline_mode<synchronous>, transform_indices = @transform_15, window_bounds = array<i64: 3, 64, 64>}, {pipeline_mode = #tpu.pipeline_mode<synchronous>, transform_indices = @transform_16, window_bounds = array<i64: 1, 64>}, {pipeline_mode = #tpu.pipeline_mode<synchronous>, transform_indices = @transform_17, window_bounds = array<i64: 64, 128>}, {pipeline_mode = #tpu.pipeline_mode<synchronous>, transform_indices = @transform_18, window_bounds = array<i64: 1, 128>}, {transform_indices = @transform_19, window_bounds = array<i64: 1, 2, 128>}]} {
    %cst = arith.constant 0.000000e+00 : bf16
    %0 = vector.broadcast %cst : bf16 to vector<2x4x128xbf16>
    %c0 = arith.constant 0 : index
    %c12 = arith.constant 12 : index
    %c0_0 = arith.constant 0 : index
    %1 = vector.load %arg21[%c0, %c12, %c0_0] : memref<2x64x128xbf16, #tpu.memory_space<vmem>>, vector<2x4x128xbf16>
    tpu.vector_store %arg21[%c0, %c12, %c0_0], %0 {strides = array<i32>} : memref<2x64x128xbf16, #tpu.memory_space<vmem>>, vector<2x4x128xbf16>,
    %cst_1 = arith.constant 0.000000e+00 : bf16
    %2 = vector.broadcast %cst_1 : bf16 to vector<2x3x128xbf16>
    %c0_2 = arith.constant 0 : index
    %c48 = arith.constant 48 : index
    %c0_3 = arith.constant 0 : index
    %3 = vector.load %arg21[%c0_2, %c48, %c0_3] : memref<2x64x128xbf16, #tpu.memory_space<vmem>>, vector<2x3x128xbf16>
    tpu.vector_store %arg21[%c0_2, %c48, %c0_3], %2 {strides = array<i32>} : memref<2x64x128xbf16, #tpu.memory_space<vmem>>, vector<2x3x128xbf16>,
    %cst_4 = arith.constant 0.000000e+00 : bf16
    %4 = vector.broadcast %cst_4 : bf16 to vector<2x4x128xbf16>
    %c0_5 = arith.constant 0 : index
    %c12_6 = arith.constant 12 : index
    %c0_7 = arith.constant 0 : index
    %5 = vector.load %arg22[%c0_5, %c12_6, %c0_7] : memref<2x64x128xbf16, #tpu.memory_space<vmem>>, vector<2x4x128xbf16>
    tpu.vector_store %arg22[%c0_5, %c12_6, %c0_7], %4 {strides = array<i32>} : memref<2x64x128xbf16, #tpu.memory_space<vmem>>, vector<2x4x128xbf16>,
    %cst_8 = arith.constant 0.000000e+00 : bf16
    %6 = vector.broadcast %cst_8 : bf16 to vector<2x3x128xbf16>
    %c0_9 = arith.constant 0 : index
    %c48_10 = arith.constant 48 : index
    %c0_11 = arith.constant 0 : index
    %7 = vector.load %arg22[%c0_9, %c48_10, %c0_11] : memref<2x64x128xbf16, #tpu.memory_space<vmem>>, vector<2x3x128xbf16>
    tpu.vector_store %arg22[%c0_9, %c48_10, %c0_11], %6 {strides = array<i32>} : memref<2x64x128xbf16, #tpu.memory_space<vmem>>, vector<2x3x128xbf16>,
    %8 = tpu.iota {dimensions = array<i32: 0>} : vector<32x128xi32>
    %cst_12 = arith.constant 0.000000e+00 : f32
    %9 = vector.broadcast %cst_12 : f32 to vector<64x64xf32>
    %c0_13 = arith.constant 0 : index
    %c12_14 = arith.constant 12 : index
    %c0_15 = arith.constant 0 : index
    %10 = vector.load %arg1[%c0_13, %c12_14, %c0_15] : memref<2x64x4xbf16, #tpu.memory_space<vmem>>, vector<2x32x4xbf16>
    %11 = vector.shape_cast %10 : vector<2x32x4xbf16> to vector<64x4xbf16>
    %c0_16 = arith.constant 0 : index
    %c0_17 = arith.constant 0 : index
    %c0_18 = arith.constant 0 : index
    %12 = vector.load %arg2[%c0_16, %c0_17, %c0_18] : memref<8x4x64xbf16, #tpu.memory_space<vmem>>, vector<1x4x64xbf16>
    %13 = vector.shape_cast %12 : vector<1x4x64xbf16> to vector<4x64xbf16>
    %cst_19 = arith.constant dense<0.000000e+00> : vector<64x64xf32>
    %14 = tpu.matmul %11, %13, %cst_19 {dimension_numbers = #tpu.dot_dimension_numbers<[1], [0], [0], [1], [0, 0, 1, 1], [], []>} : vector<64x4xbf16>, vector<4x64xbf16>, vector<64x64xf32> -> vector<64x64xf32>
    %15 = arith.addf %9, %14 : vector<64x64xf32>
    %c0_20 = arith.constant 0 : index
    %c13 = arith.constant 13 : index
    %c0_21 = arith.constant 0 : index
    %16 = vector.load %arg1[%c0_20, %c13, %c0_21] : memref<2x64x4xbf16, #tpu.memory_space<vmem>>, vector<2x32x4xbf16>
    %17 = vector.shape_cast %16 : vector<2x32x4xbf16> to vector<64x4xbf16>
    %c1 = arith.constant 1 : index
    %c0_22 = arith.constant 0 : index
    %c0_23 = arith.constant 0 : index
    %18 = vector.load %arg2[%c1, %c0_22, %c0_23] : memref<8x4x64xbf16, #tpu.memory_space<vmem>>, vector<1x4x64xbf16>
    %19 = vector.shape_cast %18 : vector<1x4x64xbf16> to vector<4x64xbf16>
    %cst_24 = arith.constant dense<0.000000e+00> : vector<64x64xf32>
    %20 = tpu.matmul %17, %19, %cst_24 {dimension_numbers = #tpu.dot_dimension_numbers<[1], [0], [0], [1], [0, 0, 1, 1], [], []>} : vector<64x4xbf16>, vector<4x64xbf16>, vector<64x64xf32> -> vector<64x64xf32>
    %21 = arith.addf %15, %20 : vector<64x64xf32>
    %c0_25 = arith.constant 0 : index
    %c14 = arith.constant 14 : index
    %c0_26 = arith.constant 0 : index
    %22 = vector.load %arg1[%c0_25, %c14, %c0_26] : memref<2x64x4xbf16, #tpu.memory_space<vmem>>, vector<2x32x4xbf16>
    %23 = vector.shape_cast %22 : vector<2x32x4xbf16> to vector<64x4xbf16>
    %c2 = arith.constant 2 : index
    %c0_27 = arith.constant 0 : index
    %c0_28 = arith.constant 0 : index
    %24 = vector.load %arg2[%c2, %c0_27, %c0_28] : memref<8x4x64xbf16, #tpu.memory_space<vmem>>, vector<1x4x64xbf16>
    %25 = vector.shape_cast %24 : vector<1x4x64xbf16> to vector<4x64xbf16>
    %cst_29 = arith.constant dense<0.000000e+00> : vector<64x64xf32>
    %26 = tpu.matmul %23, %25, %cst_29 {dimension_numbers = #tpu.dot_dimension_numbers<[1], [0], [0], [1], [0, 0, 1, 1], [], []>} : vector<64x4xbf16>, vector<4x64xbf16>, vector<64x64xf32> -> vector<64x64xf32>
    %27 = arith.addf %21, %26 : vector<64x64xf32>
    %c0_30 = arith.constant 0 : index
    %c15 = arith.constant 15 : index
    %c0_31 = arith.constant 0 : index
    %28 = vector.load %arg1[%c0_30, %c15, %c0_31] : memref<2x64x4xbf16, #tpu.memory_space<vmem>>, vector<2x32x4xbf16>
    %29 = vector.shape_cast %28 : vector<2x32x4xbf16> to vector<64x4xbf16>
    %c3 = arith.constant 3 : index
    %c0_32 = arith.constant 0 : index
    %c0_33 = arith.constant 0 : index
    %30 = vector.load %arg2[%c3, %c0_32, %c0_33] : memref<8x4x64xbf16, #tpu.memory_space<vmem>>, vector<1x4x64xbf16>
    %31 = vector.shape_cast %30 : vector<1x4x64xbf16> to vector<4x64xbf16>
    %cst_34 = arith.constant dense<0.000000e+00> : vector<64x64xf32>
    %32 = tpu.matmul %29, %31, %cst_34 {dimension_numbers = #tpu.dot_dimension_numbers<[1], [0], [0], [1], [0, 0, 1, 1], [], []>} : vector<64x4xbf16>, vector<4x64xbf16>, vector<64x64xf32> -> vector<64x64xf32>
    %33 = arith.addf %27, %32 : vector<64x64xf32>
    %c0_35 = arith.constant 0 : index
    %c16 = arith.constant 16 : index
    %c0_36 = arith.constant 0 : index
    %34 = vector.load %arg1[%c0_35, %c16, %c0_36] : memref<2x64x4xbf16, #tpu.memory_space<vmem>>, vector<2x32x4xbf16>
    %35 = vector.shape_cast %34 : vector<2x32x4xbf16> to vector<64x4xbf16>
    %c4 = arith.constant 4 : index
    %c0_37 = arith.constant 0 : index
    %c0_38 = arith.constant 0 : index
    %36 = vector.load %arg2[%c4, %c0_37, %c0_38] : memref<8x4x64xbf16, #tpu.memory_space<vmem>>, vector<1x4x64xbf16>
    %37 = vector.shape_cast %36 : vector<1x4x64xbf16> to vector<4x64xbf16>
    %cst_39 = arith.constant dense<0.000000e+00> : vector<64x64xf32>
    %38 = tpu.matmul %35, %37, %cst_39 {dimension_numbers = #tpu.dot_dimension_numbers<[1], [0], [0], [1], [0, 0, 1, 1], [], []>} : vector<64x4xbf16>, vector<4x64xbf16>, vector<64x64xf32> -> vector<64x64xf32>
    %39 = arith.addf %33, %38 : vector<64x64xf32>
    %c0_40 = arith.constant 0 : index
    %c17 = arith.constant 17 : index
    %c0_41 = arith.constant 0 : index
    %40 = vector.load %arg1[%c0_40, %c17, %c0_41] : memref<2x64x4xbf16, #tpu.memory_space<vmem>>, vector<2x32x4xbf16>
    %41 = vector.shape_cast %40 : vector<2x32x4xbf16> to vector<64x4xbf16>
    %c5 = arith.constant 5 : index
    %c0_42 = arith.constant 0 : index
    %c0_43 = arith.constant 0 : index
    %42 = vector.load %arg2[%c5, %c0_42, %c0_43] : memref<8x4x64xbf16, #tpu.memory_space<vmem>>, vector<1x4x64xbf16>
    %43 = vector.shape_cast %42 : vector<1x4x64xbf16> to vector<4x64xbf16>
    %cst_44 = arith.constant dense<0.000000e+00> : vector<64x64xf32>
    %44 = tpu.matmul %41, %43, %cst_44 {dimension_numbers = #tpu.dot_dimension_numbers<[1], [0], [0], [1], [0, 0, 1, 1], [], []>} : vector<64x4xbf16>, vector<4x64xbf16>, vector<64x64xf32> -> vector<64x64xf32>
    %45 = arith.addf %39, %44 : vector<64x64xf32>
    %c0_45 = arith.constant 0 : index
    %c18 = arith.constant 18 : index
    %c0_46 = arith.constant 0 : index
    %46 = vector.load %arg1[%c0_45, %c18, %c0_46] : memref<2x64x4xbf16, #tpu.memory_space<vmem>>, vector<2x32x4xbf16>
    %47 = vector.shape_cast %46 : vector<2x32x4xbf16> to vector<64x4xbf16>
    %c6 = arith.constant 6 : index
    %c0_47 = arith.constant 0 : index
    %c0_48 = arith.constant 0 : index
    %48 = vector.load %arg2[%c6, %c0_47, %c0_48] : memref<8x4x64xbf16, #tpu.memory_space<vmem>>, vector<1x4x64xbf16>
    %49 = vector.shape_cast %48 : vector<1x4x64xbf16> to vector<4x64xbf16>
    %cst_49 = arith.constant dense<0.000000e+00> : vector<64x64xf32>
    %50 = tpu.matmul %47, %49, %cst_49 {dimension_numbers = #tpu.dot_dimension_numbers<[1], [0], [0], [1], [0, 0, 1, 1], [], []>} : vector<64x4xbf16>, vector<4x64xbf16>, vector<64x64xf32> -> vector<64x64xf32>
    %51 = arith.addf %45, %50 : vector<64x64xf32>
    %c0_50 = arith.constant 0 : index
    %c19 = arith.constant 19 : index
    %c0_51 = arith.constant 0 : index
    %52 = vector.load %arg1[%c0_50, %c19, %c0_51] : memref<2x64x4xbf16, #tpu.memory_space<vmem>>, vector<2x32x4xbf16>
    %53 = vector.shape_cast %52 : vector<2x32x4xbf16> to vector<64x4xbf16>
    %c7 = arith.constant 7 : index
    %c0_52 = arith.constant 0 : index
    %c0_53 = arith.constant 0 : index
    %54 = vector.load %arg2[%c7, %c0_52, %c0_53] : memref<8x4x64xbf16, #tpu.memory_space<vmem>>, vector<1x4x64xbf16>
    %55 = vector.shape_cast %54 : vector<1x4x64xbf16> to vector<4x64xbf16>
    %cst_54 = arith.constant dense<0.000000e+00> : vector<64x64xf32>
    %56 = tpu.matmul %53, %55, %cst_54 {dimension_numbers = #tpu.dot_dimension_numbers<[1], [0], [0], [1], [0, 0, 1, 1], [], []>} : vector<64x4xbf16>, vector<4x64xbf16>, vector<64x64xf32> -> vector<64x64xf32>
    %57 = arith.addf %51, %56 : vector<64x64xf32>
    %c0_55 = arith.constant 0 : index
    %c0_56 = arith.constant 0 : index
    %58 = vector.load %arg3[%c0_55, %c0_56] : memref<1x64xf32, #tpu.memory_space<vmem>>, vector<1x64xf32>
    %59 = vector.broadcast %58 : vector<1x64xf32> to vector<64x64xf32>
    %60 = arith.addf %57, %59 : vector<64x64xf32>
    %cst_57 = arith.constant 0.000000e+00 : f32
    %61 = vector.broadcast %cst_57 : f32 to vector<64x64xf32>
    %62 = arith.maximumf %60, %61 : vector<64x64xf32>
    %63 = vector.shape_cast %62 : vector<64x64xf32> to vector<2x32x64xf32>
    %64 = vector.extract_strided_slice %8 {offsets = [0, 0], sizes = [32, 64], strides = [1, 1]} : vector<32x128xi32> to vector<32x64xi32>
    %c17_i32 = arith.constant 17 : i32
    %65 = vector.broadcast %c17_i32 : i32 to vector<32x64xi32>
    %66 = arith.cmpi slt, %64, %65 : vector<32x64xi32>
    %cst_58 = arith.constant 0.000000e+00 : f32
    %67 = vector.shape_cast %66 : vector<32x64xi1> to vector<1x32x64xi1>
    %68 = vector.broadcast %67 : vector<1x32x64xi1> to vector<2x32x64xi1>
    %69 = vector.broadcast %cst_58 : f32 to vector<2x32x64xf32>
    %70 = arith.select %68, %63, %69 : vector<2x32x64xi1>, vector<2x32x64xf32>
    %71 = arith.truncf %70 : vector<2x32x64xf32> to vector<2x32x64xbf16>
    %c0_59 = arith.constant 0 : index
    %c16_60 = arith.constant 16 : index
    %c0_61 = arith.constant 0 : index
    %72 = vector.load %arg21[%c0_59, %c16_60, %c0_61] : memref<2x64x128xbf16, #tpu.memory_space<vmem>>, vector<2x32x64xbf16>
    tpu.vector_store %arg21[%c0_59, %c16_60, %c0_61], %71 {strides = array<i32>} : memref<2x64x128xbf16, #tpu.memory_space<vmem>>, vector<2x32x64xbf16>,
    %cst_62 = arith.constant 0.000000e+00 : f32
    %73 = vector.broadcast %cst_62 : f32 to vector<64x64xf32>
    %c0_63 = arith.constant 0 : index
    %c12_64 = arith.constant 12 : index
    %c0_65 = arith.constant 0 : index
    %74 = vector.load %arg21[%c0_63, %c12_64, %c0_65] : memref<2x64x128xbf16, #tpu.memory_space<vmem>>, vector<2x32x64xbf16>
    %75 = vector.shape_cast %74 : vector<2x32x64xbf16> to vector<64x64xbf16>
    %c0_66 = arith.constant 0 : index
    %c0_67 = arith.constant 0 : index
    %c0_68 = arith.constant 0 : index
    %76 = vector.load %arg4[%c0_66, %c0_67, %c0_68] : memref<8x64x64xbf16, #tpu.memory_space<vmem>>, vector<1x64x64xbf16>
    %77 = vector.shape_cast %76 : vector<1x64x64xbf16> to vector<64x64xbf16>
    %cst_69 = arith.constant dense<0.000000e+00> : vector<64x64xf32>
    %78 = tpu.matmul %75, %77, %cst_69 {dimension_numbers = #tpu.dot_dimension_numbers<[1], [0], [0], [1], [0, 0, 1, 1], [], []>} : vector<64x64xbf16>, vector<64x64xbf16>, vector<64x64xf32> -> vector<64x64xf32>
    %79 = arith.addf %73, %78 : vector<64x64xf32>
    %c0_70 = arith.constant 0 : index
    %c13_71 = arith.constant 13 : index
    %c0_72 = arith.constant 0 : index
    %80 = vector.load %arg21[%c0_70, %c13_71, %c0_72] : memref<2x64x128xbf16, #tpu.memory_space<vmem>>, vector<2x32x64xbf16>
    %81 = vector.shape_cast %80 : vector<2x32x64xbf16> to vector<64x64xbf16>
    %c1_73 = arith.constant 1 : index
    %c0_74 = arith.constant 0 : index
    %c0_75 = arith.constant 0 : index
    %82 = vector.load %arg4[%c1_73, %c0_74, %c0_75] : memref<8x64x64xbf16, #tpu.memory_space<vmem>>, vector<1x64x64xbf16>
    %83 = vector.shape_cast %82 : vector<1x64x64xbf16> to vector<64x64xbf16>
    %cst_76 = arith.constant dense<0.000000e+00> : vector<64x64xf32>
    %84 = tpu.matmul %81, %83, %cst_76 {dimension_numbers = #tpu.dot_dimension_numbers<[1], [0], [0], [1], [0, 0, 1, 1], [], []>} : vector<64x64xbf16>, vector<64x64xbf16>, vector<64x64xf32> -> vector<64x64xf32>
    %85 = arith.addf %79, %84 : vector<64x64xf32>
    %c0_77 = arith.constant 0 : index
    %c14_78 = arith.constant 14 : index
    %c0_79 = arith.constant 0 : index
    %86 = vector.load %arg21[%c0_77, %c14_78, %c0_79] : memref<2x64x128xbf16, #tpu.memory_space<vmem>>, vector<2x32x64xbf16>
    %87 = vector.shape_cast %86 : vector<2x32x64xbf16> to vector<64x64xbf16>
    %c2_80 = arith.constant 2 : index
    %c0_81 = arith.constant 0 : index
    %c0_82 = arith.constant 0 : index
    %88 = vector.load %arg4[%c2_80, %c0_81, %c0_82] : memref<8x64x64xbf16, #tpu.memory_space<vmem>>, vector<1x64x64xbf16>
    %89 = vector.shape_cast %88 : vector<1x64x64xbf16> to vector<64x64xbf16>
    %cst_83 = arith.constant dense<0.000000e+00> : vector<64x64xf32>
    %90 = tpu.matmul %87, %89, %cst_83 {dimension_numbers = #tpu.dot_dimension_numbers<[1], [0], [0], [1], [0, 0, 1, 1], [], []>} : vector<64x64xbf16>, vector<64x64xbf16>, vector<64x64xf32> -> vector<64x64xf32>
    %91 = arith.addf %85, %90 : vector<64x64xf32>
    %c0_84 = arith.constant 0 : index
    %c15_85 = arith.constant 15 : index
    %c0_86 = arith.constant 0 : index
    %92 = vector.load %arg21[%c0_84, %c15_85, %c0_86] : memref<2x64x128xbf16, #tpu.memory_space<vmem>>, vector<2x32x64xbf16>
    %93 = vector.shape_cast %92 : vector<2x32x64xbf16> to vector<64x64xbf16>
    %c3_87 = arith.constant 3 : index
    %c0_88 = arith.constant 0 : index
    %c0_89 = arith.constant 0 : index
    %94 = vector.load %arg4[%c3_87, %c0_88, %c0_89] : memref<8x64x64xbf16, #tpu.memory_space<vmem>>, vector<1x64x64xbf16>
    %95 = vector.shape_cast %94 : vector<1x64x64xbf16> to vector<64x64xbf16>
    %cst_90 = arith.constant dense<0.000000e+00> : vector<64x64xf32>
    %96 = tpu.matmul %93, %95, %cst_90 {dimension_numbers = #tpu.dot_dimension_numbers<[1], [0], [0], [1], [0, 0, 1, 1], [], []>} : vector<64x64xbf16>, vector<64x64xbf16>, vector<64x64xf32> -> vector<64x64xf32>
    %97 = arith.addf %91, %96 : vector<64x64xf32>
    %c0_91 = arith.constant 0 : index
    %c16_92 = arith.constant 16 : index
    %c0_93 = arith.constant 0 : index
    %98 = vector.load %arg21[%c0_91, %c16_92, %c0_93] : memref<2x64x128xbf16, #tpu.memory_space<vmem>>, vector<2x32x64xbf16>
    %99 = vector.shape_cast %98 : vector<2x32x64xbf16> to vector<64x64xbf16>
    %c4_94 = arith.constant 4 : index
    %c0_95 = arith.constant 0 : index
    %c0_96 = arith.constant 0 : index
    %100 = vector.load %arg4[%c4_94, %c0_95, %c0_96] : memref<8x64x64xbf16, #tpu.memory_space<vmem>>, vector<1x64x64xbf16>
    %101 = vector.shape_cast %100 : vector<1x64x64xbf16> to vector<64x64xbf16>
    %cst_97 = arith.constant dense<0.000000e+00> : vector<64x64xf32>
    %102 = tpu.matmul %99, %101, %cst_97 {dimension_numbers = #tpu.dot_dimension_numbers<[1], [0], [0], [1], [0, 0, 1, 1], [], []>} : vector<64x64xbf16>, vector<64x64xbf16>, vector<64x64xf32> -> vector<64x64xf32>
    %103 = arith.addf %97, %102 : vector<64x64xf32>
    %c0_98 = arith.constant 0 : index
    %c17_99 = arith.constant 17 : index
    %c0_100 = arith.constant 0 : index
    %104 = vector.load %arg21[%c0_98, %c17_99, %c0_100] : memref<2x64x128xbf16, #tpu.memory_space<vmem>>, vector<2x32x64xbf16>
    %105 = vector.shape_cast %104 : vector<2x32x64xbf16> to vector<64x64xbf16>
    %c5_101 = arith.constant 5 : index
    %c0_102 = arith.constant 0 : index
    %c0_103 = arith.constant 0 : index
    %106 = vector.load %arg4[%c5_101, %c0_102, %c0_103] : memref<8x64x64xbf16, #tpu.memory_space<vmem>>, vector<1x64x64xbf16>
    %107 = vector.shape_cast %106 : vector<1x64x64xbf16> to vector<64x64xbf16>
    %cst_104 = arith.constant dense<0.000000e+00> : vector<64x64xf32>
    %108 = tpu.matmul %105, %107, %cst_104 {dimension_numbers = #tpu.dot_dimension_numbers<[1], [0], [0], [1], [0, 0, 1, 1], [], []>} : vector<64x64xbf16>, vector<64x64xbf16>, vector<64x64xf32> -> vector<64x64xf32>
    %109 = arith.addf %103, %108 : vector<64x64xf32>
    %c0_105 = arith.constant 0 : index
    %c18_106 = arith.constant 18 : index
    %c0_107 = arith.constant 0 : index
    %110 = vector.load %arg21[%c0_105, %c18_106, %c0_107] : memref<2x64x128xbf16, #tpu.memory_space<vmem>>, vector<2x32x64xbf16>
    %111 = vector.shape_cast %110 : vector<2x32x64xbf16> to vector<64x64xbf16>
    %c6_108 = arith.constant 6 : index
    %c0_109 = arith.constant 0 : index
    %c0_110 = arith.constant 0 : index
    %112 = vector.load %arg4[%c6_108, %c0_109, %c0_110] : memref<8x64x64xbf16, #tpu.memory_space<vmem>>, vector<1x64x64xbf16>
    %113 = vector.shape_cast %112 : vector<1x64x64xbf16> to vector<64x64xbf16>
    %cst_111 = arith.constant dense<0.000000e+00> : vector<64x64xf32>
    %114 = tpu.matmul %111, %113, %cst_111 {dimension_numbers = #tpu.dot_dimension_numbers<[1], [0], [0], [1], [0, 0, 1, 1], [], []>} : vector<64x64xbf16>, vector<64x64xbf16>, vector<64x64xf32> -> vector<64x64xf32>
    %115 = arith.addf %109, %114 : vector<64x64xf32>
    %c0_112 = arith.constant 0 : index
    %c19_113 = arith.constant 19 : index
    %c0_114 = arith.constant 0 : index
    %116 = vector.load %arg21[%c0_112, %c19_113, %c0_114] : memref<2x64x128xbf16, #tpu.memory_space<vmem>>, vector<2x32x64xbf16>
    %117 = vector.shape_cast %116 : vector<2x32x64xbf16> to vector<64x64xbf16>
    %c7_115 = arith.constant 7 : index
    %c0_116 = arith.constant 0 : index
    %c0_117 = arith.constant 0 : index
    %118 = vector.load %arg4[%c7_115, %c0_116, %c0_117] : memref<8x64x64xbf16, #tpu.memory_space<vmem>>, vector<1x64x64xbf16>
    %119 = vector.shape_cast %118 : vector<1x64x64xbf16> to vector<64x64xbf16>
    %cst_118 = arith.constant dense<0.000000e+00> : vector<64x64xf32>
    %120 = tpu.matmul %117, %119, %cst_118 {dimension_numbers = #tpu.dot_dimension_numbers<[1], [0], [0], [1], [0, 0, 1, 1], [], []>} : vector<64x64xbf16>, vector<64x64xbf16>, vector<64x64xf32> -> vector<64x64xf32>
    %121 = arith.addf %115, %120 : vector<64x64xf32>
    %c0_119 = arith.constant 0 : index
    %c0_120 = arith.constant 0 : index
    %122 = vector.load %arg5[%c0_119, %c0_120] : memref<1x64xf32, #tpu.memory_space<vmem>>, vector<1x64xf32>
    %123 = vector.broadcast %122 : vector<1x64xf32> to vector<64x64xf32>
    %124 = arith.addf %121, %123 : vector<64x64xf32>
    %cst_121 = arith.constant 0.000000e+00 : f32
    %125 = vector.broadcast %cst_121 : f32 to vector<64x64xf32>
    %126 = arith.maximumf %124, %125 : vector<64x64xf32>
    %127 = vector.shape_cast %126 : vector<64x64xf32> to vector<2x32x64xf32>
    %128 = vector.extract_strided_slice %8 {offsets = [0, 0], sizes = [32, 64], strides = [1, 1]} : vector<32x128xi32> to vector<32x64xi32>
    %c18_i32 = arith.constant 18 : i32
    %129 = vector.broadcast %c18_i32 : i32 to vector<32x64xi32>
    %130 = arith.cmpi slt, %128, %129 : vector<32x64xi32>
    %cst_122 = arith.constant 0.000000e+00 : f32
    %131 = vector.shape_cast %130 : vector<32x64xi1> to vector<1x32x64xi1>
    %132 = vector.broadcast %131 : vector<1x32x64xi1> to vector<2x32x64xi1>
    %133 = vector.broadcast %cst_122 : f32 to vector<2x32x64xf32>
    %134 = arith.select %132, %127, %133 : vector<2x32x64xi1>, vector<2x32x64xf32>
    %135 = arith.truncf %134 : vector<2x32x64xf32> to vector<2x32x64xbf16>
    %c0_123 = arith.constant 0 : index
    %c16_124 = arith.constant 16 : index
    %c0_125 = arith.constant 0 : index
    %136 = vector.load %arg22[%c0_123, %c16_124, %c0_125] : memref<2x64x128xbf16, #tpu.memory_space<vmem>>, vector<2x32x64xbf16>
    tpu.vector_store %arg22[%c0_123, %c16_124, %c0_125], %135 {strides = array<i32>} : memref<2x64x128xbf16, #tpu.memory_space<vmem>>, vector<2x32x64xbf16>,
    %cst_126 = arith.constant 0.000000e+00 : f32
    %137 = vector.broadcast %cst_126 : f32 to vector<64x128xf32>
    %c0_127 = arith.constant 0 : index
    %c14_128 = arith.constant 14 : index
    %c0_129 = arith.constant 0 : index
    %138 = vector.load %arg22[%c0_127, %c14_128, %c0_129] : memref<2x64x128xbf16, #tpu.memory_space<vmem>>, vector<2x32x64xbf16>
    %139 = vector.shape_cast %138 : vector<2x32x64xbf16> to vector<64x64xbf16>
    %c0_130 = arith.constant 0 : index
    %c0_131 = arith.constant 0 : index
    %c0_132 = arith.constant 0 : index
    %140 = vector.load %arg6[%c0_130, %c0_131, %c0_132] : memref<5x64x128xbf16, #tpu.memory_space<vmem>>, vector<1x64x128xbf16>
    %141 = vector.shape_cast %140 : vector<1x64x128xbf16> to vector<64x128xbf16>
    %cst_133 = arith.constant dense<0.000000e+00> : vector<64x128xf32>
    %142 = tpu.matmul %139, %141, %cst_133 {dimension_numbers = #tpu.dot_dimension_numbers<[1], [0], [0], [1], [0, 0, 1, 1], [], []>} : vector<64x64xbf16>, vector<64x128xbf16>, vector<64x128xf32> -> vector<64x128xf32>
    %143 = arith.addf %137, %142 : vector<64x128xf32>
    %c0_134 = arith.constant 0 : index
    %c15_135 = arith.constant 15 : index
    %c0_136 = arith.constant 0 : index
    %144 = vector.load %arg22[%c0_134, %c15_135, %c0_136] : memref<2x64x128xbf16, #tpu.memory_space<vmem>>, vector<2x32x64xbf16>
    %145 = vector.shape_cast %144 : vector<2x32x64xbf16> to vector<64x64xbf16>
    %c1_137 = arith.constant 1 : index
    %c0_138 = arith.constant 0 : index
    %c0_139 = arith.constant 0 : index
    %146 = vector.load %arg6[%c1_137, %c0_138, %c0_139] : memref<5x64x128xbf16, #tpu.memory_space<vmem>>, vector<1x64x128xbf16>
    %147 = vector.shape_cast %146 : vector<1x64x128xbf16> to vector<64x128xbf16>
    %cst_140 = arith.constant dense<0.000000e+00> : vector<64x128xf32>
    %148 = tpu.matmul %145, %147, %cst_140 {dimension_numbers = #tpu.dot_dimension_numbers<[1], [0], [0], [1], [0, 0, 1, 1], [], []>} : vector<64x64xbf16>, vector<64x128xbf16>, vector<64x128xf32> -> vector<64x128xf32>
    %149 = arith.addf %143, %148 : vector<64x128xf32>
    %c0_141 = arith.constant 0 : index
    %c16_142 = arith.constant 16 : index
    %c0_143 = arith.constant 0 : index
    %150 = vector.load %arg22[%c0_141, %c16_142, %c0_143] : memref<2x64x128xbf16, #tpu.memory_space<vmem>>, vector<2x32x64xbf16>
    %151 = vector.shape_cast %150 : vector<2x32x64xbf16> to vector<64x64xbf16>
    %c2_144 = arith.constant 2 : index
    %c0_145 = arith.constant 0 : index
    %c0_146 = arith.constant 0 : index
    %152 = vector.load %arg6[%c2_144, %c0_145, %c0_146] : memref<5x64x128xbf16, #tpu.memory_space<vmem>>, vector<1x64x128xbf16>
    %153 = vector.shape_cast %152 : vector<1x64x128xbf16> to vector<64x128xbf16>
    %cst_147 = arith.constant dense<0.000000e+00> : vector<64x128xf32>
    %154 = tpu.matmul %151, %153, %cst_147 {dimension_numbers = #tpu.dot_dimension_numbers<[1], [0], [0], [1], [0, 0, 1, 1], [], []>} : vector<64x64xbf16>, vector<64x128xbf16>, vector<64x128xf32> -> vector<64x128xf32>
    %155 = arith.addf %149, %154 : vector<64x128xf32>
    %c0_148 = arith.constant 0 : index
    %c17_149 = arith.constant 17 : index
    %c0_150 = arith.constant 0 : index
    %156 = vector.load %arg22[%c0_148, %c17_149, %c0_150] : memref<2x64x128xbf16, #tpu.memory_space<vmem>>, vector<2x32x64xbf16>
    %157 = vector.shape_cast %156 : vector<2x32x64xbf16> to vector<64x64xbf16>
    %c3_151 = arith.constant 3 : index
    %c0_152 = arith.constant 0 : index
    %c0_153 = arith.constant 0 : index
    %158 = vector.load %arg6[%c3_151, %c0_152, %c0_153] : memref<5x64x128xbf16, #tpu.memory_space<vmem>>, vector<1x64x128xbf16>
    %159 = vector.shape_cast %158 : vector<1x64x128xbf16> to vector<64x128xbf16>
    %cst_154 = arith.constant dense<0.000000e+00> : vector<64x128xf32>
    %160 = tpu.matmul %157, %159, %cst_154 {dimension_numbers = #tpu.dot_dimension_numbers<[1], [0], [0], [1], [0, 0, 1, 1], [], []>} : vector<64x64xbf16>, vector<64x128xbf16>, vector<64x128xf32> -> vector<64x128xf32>
    %161 = arith.addf %155, %160 : vector<64x128xf32>
    %c0_155 = arith.constant 0 : index
    %c18_156 = arith.constant 18 : index
    %c0_157 = arith.constant 0 : index
    %162 = vector.load %arg22[%c0_155, %c18_156, %c0_157] : memref<2x64x128xbf16, #tpu.memory_space<vmem>>, vector<2x32x64xbf16>
    %163 = vector.shape_cast %162 : vector<2x32x64xbf16> to vector<64x64xbf16>
    %c4_158 = arith.constant 4 : index
    %c0_159 = arith.constant 0 : index
    %c0_160 = arith.constant 0 : index
    %164 = vector.load %arg6[%c4_158, %c0_159, %c0_160] : memref<5x64x128xbf16, #tpu.memory_space<vmem>>, vector<1x64x128xbf16>
    %165 = vector.shape_cast %164 : vector<1x64x128xbf16> to vector<64x128xbf16>
    %cst_161 = arith.constant dense<0.000000e+00> : vector<64x128xf32>
    %166 = tpu.matmul %163, %165, %cst_161 {dimension_numbers = #tpu.dot_dimension_numbers<[1], [0], [0], [1], [0, 0, 1, 1], [], []>} : vector<64x64xbf16>, vector<64x128xbf16>, vector<64x128xf32> -> vector<64x128xf32>
    %167 = arith.addf %161, %166 : vector<64x128xf32>
    %c0_162 = arith.constant 0 : index
    %c0_163 = arith.constant 0 : index
    %168 = vector.load %arg7[%c0_162, %c0_163] : memref<1x128xf32, #tpu.memory_space<vmem>>, vector<1x128xf32>
    %169 = vector.broadcast %168 : vector<1x128xf32> to vector<64x128xf32>
    %170 = arith.addf %167, %169 : vector<64x128xf32>
    %cst_164 = arith.constant 0.000000e+00 : f32
    %171 = vector.broadcast %cst_164 : f32 to vector<64x128xf32>
    %172 = arith.maximumf %170, %171 : vector<64x128xf32>
    %173 = vector.shape_cast %172 : vector<64x128xf32> to vector<2x32x128xf32>
    %c18_i32_165 = arith.constant 18 : i32
    %174 = vector.broadcast %c18_i32_165 : i32 to vector<32x128xi32>
    %175 = arith.cmpi slt, %8, %174 : vector<32x128xi32>
    %cst_166 = arith.constant 0.000000e+00 : f32
    %176 = vector.shape_cast %175 : vector<32x128xi1> to vector<1x32x128xi1>
    %177 = vector.broadcast %176 : vector<1x32x128xi1> to vector<2x32x128xi1>
    %178 = vector.broadcast %cst_166 : f32 to vector<2x32x128xf32>
    %179 = arith.select %177, %173, %178 : vector<2x32x128xi1>, vector<2x32x128xf32>
    %180 = arith.truncf %179 : vector<2x32x128xf32> to vector<2x32x128xbf16>
    %c0_167 = arith.constant 0 : index
    %c16_168 = arith.constant 16 : index
    %c0_169 = arith.constant 0 : index
    %181 = vector.load %arg21[%c0_167, %c16_168, %c0_169] : memref<2x64x128xbf16, #tpu.memory_space<vmem>>, vector<2x32x128xbf16>
    tpu.vector_store %arg21[%c0_167, %c16_168, %c0_169], %180 {strides = array<i32>} : memref<2x64x128xbf16, #tpu.memory_space<vmem>>, vector<2x32x128xbf16>,
    %cst_170 = arith.constant 0.000000e+00 : f32
    %182 = vector.broadcast %cst_170 : f32 to vector<64x128xf32>
    %c0_171 = arith.constant 0 : index
    %c14_172 = arith.constant 14 : index
    %c0_173 = arith.constant 0 : index
    %183 = vector.load %arg21[%c0_171, %c14_172, %c0_173] : memref<2x64x128xbf16, #tpu.memory_space<vmem>>, vector<2x32x128xbf16>
    %184 = vector.shape_cast %183 : vector<2x32x128xbf16> to vector<64x128xbf16>
    %c0_174 = arith.constant 0 : index
    %c0_175 = arith.constant 0 : index
    %c0_176 = arith.constant 0 : index
    %185 = vector.load %arg8[%c0_174, %c0_175, %c0_176] : memref<5x128x128xbf16, #tpu.memory_space<vmem>>, vector<1x128x128xbf16>
    %186 = vector.shape_cast %185 : vector<1x128x128xbf16> to vector<128x128xbf16>
    %cst_177 = arith.constant dense<0.000000e+00> : vector<64x128xf32>
    %187 = tpu.matmul %184, %186, %cst_177 {dimension_numbers = #tpu.dot_dimension_numbers<[1], [0], [0], [1], [0, 0, 1, 1], [], []>} : vector<64x128xbf16>, vector<128x128xbf16>, vector<64x128xf32> -> vector<64x128xf32>
    %188 = arith.addf %182, %187 : vector<64x128xf32>
    %c0_178 = arith.constant 0 : index
    %c15_179 = arith.constant 15 : index
    %c0_180 = arith.constant 0 : index
    %189 = vector.load %arg21[%c0_178, %c15_179, %c0_180] : memref<2x64x128xbf16, #tpu.memory_space<vmem>>, vector<2x32x128xbf16>
    %190 = vector.shape_cast %189 : vector<2x32x128xbf16> to vector<64x128xbf16>
    %c1_181 = arith.constant 1 : index
    %c0_182 = arith.constant 0 : index
    %c0_183 = arith.constant 0 : index
    %191 = vector.load %arg8[%c1_181, %c0_182, %c0_183] : memref<5x128x128xbf16, #tpu.memory_space<vmem>>, vector<1x128x128xbf16>
    %192 = vector.shape_cast %191 : vector<1x128x128xbf16> to vector<128x128xbf16>
    %cst_184 = arith.constant dense<0.000000e+00> : vector<64x128xf32>
    %193 = tpu.matmul %190, %192, %cst_184 {dimension_numbers = #tpu.dot_dimension_numbers<[1], [0], [0], [1], [0, 0, 1, 1], [], []>} : vector<64x128xbf16>, vector<128x128xbf16>, vector<64x128xf32> -> vector<64x128xf32>
    %194 = arith.addf %188, %193 : vector<64x128xf32>
    %c0_185 = arith.constant 0 : index
    %c16_186 = arith.constant 16 : index
    %c0_187 = arith.constant 0 : index
    %195 = vector.load %arg21[%c0_185, %c16_186, %c0_187] : memref<2x64x128xbf16, #tpu.memory_space<vmem>>, vector<2x32x128xbf16>
    %196 = vector.shape_cast %195 : vector<2x32x128xbf16> to vector<64x128xbf16>
    %c2_188 = arith.constant 2 : index
    %c0_189 = arith.constant 0 : index
    %c0_190 = arith.constant 0 : index
    %197 = vector.load %arg8[%c2_188, %c0_189, %c0_190] : memref<5x128x128xbf16, #tpu.memory_space<vmem>>, vector<1x128x128xbf16>
    %198 = vector.shape_cast %197 : vector<1x128x128xbf16> to vector<128x128xbf16>
    %cst_191 = arith.constant dense<0.000000e+00> : vector<64x128xf32>
    %199 = tpu.matmul %196, %198, %cst_191 {dimension_numbers = #tpu.dot_dimension_numbers<[1], [0], [0], [1], [0, 0, 1, 1], [], []>} : vector<64x128xbf16>, vector<128x128xbf16>, vector<64x128xf32> -> vector<64x128xf32>
    %200 = arith.addf %194, %199 : vector<64x128xf32>
    %c0_192 = arith.constant 0 : index
    %c17_193 = arith.constant 17 : index
    %c0_194 = arith.constant 0 : index
    %201 = vector.load %arg21[%c0_192, %c17_193, %c0_194] : memref<2x64x128xbf16, #tpu.memory_space<vmem>>, vector<2x32x128xbf16>
    %202 = vector.shape_cast %201 : vector<2x32x128xbf16> to vector<64x128xbf16>
    %c3_195 = arith.constant 3 : index
    %c0_196 = arith.constant 0 : index
    %c0_197 = arith.constant 0 : index
    %203 = vector.load %arg8[%c3_195, %c0_196, %c0_197] : memref<5x128x128xbf16, #tpu.memory_space<vmem>>, vector<1x128x128xbf16>
    %204 = vector.shape_cast %203 : vector<1x128x128xbf16> to vector<128x128xbf16>
    %cst_198 = arith.constant dense<0.000000e+00> : vector<64x128xf32>
    %205 = tpu.matmul %202, %204, %cst_198 {dimension_numbers = #tpu.dot_dimension_numbers<[1], [0], [0], [1], [0, 0, 1, 1], [], []>} : vector<64x128xbf16>, vector<128x128xbf16>, vector<64x128xf32> -> vector<64x128xf32>
    %206 = arith.addf %200, %205 : vector<64x128xf32>
    %c0_199 = arith.constant 0 : index
    %c18_200 = arith.constant 18 : index
    %c0_201 = arith.constant 0 : index
    %207 = vector.load %arg21[%c0_199, %c18_200, %c0_201] : memref<2x64x128xbf16, #tpu.memory_space<vmem>>, vector<2x32x128xbf16>
    %208 = vector.shape_cast %207 : vector<2x32x128xbf16> to vector<64x128xbf16>
    %c4_202 = arith.constant 4 : index
    %c0_203 = arith.constant 0 : index
    %c0_204 = arith.constant 0 : index
    %209 = vector.load %arg8[%c4_202, %c0_203, %c0_204] : memref<5x128x128xbf16, #tpu.memory_space<vmem>>, vector<1x128x128xbf16>
    %210 = vector.shape_cast %209 : vector<1x128x128xbf16> to vector<128x128xbf16>
    %cst_205 = arith.constant dense<0.000000e+00> : vector<64x128xf32>
    %211 = tpu.matmul %208, %210, %cst_205 {dimension_numbers = #tpu.dot_dimension_numbers<[1], [0], [0], [1], [0, 0, 1, 1], [], []>} : vector<64x128xbf16>, vector<128x128xbf16>, vector<64x128xf32> -> vector<64x128xf32>
    %212 = arith.addf %206, %211 : vector<64x128xf32>
    %c0_206 = arith.constant 0 : index
    %c0_207 = arith.constant 0 : index
    %213 = vector.load %arg9[%c0_206, %c0_207] : memref<1x128xf32, #tpu.memory_space<vmem>>, vector<1x128xf32>
    %214 = vector.broadcast %213 : vector<1x128xf32> to vector<64x128xf32>
    %215 = arith.addf %212, %214 : vector<64x128xf32>
    %cst_208 = arith.constant 0.000000e+00 : f32
    %216 = vector.broadcast %cst_208 : f32 to vector<64x128xf32>
    %217 = arith.maximumf %215, %216 : vector<64x128xf32>
    %218 = vector.shape_cast %217 : vector<64x128xf32> to vector<2x32x128xf32>
    %c18_i32_209 = arith.constant 18 : i32
    %219 = vector.broadcast %c18_i32_209 : i32 to vector<32x128xi32>
    %220 = arith.cmpi slt, %8, %219 : vector<32x128xi32>
    %cst_210 = arith.constant 0.000000e+00 : f32
    %221 = vector.shape_cast %220 : vector<32x128xi1> to vector<1x32x128xi1>
    %222 = vector.broadcast %221 : vector<1x32x128xi1> to vector<2x32x128xi1>
    %223 = vector.broadcast %cst_210 : f32 to vector<2x32x128xf32>
    %224 = arith.select %222, %218, %223 : vector<2x32x128xi1>, vector<2x32x128xf32>
    %225 = arith.truncf %224 : vector<2x32x128xf32> to vector<2x32x128xbf16>
    %c0_211 = arith.constant 0 : index
    %c16_212 = arith.constant 16 : index
    %c0_213 = arith.constant 0 : index
    %226 = vector.load %arg22[%c0_211, %c16_212, %c0_213] : memref<2x64x128xbf16, #tpu.memory_space<vmem>>, vector<2x32x128xbf16>
    tpu.vector_store %arg22[%c0_211, %c16_212, %c0_213], %225 {strides = array<i32>} : memref<2x64x128xbf16, #tpu.memory_space<vmem>>, vector<2x32x128xbf16>,
    %cst_214 = arith.constant 0.000000e+00 : f32
    %227 = vector.broadcast %cst_214 : f32 to vector<64x64xf32>
    %c0_215 = arith.constant 0 : index
    %c15_216 = arith.constant 15 : index
    %c0_217 = arith.constant 0 : index
    %228 = vector.load %arg22[%c0_215, %c15_216, %c0_217] : memref<2x64x128xbf16, #tpu.memory_space<vmem>>, vector<2x32x128xbf16>
    %229 = vector.shape_cast %228 : vector<2x32x128xbf16> to vector<64x128xbf16>
    %c0_218 = arith.constant 0 : index
    %c0_219 = arith.constant 0 : index
    %c0_220 = arith.constant 0 : index
    %230 = vector.load %arg10[%c0_218, %c0_219, %c0_220] : memref<3x128x64xbf16, #tpu.memory_space<vmem>>, vector<1x128x64xbf16>
    %231 = vector.shape_cast %230 : vector<1x128x64xbf16> to vector<128x64xbf16>
    %cst_221 = arith.constant dense<0.000000e+00> : vector<64x64xf32>
    %232 = tpu.matmul %229, %231, %cst_221 {dimension_numbers = #tpu.dot_dimension_numbers<[1], [0], [0], [1], [0, 0, 1, 1], [], []>} : vector<64x128xbf16>, vector<128x64xbf16>, vector<64x64xf32> -> vector<64x64xf32>
    %233 = arith.addf %227, %232 : vector<64x64xf32>
    %c0_222 = arith.constant 0 : index
    %c16_223 = arith.constant 16 : index
    %c0_224 = arith.constant 0 : index
    %234 = vector.load %arg22[%c0_222, %c16_223, %c0_224] : memref<2x64x128xbf16, #tpu.memory_space<vmem>>, vector<2x32x128xbf16>
    %235 = vector.shape_cast %234 : vector<2x32x128xbf16> to vector<64x128xbf16>
    %c1_225 = arith.constant 1 : index
    %c0_226 = arith.constant 0 : index
    %c0_227 = arith.constant 0 : index
    %236 = vector.load %arg10[%c1_225, %c0_226, %c0_227] : memref<3x128x64xbf16, #tpu.memory_space<vmem>>, vector<1x128x64xbf16>
    %237 = vector.shape_cast %236 : vector<1x128x64xbf16> to vector<128x64xbf16>
    %cst_228 = arith.constant dense<0.000000e+00> : vector<64x64xf32>
    %238 = tpu.matmul %235, %237, %cst_228 {dimension_numbers = #tpu.dot_dimension_numbers<[1], [0], [0], [1], [0, 0, 1, 1], [], []>} : vector<64x128xbf16>, vector<128x64xbf16>, vector<64x64xf32> -> vector<64x64xf32>
    %239 = arith.addf %233, %238 : vector<64x64xf32>
    %c0_229 = arith.constant 0 : index
    %c17_230 = arith.constant 17 : index
    %c0_231 = arith.constant 0 : index
    %240 = vector.load %arg22[%c0_229, %c17_230, %c0_231] : memref<2x64x128xbf16, #tpu.memory_space<vmem>>, vector<2x32x128xbf16>
    %241 = vector.shape_cast %240 : vector<2x32x128xbf16> to vector<64x128xbf16>
    %c2_232 = arith.constant 2 : index
    %c0_233 = arith.constant 0 : index
    %c0_234 = arith.constant 0 : index
    %242 = vector.load %arg10[%c2_232, %c0_233, %c0_234] : memref<3x128x64xbf16, #tpu.memory_space<vmem>>, vector<1x128x64xbf16>
    %243 = vector.shape_cast %242 : vector<1x128x64xbf16> to vector<128x64xbf16>
    %cst_235 = arith.constant dense<0.000000e+00> : vector<64x64xf32>
    %244 = tpu.matmul %241, %243, %cst_235 {dimension_numbers = #tpu.dot_dimension_numbers<[1], [0], [0], [1], [0, 0, 1, 1], [], []>} : vector<64x128xbf16>, vector<128x64xbf16>, vector<64x64xf32> -> vector<64x64xf32>
    %245 = arith.addf %239, %244 : vector<64x64xf32>
    %c0_236 = arith.constant 0 : index
    %c0_237 = arith.constant 0 : index
    %246 = vector.load %arg11[%c0_236, %c0_237] : memref<1x64xf32, #tpu.memory_space<vmem>>, vector<1x64xf32>
    %247 = vector.broadcast %246 : vector<1x64xf32> to vector<64x64xf32>
    %248 = arith.addf %245, %247 : vector<64x64xf32>
    %cst_238 = arith.constant 0.000000e+00 : f32
    %249 = vector.broadcast %cst_238 : f32 to vector<64x64xf32>
    %250 = arith.maximumf %248, %249 : vector<64x64xf32>
    %251 = vector.shape_cast %250 : vector<64x64xf32> to vector<2x32x64xf32>
    %252 = vector.extract_strided_slice %8 {offsets = [0, 0], sizes = [32, 64], strides = [1, 1]} : vector<32x128xi32> to vector<32x64xi32>
    %c18_i32_239 = arith.constant 18 : i32
    %253 = vector.broadcast %c18_i32_239 : i32 to vector<32x64xi32>
    %254 = arith.cmpi slt, %252, %253 : vector<32x64xi32>
    %cst_240 = arith.constant 0.000000e+00 : f32
    %255 = vector.shape_cast %254 : vector<32x64xi1> to vector<1x32x64xi1>
    %256 = vector.broadcast %255 : vector<1x32x64xi1> to vector<2x32x64xi1>
    %257 = vector.broadcast %cst_240 : f32 to vector<2x32x64xf32>
    %258 = arith.select %256, %251, %257 : vector<2x32x64xi1>, vector<2x32x64xf32>
    %259 = arith.truncf %258 : vector<2x32x64xf32> to vector<2x32x64xbf16>
    %c0_241 = arith.constant 0 : index
    %c16_242 = arith.constant 16 : index
    %c0_243 = arith.constant 0 : index
    %260 = vector.load %arg21[%c0_241, %c16_242, %c0_243] : memref<2x64x128xbf16, #tpu.memory_space<vmem>>, vector<2x32x64xbf16>
    tpu.vector_store %arg21[%c0_241, %c16_242, %c0_243], %259 {strides = array<i32>} : memref<2x64x128xbf16, #tpu.memory_space<vmem>>, vector<2x32x64xbf16>,
    %cst_244 = arith.constant 0.000000e+00 : f32
    %261 = vector.broadcast %cst_244 : f32 to vector<64x64xf32>
    %c0_245 = arith.constant 0 : index
    %c15_246 = arith.constant 15 : index
    %c0_247 = arith.constant 0 : index
    %262 = vector.load %arg21[%c0_245, %c15_246, %c0_247] : memref<2x64x128xbf16, #tpu.memory_space<vmem>>, vector<2x32x64xbf16>
    %263 = vector.shape_cast %262 : vector<2x32x64xbf16> to vector<64x64xbf16>
    %c0_248 = arith.constant 0 : index
    %c0_249 = arith.constant 0 : index
    %c0_250 = arith.constant 0 : index
    %264 = vector.load %arg12[%c0_248, %c0_249, %c0_250] : memref<3x64x64xbf16, #tpu.memory_space<vmem>>, vector<1x64x64xbf16>
    %265 = vector.shape_cast %264 : vector<1x64x64xbf16> to vector<64x64xbf16>
    %cst_251 = arith.constant dense<0.000000e+00> : vector<64x64xf32>
    %266 = tpu.matmul %263, %265, %cst_251 {dimension_numbers = #tpu.dot_dimension_numbers<[1], [0], [0], [1], [0, 0, 1, 1], [], []>} : vector<64x64xbf16>, vector<64x64xbf16>, vector<64x64xf32> -> vector<64x64xf32>
    %267 = arith.addf %261, %266 : vector<64x64xf32>
    %c0_252 = arith.constant 0 : index
    %c16_253 = arith.constant 16 : index
    %c0_254 = arith.constant 0 : index
    %268 = vector.load %arg21[%c0_252, %c16_253, %c0_254] : memref<2x64x128xbf16, #tpu.memory_space<vmem>>, vector<2x32x64xbf16>
    %269 = vector.shape_cast %268 : vector<2x32x64xbf16> to vector<64x64xbf16>
    %c1_255 = arith.constant 1 : index
    %c0_256 = arith.constant 0 : index
    %c0_257 = arith.constant 0 : index
    %270 = vector.load %arg12[%c1_255, %c0_256, %c0_257] : memref<3x64x64xbf16, #tpu.memory_space<vmem>>, vector<1x64x64xbf16>
    %271 = vector.shape_cast %270 : vector<1x64x64xbf16> to vector<64x64xbf16>
    %cst_258 = arith.constant dense<0.000000e+00> : vector<64x64xf32>
    %272 = tpu.matmul %269, %271, %cst_258 {dimension_numbers = #tpu.dot_dimension_numbers<[1], [0], [0], [1], [0, 0, 1, 1], [], []>} : vector<64x64xbf16>, vector<64x64xbf16>, vector<64x64xf32> -> vector<64x64xf32>
    %273 = arith.addf %267, %272 : vector<64x64xf32>
    %c0_259 = arith.constant 0 : index
    %c17_260 = arith.constant 17 : index
    %c0_261 = arith.constant 0 : index
    %274 = vector.load %arg21[%c0_259, %c17_260, %c0_261] : memref<2x64x128xbf16, #tpu.memory_space<vmem>>, vector<2x32x64xbf16>
    %275 = vector.shape_cast %274 : vector<2x32x64xbf16> to vector<64x64xbf16>
    %c2_262 = arith.constant 2 : index
    %c0_263 = arith.constant 0 : index
    %c0_264 = arith.constant 0 : index
    %276 = vector.load %arg12[%c2_262, %c0_263, %c0_264] : memref<3x64x64xbf16, #tpu.memory_space<vmem>>, vector<1x64x64xbf16>
    %277 = vector.shape_cast %276 : vector<1x64x64xbf16> to vector<64x64xbf16>
    %cst_265 = arith.constant dense<0.000000e+00> : vector<64x64xf32>
    %278 = tpu.matmul %275, %277, %cst_265 {dimension_numbers = #tpu.dot_dimension_numbers<[1], [0], [0], [1], [0, 0, 1, 1], [], []>} : vector<64x64xbf16>, vector<64x64xbf16>, vector<64x64xf32> -> vector<64x64xf32>
    %279 = arith.addf %273, %278 : vector<64x64xf32>
    %c0_266 = arith.constant 0 : index
    %c0_267 = arith.constant 0 : index
    %280 = vector.load %arg13[%c0_266, %c0_267] : memref<1x64xf32, #tpu.memory_space<vmem>>, vector<1x64xf32>
    %281 = vector.broadcast %280 : vector<1x64xf32> to vector<64x64xf32>
    %282 = arith.addf %279, %281 : vector<64x64xf32>
    %cst_268 = arith.constant 0.000000e+00 : f32
    %283 = vector.broadcast %cst_268 : f32 to vector<64x64xf32>
    %284 = arith.maximumf %282, %283 : vector<64x64xf32>
    %285 = vector.shape_cast %284 : vector<64x64xf32> to vector<2x32x64xf32>
    %286 = vector.extract_strided_slice %8 {offsets = [0, 0], sizes = [32, 64], strides = [1, 1]} : vector<32x128xi32> to vector<32x64xi32>
    %c18_i32_269 = arith.constant 18 : i32
    %287 = vector.broadcast %c18_i32_269 : i32 to vector<32x64xi32>
    %288 = arith.cmpi slt, %286, %287 : vector<32x64xi32>
    %cst_270 = arith.constant 0.000000e+00 : f32
    %289 = vector.shape_cast %288 : vector<32x64xi1> to vector<1x32x64xi1>
    %290 = vector.broadcast %289 : vector<1x32x64xi1> to vector<2x32x64xi1>
    %291 = vector.broadcast %cst_270 : f32 to vector<2x32x64xf32>
    %292 = arith.select %290, %285, %291 : vector<2x32x64xi1>, vector<2x32x64xf32>
    %293 = arith.truncf %292 : vector<2x32x64xf32> to vector<2x32x64xbf16>
    %c0_271 = arith.constant 0 : index
    %c16_272 = arith.constant 16 : index
    %c0_273 = arith.constant 0 : index
    %294 = vector.load %arg22[%c0_271, %c16_272, %c0_273] : memref<2x64x128xbf16, #tpu.memory_space<vmem>>, vector<2x32x64xbf16>
    tpu.vector_store %arg22[%c0_271, %c16_272, %c0_273], %293 {strides = array<i32>} : memref<2x64x128xbf16, #tpu.memory_space<vmem>>, vector<2x32x64xbf16>,
    %cst_274 = arith.constant 0.000000e+00 : f32
    %295 = vector.broadcast %cst_274 : f32 to vector<64x64xf32>
    %c0_275 = arith.constant 0 : index
    %c15_276 = arith.constant 15 : index
    %c0_277 = arith.constant 0 : index
    %296 = vector.load %arg22[%c0_275, %c15_276, %c0_277] : memref<2x64x128xbf16, #tpu.memory_space<vmem>>, vector<2x32x64xbf16>
    %297 = vector.shape_cast %296 : vector<2x32x64xbf16> to vector<64x64xbf16>
    %c0_278 = arith.constant 0 : index
    %c0_279 = arith.constant 0 : index
    %c0_280 = arith.constant 0 : index
    %298 = vector.load %arg14[%c0_278, %c0_279, %c0_280] : memref<3x64x64xbf16, #tpu.memory_space<vmem>>, vector<1x64x64xbf16>
    %299 = vector.shape_cast %298 : vector<1x64x64xbf16> to vector<64x64xbf16>
    %cst_281 = arith.constant dense<0.000000e+00> : vector<64x64xf32>
    %300 = tpu.matmul %297, %299, %cst_281 {dimension_numbers = #tpu.dot_dimension_numbers<[1], [0], [0], [1], [0, 0, 1, 1], [], []>} : vector<64x64xbf16>, vector<64x64xbf16>, vector<64x64xf32> -> vector<64x64xf32>
    %301 = arith.addf %295, %300 : vector<64x64xf32>
    %c0_282 = arith.constant 0 : index
    %c16_283 = arith.constant 16 : index
    %c0_284 = arith.constant 0 : index
    %302 = vector.load %arg22[%c0_282, %c16_283, %c0_284] : memref<2x64x128xbf16, #tpu.memory_space<vmem>>, vector<2x32x64xbf16>
    %303 = vector.shape_cast %302 : vector<2x32x64xbf16> to vector<64x64xbf16>
    %c1_285 = arith.constant 1 : index
    %c0_286 = arith.constant 0 : index
    %c0_287 = arith.constant 0 : index
    %304 = vector.load %arg14[%c1_285, %c0_286, %c0_287] : memref<3x64x64xbf16, #tpu.memory_space<vmem>>, vector<1x64x64xbf16>
    %305 = vector.shape_cast %304 : vector<1x64x64xbf16> to vector<64x64xbf16>
    %cst_288 = arith.constant dense<0.000000e+00> : vector<64x64xf32>
    %306 = tpu.matmul %303, %305, %cst_288 {dimension_numbers = #tpu.dot_dimension_numbers<[1], [0], [0], [1], [0, 0, 1, 1], [], []>} : vector<64x64xbf16>, vector<64x64xbf16>, vector<64x64xf32> -> vector<64x64xf32>
    %307 = arith.addf %301, %306 : vector<64x64xf32>
    %c0_289 = arith.constant 0 : index
    %c17_290 = arith.constant 17 : index
    %c0_291 = arith.constant 0 : index
    %308 = vector.load %arg22[%c0_289, %c17_290, %c0_291] : memref<2x64x128xbf16, #tpu.memory_space<vmem>>, vector<2x32x64xbf16>
    %309 = vector.shape_cast %308 : vector<2x32x64xbf16> to vector<64x64xbf16>
    %c2_292 = arith.constant 2 : index
    %c0_293 = arith.constant 0 : index
    %c0_294 = arith.constant 0 : index
    %310 = vector.load %arg14[%c2_292, %c0_293, %c0_294] : memref<3x64x64xbf16, #tpu.memory_space<vmem>>, vector<1x64x64xbf16>
    %311 = vector.shape_cast %310 : vector<1x64x64xbf16> to vector<64x64xbf16>
    %cst_295 = arith.constant dense<0.000000e+00> : vector<64x64xf32>
    %312 = tpu.matmul %309, %311, %cst_295 {dimension_numbers = #tpu.dot_dimension_numbers<[1], [0], [0], [1], [0, 0, 1, 1], [], []>} : vector<64x64xbf16>, vector<64x64xbf16>, vector<64x64xf32> -> vector<64x64xf32>
    %313 = arith.addf %307, %312 : vector<64x64xf32>
    %c0_296 = arith.constant 0 : index
    %c0_297 = arith.constant 0 : index
    %314 = vector.load %arg15[%c0_296, %c0_297] : memref<1x64xf32, #tpu.memory_space<vmem>>, vector<1x64xf32>
    %315 = vector.broadcast %314 : vector<1x64xf32> to vector<64x64xf32>
    %316 = arith.addf %313, %315 : vector<64x64xf32>
    %cst_298 = arith.constant 0.000000e+00 : f32
    %317 = vector.broadcast %cst_298 : f32 to vector<64x64xf32>
    %318 = arith.maximumf %316, %317 : vector<64x64xf32>
    %319 = vector.shape_cast %318 : vector<64x64xf32> to vector<2x32x64xf32>
    %320 = vector.extract_strided_slice %8 {offsets = [0, 0], sizes = [32, 64], strides = [1, 1]} : vector<32x128xi32> to vector<32x64xi32>
    %c18_i32_299 = arith.constant 18 : i32
    %321 = vector.broadcast %c18_i32_299 : i32 to vector<32x64xi32>
    %322 = arith.cmpi slt, %320, %321 : vector<32x64xi32>
    %cst_300 = arith.constant 0.000000e+00 : f32
    %323 = vector.shape_cast %322 : vector<32x64xi1> to vector<1x32x64xi1>
    %324 = vector.broadcast %323 : vector<1x32x64xi1> to vector<2x32x64xi1>
    %325 = vector.broadcast %cst_300 : f32 to vector<2x32x64xf32>
    %326 = arith.select %324, %319, %325 : vector<2x32x64xi1>, vector<2x32x64xf32>
    %327 = arith.truncf %326 : vector<2x32x64xf32> to vector<2x32x64xbf16>
    %c0_301 = arith.constant 0 : index
    %c16_302 = arith.constant 16 : index
    %c0_303 = arith.constant 0 : index
    %328 = vector.load %arg21[%c0_301, %c16_302, %c0_303] : memref<2x64x128xbf16, #tpu.memory_space<vmem>>, vector<2x32x64xbf16>
    tpu.vector_store %arg21[%c0_301, %c16_302, %c0_303], %327 {strides = array<i32>} : memref<2x64x128xbf16, #tpu.memory_space<vmem>>, vector<2x32x64xbf16>,
    %cst_304 = arith.constant 0.000000e+00 : f32
    %329 = vector.broadcast %cst_304 : f32 to vector<64x64xf32>
    %c0_305 = arith.constant 0 : index
    %c15_306 = arith.constant 15 : index
    %c0_307 = arith.constant 0 : index
    %330 = vector.load %arg21[%c0_305, %c15_306, %c0_307] : memref<2x64x128xbf16, #tpu.memory_space<vmem>>, vector<2x32x64xbf16>
    %331 = vector.shape_cast %330 : vector<2x32x64xbf16> to vector<64x64xbf16>
    %c0_308 = arith.constant 0 : index
    %c0_309 = arith.constant 0 : index
    %c0_310 = arith.constant 0 : index
    %332 = vector.load %arg16[%c0_308, %c0_309, %c0_310] : memref<3x64x64xbf16, #tpu.memory_space<vmem>>, vector<1x64x64xbf16>
    %333 = vector.shape_cast %332 : vector<1x64x64xbf16> to vector<64x64xbf16>
    %cst_311 = arith.constant dense<0.000000e+00> : vector<64x64xf32>
    %334 = tpu.matmul %331, %333, %cst_311 {dimension_numbers = #tpu.dot_dimension_numbers<[1], [0], [0], [1], [0, 0, 1, 1], [], []>} : vector<64x64xbf16>, vector<64x64xbf16>, vector<64x64xf32> -> vector<64x64xf32>
    %335 = arith.addf %329, %334 : vector<64x64xf32>
    %c0_312 = arith.constant 0 : index
    %c16_313 = arith.constant 16 : index
    %c0_314 = arith.constant 0 : index
    %336 = vector.load %arg21[%c0_312, %c16_313, %c0_314] : memref<2x64x128xbf16, #tpu.memory_space<vmem>>, vector<2x32x64xbf16>
    %337 = vector.shape_cast %336 : vector<2x32x64xbf16> to vector<64x64xbf16>
    %c1_315 = arith.constant 1 : index
    %c0_316 = arith.constant 0 : index
    %c0_317 = arith.constant 0 : index
    %338 = vector.load %arg16[%c1_315, %c0_316, %c0_317] : memref<3x64x64xbf16, #tpu.memory_space<vmem>>, vector<1x64x64xbf16>
    %339 = vector.shape_cast %338 : vector<1x64x64xbf16> to vector<64x64xbf16>
    %cst_318 = arith.constant dense<0.000000e+00> : vector<64x64xf32>
    %340 = tpu.matmul %337, %339, %cst_318 {dimension_numbers = #tpu.dot_dimension_numbers<[1], [0], [0], [1], [0, 0, 1, 1], [], []>} : vector<64x64xbf16>, vector<64x64xbf16>, vector<64x64xf32> -> vector<64x64xf32>
    %341 = arith.addf %335, %340 : vector<64x64xf32>
    %c0_319 = arith.constant 0 : index
    %c17_320 = arith.constant 17 : index
    %c0_321 = arith.constant 0 : index
    %342 = vector.load %arg21[%c0_319, %c17_320, %c0_321] : memref<2x64x128xbf16, #tpu.memory_space<vmem>>, vector<2x32x64xbf16>
    %343 = vector.shape_cast %342 : vector<2x32x64xbf16> to vector<64x64xbf16>
    %c2_322 = arith.constant 2 : index
    %c0_323 = arith.constant 0 : index
    %c0_324 = arith.constant 0 : index
    %344 = vector.load %arg16[%c2_322, %c0_323, %c0_324] : memref<3x64x64xbf16, #tpu.memory_space<vmem>>, vector<1x64x64xbf16>
    %345 = vector.shape_cast %344 : vector<1x64x64xbf16> to vector<64x64xbf16>
    %cst_325 = arith.constant dense<0.000000e+00> : vector<64x64xf32>
    %346 = tpu.matmul %343, %345, %cst_325 {dimension_numbers = #tpu.dot_dimension_numbers<[1], [0], [0], [1], [0, 0, 1, 1], [], []>} : vector<64x64xbf16>, vector<64x64xbf16>, vector<64x64xf32> -> vector<64x64xf32>
    %347 = arith.addf %341, %346 : vector<64x64xf32>
    %c0_326 = arith.constant 0 : index
    %c0_327 = arith.constant 0 : index
    %348 = vector.load %arg17[%c0_326, %c0_327] : memref<1x64xf32, #tpu.memory_space<vmem>>, vector<1x64xf32>
    %349 = vector.broadcast %348 : vector<1x64xf32> to vector<64x64xf32>
    %350 = arith.addf %347, %349 : vector<64x64xf32>
    %cst_328 = arith.constant 0.000000e+00 : f32
    %351 = vector.broadcast %cst_328 : f32 to vector<64x64xf32>
    %352 = arith.maximumf %350, %351 : vector<64x64xf32>
    %353 = vector.shape_cast %352 : vector<64x64xf32> to vector<2x32x64xf32>
    %354 = vector.extract_strided_slice %8 {offsets = [0, 0], sizes = [32, 64], strides = [1, 1]} : vector<32x128xi32> to vector<32x64xi32>
    %c18_i32_329 = arith.constant 18 : i32
    %355 = vector.broadcast %c18_i32_329 : i32 to vector<32x64xi32>
    %356 = arith.cmpi slt, %354, %355 : vector<32x64xi32>
    %cst_330 = arith.constant 0.000000e+00 : f32
    %357 = vector.shape_cast %356 : vector<32x64xi1> to vector<1x32x64xi1>
    %358 = vector.broadcast %357 : vector<1x32x64xi1> to vector<2x32x64xi1>
    %359 = vector.broadcast %cst_330 : f32 to vector<2x32x64xf32>
    %360 = arith.select %358, %353, %359 : vector<2x32x64xi1>, vector<2x32x64xf32>
    %361 = arith.truncf %360 : vector<2x32x64xf32> to vector<2x32x64xbf16>
    %c0_331 = arith.constant 0 : index
    %c16_332 = arith.constant 16 : index
    %c0_333 = arith.constant 0 : index
    %362 = vector.load %arg22[%c0_331, %c16_332, %c0_333] : memref<2x64x128xbf16, #tpu.memory_space<vmem>>, vector<2x32x64xbf16>
    tpu.vector_store %arg22[%c0_331, %c16_332, %c0_333], %361 {strides = array<i32>} : memref<2x64x128xbf16, #tpu.memory_space<vmem>>, vector<2x32x64xbf16>,
    %c0_334 = arith.constant 0 : index
    %c16_335 = arith.constant 16 : index
    %c0_336 = arith.constant 0 : index
    %363 = vector.load %arg22[%c0_334, %c16_335, %c0_336] : memref<2x64x128xbf16, #tpu.memory_space<vmem>>, vector<2x32x64xbf16>
    %364 = arith.extf %363 : vector<2x32x64xbf16> to vector<2x32x64xf32>
    %cst_337 = arith.constant dense<0.000000e+00> : vector<2x64xf32>
    %365 = vector.multi_reduction <add>, %364, %cst_337 [1] : vector<2x32x64xf32> to vector<2x64xf32>
    %cst_338 = arith.constant 0.055555556 : f32
    %366 = vector.broadcast %cst_338 : f32 to vector<2x64xf32>
    %367 = arith.mulf %365, %366 : vector<2x64xf32>
    %c0_339 = arith.constant 0 : index
    %c0_340 = arith.constant 0 : index
    %368 = vector.load %arg18[%c0_339, %c0_340] : memref<64x128xf32, #tpu.memory_space<vmem>>, vector<64x128xf32>
    %cst_341 = arith.constant dense<0.000000e+00> : vector<2x128xf32>
    %369 = tpu.matmul %367, %368, %cst_341 {dimension_numbers = #tpu.dot_dimension_numbers<[1], [0], [0], [1], [0, 0, 1, 1], [], []>} : vector<2x64xf32>, vector<64x128xf32>, vector<2x128xf32> -> vector<2x128xf32>
    %c0_342 = arith.constant 0 : index
    %c0_343 = arith.constant 0 : index
    %370 = vector.load %arg19[%c0_342, %c0_343] : memref<1x128xf32, #tpu.memory_space<vmem>>, vector<1x128xf32>
    %371 = vector.broadcast %370 : vector<1x128xf32> to vector<2x128xf32>
    %372 = arith.addf %369, %371 : vector<2x128xf32>
    %373 = vector.shape_cast %372 : vector<2x128xf32> to vector<1x2x128xf32>
    %c0_344 = arith.constant 0 : index
    %c0_345 = arith.constant 0 : index
    %c0_346 = arith.constant 0 : index
    %374 = vector.load %arg20[%c0_344, %c0_345, %c0_346] : memref<1x2x128xf32, #tpu.memory_space<vmem>>, vector<1x2x128xf32>
    tpu.vector_store %arg20[%c0_344, %c0_345, %c0_346], %373 {strides = array<i32>} : memref<1x2x128xf32, #tpu.memory_space<vmem>>, vector<1x2x128xf32>,
    return
  }
  func.func @transform_0(%arg0: i32) -> (i32, i32, i32) {
    %c0_i32 = arith.constant 0 : i32
    %c0_i32_0 = arith.constant 0 : i32
    %c0_i32_1 = arith.constant 0 : i32
    return %arg0, %c0_i32, %c0_i32_0 : i32, i32, i32
  }
  func.func @transform_1(%arg0: i32) -> (i32, i32, i32) {
    %c0_i32 = arith.constant 0 : i32
    %c0_i32_0 = arith.constant 0 : i32
    %c0_i32_1 = arith.constant 0 : i32
    %c0_i32_2 = arith.constant 0 : i32
    return %c0_i32, %c0_i32_0, %c0_i32_1 : i32, i32, i32
  }
  func.func @transform_2(%arg0: i32) -> (i32, i32) {
    %c0_i32 = arith.constant 0 : i32
    %c0_i32_0 = arith.constant 0 : i32
    %c0_i32_1 = arith.constant 0 : i32
    return %c0_i32, %c0_i32_0 : i32, i32
  }
  func.func @transform_3(%arg0: i32) -> (i32, i32, i32) {
    %c0_i32 = arith.constant 0 : i32
    %c0_i32_0 = arith.constant 0 : i32
    %c0_i32_1 = arith.constant 0 : i32
    %c0_i32_2 = arith.constant 0 : i32
    return %c0_i32, %c0_i32_0, %c0_i32_1 : i32, i32, i32
  }
  func.func @transform_4(%arg0: i32) -> (i32, i32) {
    %c0_i32 = arith.constant 0 : i32
    %c0_i32_0 = arith.constant 0 : i32
    %c0_i32_1 = arith.constant 0 : i32
    return %c0_i32, %c0_i32_0 : i32, i32
  }
  func.func @transform_5(%arg0: i32) -> (i32, i32, i32) {
    %c0_i32 = arith.constant 0 : i32
    %c0_i32_0 = arith.constant 0 : i32
    %c0_i32_1 = arith.constant 0 : i32
    %c0_i32_2 = arith.constant 0 : i32
    return %c0_i32, %c0_i32_0, %c0_i32_1 : i32, i32, i32
  }
  func.func @transform_6(%arg0: i32) -> (i32, i32) {
    %c0_i32 = arith.constant 0 : i32
    %c0_i32_0 = arith.constant 0 : i32
    %c0_i32_1 = arith.constant 0 : i32
    return %c0_i32, %c0_i32_0 : i32, i32
  }
  func.func @transform_7(%arg0: i32) -> (i32, i32, i32) {
    %c0_i32 = arith.constant 0 : i32
    %c0_i32_0 = arith.constant 0 : i32
    %c0_i32_1 = arith.constant 0 : i32
    %c0_i32_2 = arith.constant 0 : i32
    return %c0_i32, %c0_i32_0, %c0_i32_1 : i32, i32, i32
  }
  func.func @transform_8(%arg0: i32) -> (i32, i32) {
    %c0_i32 = arith.constant 0 : i32
    %c0_i32_0 = arith.constant 0 : i32
    %c0_i32_1 = arith.constant 0 : i32
    return %c0_i32, %c0_i32_0 : i32, i32
  }
  func.func @transform_9(%arg0: i32) -> (i32, i32, i32) {
    %c0_i32 = arith.constant 0 : i32
    %c0_i32_0 = arith.constant 0 : i32
    %c0_i32_1 = arith.constant 0 : i32
    %c0_i32_2 = arith.constant 0 : i32
    return %c0_i32, %c0_i32_0, %c0_i32_1 : i32, i32, i32
  }
  func.func @transform_10(%arg0: i32) -> (i32, i32) {
    %c0_i32 = arith.constant 0 : i32
    %c0_i32_0 = arith.constant 0 : i32
    %c0_i32_1 = arith.constant 0 : i32
    return %c0_i32, %c0_i32_0 : i32, i32
  }
  func.func @transform_11(%arg0: i32) -> (i32, i32, i32) {
    %c0_i32 = arith.constant 0 : i32
    %c0_i32_0 = arith.constant 0 : i32
    %c0_i32_1 = arith.constant 0 : i32
    %c0_i32_2 = arith.constant 0 : i32
    return %c0_i32, %c0_i32_0, %c0_i32_1 : i32, i32, i32
  }
  func.func @transform_12(%arg0: i32) -> (i32, i32) {
    %c0_i32 = arith.constant 0 : i32
    %c0_i32_0 = arith.constant 0 : i32
    %c0_i32_1 = arith.constant 0 : i32
    return %c0_i32, %c0_i32_0 : i32, i32
  }
  func.func @transform_13(%arg0: i32) -> (i32, i32, i32) {
    %c0_i32 = arith.constant 0 : i32
    %c0_i32_0 = arith.constant 0 : i32
    %c0_i32_1 = arith.constant 0 : i32
    %c0_i32_2 = arith.constant 0 : i32
    return %c0_i32, %c0_i32_0, %c0_i32_1 : i32, i32, i32
  }
  func.func @transform_14(%arg0: i32) -> (i32, i32) {
    %c0_i32 = arith.constant 0 : i32
    %c0_i32_0 = arith.constant 0 : i32
    %c0_i32_1 = arith.constant 0 : i32
    return %c0_i32, %c0_i32_0 : i32, i32
  }
  func.func @transform_15(%arg0: i32) -> (i32, i32, i32) {
    %c0_i32 = arith.constant 0 : i32
    %c0_i32_0 = arith.constant 0 : i32
    %c0_i32_1 = arith.constant 0 : i32
    %c0_i32_2 = arith.constant 0 : i32
    return %c0_i32, %c0_i32_0, %c0_i32_1 : i32, i32, i32
  }
  func.func @transform_16(%arg0: i32) -> (i32, i32) {
    %c0_i32 = arith.constant 0 : i32
    %c0_i32_0 = arith.constant 0 : i32
    %c0_i32_1 = arith.constant 0 : i32
    return %c0_i32, %c0_i32_0 : i32, i32
  }
  func.func @transform_17(%arg0: i32) -> (i32, i32) {
    %c0_i32 = arith.constant 0 : i32
    %c0_i32_0 = arith.constant 0 : i32
    %c0_i32_1 = arith.constant 0 : i32
    return %c0_i32, %c0_i32_0 : i32, i32
  }
  func.func @transform_18(%arg0: i32) -> (i32, i32) {
    %c0_i32 = arith.constant 0 : i32
    %c0_i32_0 = arith.constant 0 : i32
    %c0_i32_1 = arith.constant 0 : i32
    return %c0_i32, %c0_i32_0 : i32, i32
  }
  func.func @transform_19(%arg0: i32) -> (i32, i32, i32) {
    %c0_i32 = arith.constant 0 : i32
    %c0_i32_0 = arith.constant 0 : i32
    %c0_i32_1 = arith.constant 0 : i32
    return %arg0, %c0_i32, %c0_i32_0 : i32, i32, i32
  }
}

</mosaic_0001>

<bundles_post_ra>
// kernel: tpu_custom_call.1
= control target key start
LH: loop header
LB: loop body
LE: loop exit
PB: predicated region body
PF: predicated region fallthrough
CT: control target
= control target key end

     0   :  { %s9597_s0 = inlined_call_operand.vmem [shape: bf16[2,64,4], index: 0, kind: input, shape index: {}]   ;;  %s9598_s1 = inlined_call_operand.vmem [shape: bf16[8,4,64], index: 1, kind: input, shape index: {}]   ;;  %s9599_s2 = inlined_call_operand.vmem [shape: f32[1,64], index: 2, kind: input, shape index: {}]   ;;  %s9600_s3 = inlined_call_operand.hbm [shape: bf16[8,64,64], index: 3, kind: input, shape index: {}]   ;;  %s9601_s4 = inlined_call_operand.vmem [shape: f32[1,64], index: 4, kind: input, shape index: {}]   ;;  %s9602_s5 = inlined_call_operand.hbm [shape: bf16[5,64,128], index: 5, kind: input, shape index: {}]   ;;  %s9603_s6 = inlined_call_operand.vmem [shape: f32[1,128], index: 6, kind: input, shape index: {}]   ;;  %s9604_s7 = inlined_call_operand.vmem [shape: bf16[5,128,128], index: 7, kind: input, shape index: {}]   ;;  %s9605_s8 = inlined_call_operand.vmem [shape: f32[1,128], index: 8, kind: input, shape index: {}]   ;;  %s9606_s9 = inlined_call_operand.vmem [shape: bf16[3,128,64], index: 9, kind: input, shape index: {}]   ;;  %s9607_s10 = inlined_call_operand.vmem [shape: f32[1,64], index: 10, kind: input, shape index: {}]   ;;  %s9608_s11 = inlined_call_operand.hbm [shape: bf16[3,64,64], index: 11, kind: input, shape index: {}]   ;;  %s9609_s12 = inlined_call_operand.vmem [shape: f32[1,64], index: 12, kind: input, shape index: {}]   ;;  %s9610_s13 = inlined_call_operand.hbm [shape: bf16[3,64,64], index: 13, kind: input, shape index: {}]   ;;  %s9611_s14 = inlined_call_operand.vmem [shape: f32[1,64], index: 14, kind: input, shape index: {}]   ;;  %s9612_s15 = inlined_call_operand.hbm [shape: bf16[3,64,64], index: 15, kind: input, shape index: {}]   ;;  %s9613_s16 = inlined_call_operand.vmem [shape: f32[1,64], index: 16, kind: input, shape index: {}]   ;;  %s9614_s17 = inlined_call_operand.hbm [shape: f32[64,128], index: 17, kind: input, shape index: {}]   ;;  %s9615_s18 = inlined_call_operand.vmem [shape: f32[1,128], index: 18, kind: input, shape index: {}]   ;;  %s9616_s19 = inlined_call_operand.hbm [shape: f32[1,2,128], index: 19, kind: output, shape index: {}]  }
   0x1   :  { %9619 = sst [smem:[#allocation21_spill]] %s9597_s0 }
   0x2   :  { %9620 = sst [smem:[#allocation22_spill]] %s9598_s1 }
   0x3   :  { %9621 = sst [smem:[#allocation23_spill]] %s9599_s2 }
   0x4   :  { %9622 = sst [smem:[#allocation24_spill]] %s9600_s3 }
   0x5   :  { %24 = vsyncpa [#allocation5], 0 }
   0x6   :  { %25 = vsyncpa [#allocation8], 0 }
   0x7   :  { %26 = vsyncpa [#allocation11], 0 }
   0x8   :  { %27 = vsyncpa [#allocation14], 0 }
   0x9   :  { %28 = vsyncpa [#allocation6], 0  ;;  %s54_s20 = sshll.u32 %s9602_s5, 4  ;;  %s7728_s21 = smov [#allocation7]   ;;  %s55_s20 = int_to_ptr.hbm [resolvable:$true] %s54_s20 }
   0xa   :  { %s56_s1 = sshll.u32 %s7728_s21, 4  ;;  %s92_s23 = sshll.u32 %s9610_s13, 4  ;;  %s57_s1 = int_to_ptr.vmem [resolvable:$true] %s56_s1  ;;  %s93_s23 = int_to_ptr.hbm [resolvable:$true] %s92_s23 }
   0xb   :  { %s7729_s24 = smov 64   ;;  %s7730_s25 = smov 4  }
   0xc   :  { %62 = dma.hbm_to_vmem [thread:$0]  %s55_s20, 2560, %s57_s1, [#allocation8], %s7729_s24, %s7729_s24, %s7730_s25  }
   0xd   :  { %s7731_s3 = smov [#allocation10]   ;;  %s9623_s5 = sld [smem:[#allocation24_spill]] }
   0xe   :  { %s94_s26 = sshll.u32 %s7731_s3, 4  ;;  %s77_s30 = sshll.u32 %s9608_s11, 4  ;;  %s95_s26 = int_to_ptr.vmem [resolvable:$true] %s94_s26  ;;  %s78_s30 = int_to_ptr.hbm [resolvable:$true] %s77_s30 }
   0xf   :  { %100 = dma.hbm_to_vmem [thread:$0]  %s93_s23, 1536, %s95_s26, [#allocation11], %s7729_s24, %s7729_s24, %s7730_s25  }
  0x10   :  { %s7732_s21 = smov [#allocation4]   ;;  %s7733_s20 = smov [#allocation9]  }
  0x11   :  { %s41_s22 = sshll.u32 %s7732_s21, 4  ;;  %s79_s1 = sshll.u32 %s7733_s20, 4  ;;  %s42_s22 = int_to_ptr.vmem [resolvable:$true] %s41_s22  ;;  %s80_s1 = int_to_ptr.vmem [resolvable:$true] %s79_s1 }
  0x12   :  { %s107_s27 = sshll.u32 %s9612_s15, 4  ;;  %s122_s26 = sshll.u32 %s9614_s17, 4  ;;  %s108_s27 = int_to_ptr.hbm [resolvable:$true] %s107_s27  ;;  %s123_s26 = int_to_ptr.hbm [resolvable:$true] %s122_s26 }
  0x13   :  { %s39_s29 = sshll.u32 %s9623_s5, 4  ;;  %s7734_s28 = smov [#allocation12]   ;;  %s40_s29 = int_to_ptr.hbm [resolvable:$true] %s39_s29 }
  0x14   :  { %47 = dma.hbm_to_vmem [thread:$0]  %s40_s29, 4096, %s42_s22, [#allocation5], %s7729_s24, %s7729_s24, %s7730_s25  }
  0x15   :  { %85 = dma.hbm_to_vmem [thread:$0]  %s78_s30, 1536, %s80_s1, [#allocation8], %s7729_s24, %s7729_s24, %s7730_s25  }
  0x16   :  { %s109_s5 = sshll.u32 %s7734_s28, 4  ;;  %s7735_s29 = smov [#allocation13]   ;;  %s110_s5 = int_to_ptr.vmem [resolvable:$true] %s109_s5 }
  0x17   :  { %115 = dma.hbm_to_vmem [thread:$0]  %s108_s27, 1536, %s110_s5, [#allocation11], %s7729_s24, %s7729_s24, %s7730_s25  }
  0x18   :  { %s124_s15 = sshll.u32 %s7735_s29, 4  ;;  %s7736_s13 = smov 128   ;;  %s125_s15 = int_to_ptr.vmem [resolvable:$true] %s124_s15 }
  0x19   :  { %s7737_s0 = smov 8  }
  0x1a   :  { %130 = dma.hbm_to_vmem [thread:$0]  %s123_s26, 1024, %s125_s15, [#allocation14], %s7736_s13, %s7736_s13, %s7737_s0  }
  0x1b   :  { %7718 = dma.done.wait [#allocation5], 4096  }
  0x1c   :  { %7719 = vsyncadd [#allocation5], 4294963200 }
  0x1d   :  { %7720 = dma.done.wait [#allocation8], 4096  }
  0x1e   :  { %7721 = vsyncadd [#allocation8], 4294963200 }
  0x1f   :  { %7722 = dma.done.wait [#allocation11], 3072  }
  0x20   :  { %7723 = vsyncadd [#allocation11], 4294964224 }
  0x21   :  { %7724 = dma.done.wait [#allocation14], 1024  }
  0x22   :  { %7725 = vsyncadd [#allocation14], 4294966272  ;;  %vm160_vm0 = vcmask 1041408   ;;  %vm161_vm1 = vsmask.f32 1280  ;;  %vm202_vm3 = vcmask 1045508  }
  0x23   :  { %vm7876_vm2 = vmand %vm160_vm0, %vm161_vm1  ;;  %vm453_vm4 = vcmask 1040384   ;;  %vm454_vm5 = vcmask 1044484   ;;  %vm550_vm6 = vsmask.f32 256  ;;  %vm551_vm7 = vsmask.f32 4368 }
  0x24   :  { %s9626_s25 = sld [smem:[#allocation22_spill]]  ;;  %vm345_vm8 = vcmask 31744   ;;  %vm7898_vm9 = vmor %vm160_vm0, %vm202_vm3  ;;  %vm233_vm10 = vsmask.f32 5392  ;;  %vm916_vm14 = vcmask 1042432   ;;  %vm917_vm15 = vcmask 1046532  }
  0x25   :  { %s9627_s3 = sld [smem:[#allocation21_spill]]  ;;  %vm7918_vm11 = vmor %vm453_vm4, %vm454_vm5  ;;  %vm1013_vm5 = vsmask.f32 2304  ;;  %s7740_s29 = smov [#allocation15]  }
  0x26   :  { %vm7946_vm12 = vmor %vm550_vm6, %vm551_vm7  ;;  %vm1014_vm6 = vsmask.f32 6416  ;;  %s6257_s15 = sshll.u32 %s7740_s29, 4  ;;  %s6259_s17 = sshll.u32 %s9616_s19, 4  ;;  %s6258_s15 = int_to_ptr.vmem [resolvable:$true] %s6257_s15  ;;  %s6260_s17 = int_to_ptr.hbm [resolvable:$true] %s6259_s17 }
  0x27   :  { %vm7987_vm13 = vmor %vm161_vm1, %vm233_vm10  ;;  %vm748_vm1 = vsmask.f32 7440 }
  0x28   :  { %vm8126_vm3 = vmor %vm916_vm14, %vm917_vm15  ;;  %vm1402_vm14 = vcmask 523264  }
  0x29   :  { %vm8157_vm7 = vmor %vm1013_vm5, %vm1014_vm6 }
  0x2a   :  { %v230_v1 = vld [vmem:[%s9626_s25] sm:$0x3]  ;;  %v6285_v2 = vld [vmem:[%s9626_s25 + $0x4] sm:$0x3]  ;;  %v6292_v3 = vld [vmem:[%s9626_s25 + $0x6] sm:$0x3] }
  0x2b   :  { %v416_v4 = vsel %vm160_vm0, %v230_v1, 0  ;;  %v509_v5 = vsel %vm160_vm0, %v6285_v2, 0  ;;  %v630_v6 = vsel %vm160_vm0, %v6292_v3, 0  ;;  %v7895_v7 = vld [vmem:[%s9627_s3 + $0x4] sm:$0xc] }
  0x2c   :  { %425 = vmatpush.bf16.msra.mxu1 %v416_v4  ;;  %518 = vmatpush.bf16.msra.mxu2 %v509_v5  ;;  %v183_v9 = vld [vmem:[%s9627_s3 + $0x8] sm:$0xf]  ;;  %v7908_v10 = vld [vmem:[%s9627_s3 + $0xc] sm:$0xf]  ;;  %v6272_v11 = vrot.slane %v7895_v7, 10  ;;  %v236_v12 = vshrl.u32 %v7895_v7, 16 }
  0x2d   :  { %639 = vmatpush.bf16.msra.mxu3 %v630_v6  ;;  %v206_v13 = vrot.slane %v183_v9, 6  ;;  %v209_v14 = vrot.slane %v7908_v10, 6  ;;  %v447_v15 = vld [vmem:[%s9627_s3 + $0x4] sm:$0x8]  ;;  %v458_v17 = vrot.slane %v183_v9, 7  ;;  %v461_v18 = vrot.slane %v7908_v10, 7 }
  0x2e   :  { %v6283_v19 = vrot.slane %v447_v15, 11  ;;  %v6274_v20 = vld [vmem:[%s9626_s25 + $0x2] sm:$0x3]  ;;  %v245_v21 = vshrl.u32 %v183_v9, 16  ;;  %v248_v22 = vshll.u32 %v183_v9, 16  ;;  %v255_v23 = vshrl.u32 %v7908_v10, 16 }
  0x2f   :  { %v207_v24 = vsel %vm7898_vm9, %v6272_v11, %v206_v13  ;;  %v208_v25 = vrot.slane %v206_v13, 4  ;;  %v460_v26 = vrot.slane %v458_v17, 4  ;;  %v360_v27 = vsel %vm160_vm0, %v6274_v20, 0  ;;  %v6325_v32 = vld [vmem:[%s9626_s25 + $0xc] sm:$0x3] }
  0x30   :  { %v391_v28 = vunpack.c.l.b16 %v207_v24  ;;  %v459_v29 = vsel %vm7918_vm11, %v6283_v19, %v458_v17  ;;  %369 = vmatpush.bf16.msra.mxu0 %v360_v27  ;;  %v258_v30 = vshll.u32 %v7908_v10, 16  ;;  %v554_v31 = vshrl.u32 %v447_v15, 16  ;;  %v6297_v42 = vld [vmem:[%s9626_s25 + $0x8] sm:$0x3]  ;;  %v6330_v47 = vld [vmem:[%s9626_s25 + $0xe] sm:$0x3] }
  0x31   :  { %v210_v33 = vsel %vm7898_vm9, %v208_v25, %v209_v14  ;;  %v462_v34 = vsel %vm7918_vm11, %v460_v26, %v461_v18  ;;  %v484_v35 = vunpack.c.l.b16 %v459_v29  ;;  %v558_v36 = vrot.slane %v245_v21, 7  ;;  %v6318_v52 = vld [vmem:[%s9626_s25 + $0xa] sm:$0x3]  ;;  %v7967_v53 = vld [vmem:[%s9627_s3 + $0x10] sm:$0xf]  ;;  %s9642_s25 = sld [smem:[#allocation23_spill]] }
  0x32   :  { %v392_v37 = vunpack.c.l.b16 %v210_v33  ;;  %v485_v38 = vunpack.c.l.b16 %v462_v34  ;;  %v6290_v40 = vrot.slane %v554_v31, 11  ;;  %v7950_v41 = vrot.slane %v255_v23, 7  ;;  %v186_v58 = vld [vmem:[%s9627_s3 + $0x14] sm:$0x3] }
  0x33   :  { %v559_v43 = vor.u32 %v558_v36, %v248_v22  ;;  %v561_v44 = vrot.slane %v558_v36, 4  ;;  %v972_v45 = vsel %vm160_vm0, %v6325_v32, 0  ;;  %v238_v46 = vrot.slane %v236_v12, 6  ;;  %v7981_v63 = vld [vmem:[%s9627_s3 + $0x14] sm:$0x7] }
  0x34   :  { %v399_v48 = vpack.c.b16 %v392_v37, %v391_v28  ;;  %v492_v49 = vpack.c.b16 %v485_v38, %v484_v35  ;;  %v563_v50 = vor.u32 %v7950_v41, %v258_v30  ;;  %981 = vmatpush.bf16.msrb.mxu2 %v972_v45  ;;  %v239_v51 = vshll.u32 %v7895_v7, 16  ;;  %v548_v28 = vld [vmem:[%s9627_s3 + $0x14] sm:$0xf] }
  0x35   :  { %v560_v54 = vsel %vm7946_vm12, %v6290_v40, %v559_v43  ;;  %v247_v55 = vrot.slane %v245_v21, 6  ;;  %v250_v56 = vrot.slane %v248_v22, 7  ;;  %v257_v57 = vrot.slane %v255_v23, 6 }
  0x36   :  { %6279 = vmatmul.msk.bf16.vlgmr.msra.gmra.mxu1 %vm345_vm8, %v399_v48  ;;  %6286 = vmatmul.msk.bf16.vlgmr.msra.gmra.mxu2 %vm345_vm8, %v492_v49  ;;  %v564_v59 = vsel %vm7946_vm12, %v561_v44, %v563_v50  ;;  %v605_v60 = vunpack.c.l.b16 %v560_v54  ;;  %v241_v61 = vrot.slane %v239_v51, 7  ;;  %v260_v62 = vrot.slane %v258_v30, 7 }
  0x37   :  { %v606_v1 = vunpack.c.l.b16 %v564_v59  ;;  %v251_v2 = vor.u32 %v250_v56, %v247_v55  ;;  %v698_v3 = vsel %vm160_vm0, %v6297_v42, 0  ;;  %v1109_v4 = vsel %vm160_vm0, %v6330_v47, 0  ;;  %v187_v55 = vld [vmem:[%s9627_s3 + $0x24] sm:$0xc] }
  0x38   :  { %v242_v6 = vor.u32 %v241_v61, %v238_v46  ;;  %v7991_v7 = vor.u32 %v260_v62, %v257_v57  ;;  %707 = vmatpush.bf16.msrb.mxu0 %v698_v3  ;;  %1118 = vmatpush.bf16.msrb.mxu3 %v1109_v4  ;;  %v865_v9 = vsel %vm160_vm0, %v6318_v52, 0  ;;  %v211_v11 = vrot.slane %v209_v14, 4  ;;  %v448_v56 = vld [vmem:[%s9627_s3 + $0x24] sm:$0x8] }
  0x39   :  { %v613_v12 = vpack.c.b16 %v606_v1, %v605_v60  ;;  %v253_v13 = vrot.slane %v251_v2, 4  ;;  %874 = vmatpush.bf16.msrb.mxu1 %v865_v9  ;;  %v212_v15 = vrot.slane %v7967_v53, 6  ;;  %v215_v17 = vrot.slane %v186_v58, 6  ;;  %v8039_v60 = vld [vmem:[%s9627_s3 + $0x2c] sm:$0xf] }
  0x3a   :  { %v243_v19 = vrot.slane %v242_v6, 4  ;;  %v463_v20 = vrot.slane %v461_v18, 4  ;;  %v464_v21 = vrot.slane %v7967_v53, 7  ;;  %v467_v22 = vrot.slane %v7981_v63, 7 }
  0x3b   :  { %6293 = vmatmul.msk.bf16.vlgmr.msra.gmra.mxu3 %vm345_vm8, %v613_v12  ;;  %v262_v14 = vsel %vm7987_vm13, %v253_v13, %v7991_v7  ;;  %v213_v23 = vsel %vm7898_vm9, %v211_v11, %v212_v15  ;;  %v214_v24 = vrot.slane %v212_v15, 4  ;;  %v265_v25 = vshrl.u32 %v7967_v53, 16 }
  0x3c   :  { %v252_v10 = vsel %vm7987_vm13, %v243_v19, %v251_v2  ;;  %v334_v18 = vunpack.c.l.b16 %v262_v14  ;;  %v393_v26 = vunpack.c.l.b16 %v213_v23  ;;  %v465_v27 = vsel %vm7918_vm11, %v463_v20, %v464_v21 }
  0x3d   :  { %v333_v29 = vunpack.c.l.b16 %v252_v10  ;;  %v216_v30 = vsel %vm7898_vm9, %v214_v24, %v215_v17  ;;  %v466_v31 = vrot.slane %v464_v21, 4  ;;  %v486_v32 = vunpack.c.l.b16 %v465_v27 }
  0x3e   :  { %v394_v33 = vunpack.c.l.b16 %v216_v30  ;;  %v268_v34 = vshll.u32 %v7967_v53, 16  ;;  %v565_v35 = vrot.slane %v7950_v41, 4  ;;  %v566_v36 = vrot.slane %v265_v25, 7  ;;  %v188_v41 = vld [vmem:[%s9627_s3 + $0x28] sm:$0xf] }
  0x3f   :  { %v341_v37 = vpack.c.b16 %v334_v18, %v333_v29  ;;  %v468_v38 = vsel %vm7918_vm11, %v466_v31, %v467_v22  ;;  %v571_v40 = vshrl.u32 %v548_v28, 16  ;;  %v574_v42 = vshll.u32 %v548_v28, 16 }
  0x40   :  { %v400_v43 = vpack.c.b16 %v394_v33, %v393_v26  ;;  %v487_v44 = vunpack.c.l.b16 %v468_v38  ;;  %v567_v45 = vor.u32 %v566_v36, %v268_v34  ;;  %v569_v46 = vrot.slane %v566_v36, 4 }
  0x41   :  { %6275 = vmatmul.msk.bf16.vlgmr.msra.gmra.mxu0 %vm345_vm8, %v341_v37  ;;  %v573_v47 = vrot.slane %v571_v40, 7  ;;  %v263_v48 = vrot.slane %v7991_v7, 4  ;;  %v267_v49 = vrot.slane %v265_v25, 6  ;;  %v270_v50 = vrot.slane %v268_v34, 7 }
  0x42   :  { %v493_v51 = vpack.c.b16 %v487_v44, %v486_v32  ;;  %v568_v52 = vsel %vm7946_vm12, %v565_v35, %v567_v45  ;;  %v275_v53 = vshrl.u32 %v7981_v63, 16  ;;  %v278_v54 = vshll.u32 %v7981_v63, 16 }
  0x43   :  { %v576_v57 = vor.u32 %v574_v42, %v573_v47  ;;  %v607_v58 = vunpack.c.l.b16 %v568_v52  ;;  %v271_v59 = vor.u32 %v270_v50, %v267_v49  ;;  %v6273_v61 = vrot.slane %v187_v55, 10  ;;  %v190_v47 = vld [vmem:[%s9627_s3 + $0x30] sm:$0xf] }
  0x44   :  { %v277_v62 = vrot.slane %v275_v53, 6  ;;  %v280_v1 = vrot.slane %v278_v54, 7  ;;  %v219_v63 = vrot.slane %v188_v41, 6  ;;  %v222_v2 = vrot.slane %v8039_v60, 6  ;;  %v191_v54 = vld [vmem:[%s9627_s3 + $0x34] sm:$0x3] }
  0x45   :  { %v577_v3 = vsel %vm7946_vm12, %v569_v46, %v576_v57  ;;  %v272_v4 = vsel %vm7987_vm13, %v263_v48, %v271_v59  ;;  %v273_v6 = vrot.slane %v271_v59, 4  ;;  %v6284_v7 = vrot.slane %v448_v56, 11 }
  0x46   :  { %6280 = vmatmul.msk.bf16.gmra.mxu1 %vm345_vm8, %v400_v43  ;;  %6287 = vmatmul.msk.bf16.gmra.mxu2 %vm345_vm8, %v493_v51  ;;  %v608_v9 = vunpack.c.l.b16 %v577_v3  ;;  %v281_v11 = vor.u32 %v280_v1, %v277_v62  ;;  %v220_v12 = vsel %vm7898_vm9, %v6273_v61, %v219_v63  ;;  %v335_v13 = vunpack.c.l.b16 %v272_v4  ;;  %v232_v62 = vld [vmem:[%s9627_s3 + $0x34] sm:$0x7] }
  0x47   :  { %v221_v15 = vrot.slane %v219_v63, 4  ;;  %v471_v17 = vrot.slane %v188_v41, 7  ;;  %v474_v19 = vrot.slane %v8039_v60, 7  ;;  %v395_v22 = vunpack.c.l.b16 %v220_v12 }
  0x48   :  { %v614_v20 = vpack.c.b16 %v608_v9, %v607_v58  ;;  %v282_v21 = vsel %vm7987_vm13, %v273_v6, %v281_v11  ;;  %v293_v14 = vshrl.u32 %v188_v41, 16  ;;  %v296_v26 = vshll.u32 %v188_v41, 16 }
  0x49   :  { %v336_v23 = vunpack.c.l.b16 %v282_v21  ;;  %v223_v24 = vsel %vm7898_vm9, %v221_v15, %v222_v2  ;;  %v472_v25 = vsel %vm7918_vm11, %v6284_v7, %v471_v17  ;;  %v473_v10 = vrot.slane %v471_v17, 4  ;;  %v549_v15 = vld [vmem:[%s9627_s3 + $0x34] sm:$0xf] }
  0x4a   :  { %v396_v18 = vunpack.c.l.b16 %v223_v24  ;;  %v303_v27 = vshrl.u32 %v8039_v60, 16  ;;  %v306_v28 = vshll.u32 %v8039_v60, 16  ;;  %v488_v30 = vunpack.c.l.b16 %v472_v25 }
  0x4b   :  { %6294 = vmatmul.msk.bf16.gmra.mxu3 %vm345_vm8, %v614_v20  ;;  %v475_v29 = vsel %vm7918_vm11, %v473_v10, %v474_v19  ;;  %v579_v31 = vshrl.u32 %v448_v56, 16  ;;  %v583_v32 = vrot.slane %v293_v14, 7  ;;  %v342_v33 = vpack.c.b16 %v336_v23, %v335_v13 }
  0x4c   :  { %v489_v34 = vunpack.c.l.b16 %v475_v29  ;;  %v8062_v35 = vrot.slane %v303_v27, 7  ;;  %v284_v36 = vshrl.u32 %v187_v55, 16  ;;  %v287_v42 = vshll.u32 %v187_v55, 16 }
  0x4d   :  { %v6291_v37 = vrot.slane %v579_v31, 11  ;;  %v584_v38 = vor.u32 %v583_v32, %v296_v26  ;;  %v586_v40 = vrot.slane %v583_v32, 4  ;;  %v401_v43 = vpack.c.b16 %v396_v18, %v395_v22 }
  0x4e   :  { %v588_v44 = vor.u32 %v8062_v35, %v306_v28  ;;  %v286_v45 = vrot.slane %v284_v36, 6  ;;  %v295_v46 = vrot.slane %v293_v14, 6  ;;  %v289_v49 = vrot.slane %v287_v42, 7 }
  0x4f   :  { %v585_v48 = vsel %vm7946_vm12, %v6291_v37, %v584_v38  ;;  %v298_v50 = vrot.slane %v296_v26, 7  ;;  %v305_v41 = vrot.slane %v303_v27, 6  ;;  %v494_v51 = vpack.c.b16 %v489_v34, %v488_v30  ;;  %v737_v30 = vld [vmem:[%s9627_s3 + $0x8] sm:$0xf] }
  0x50   :  { %v589_v52 = vsel %vm7946_vm12, %v586_v40, %v588_v44  ;;  %v308_v53 = vrot.slane %v306_v28, 7  ;;  %v224_v55 = vrot.slane %v222_v2, 4  ;;  %v609_v56 = vunpack.c.l.b16 %v585_v48 }
  0x51   :  { %6276 = vmatmul.msk.bf16.gmra.mxu0 %vm345_vm8, %v342_v33  ;;  %v290_v57 = vor.u32 %v289_v49, %v286_v45  ;;  %v299_v58 = vor.u32 %v298_v50, %v295_v46  ;;  %v225_v59 = vrot.slane %v190_v47, 6  ;;  %v610_v60 = vunpack.c.l.b16 %v589_v52 }
  0x52   :  { %v8076_v61 = vor.u32 %v308_v53, %v305_v41  ;;  %v476_v1 = vrot.slane %v474_v19, 4  ;;  %v477_v63 = vrot.slane %v190_v47, 7  ;;  %v228_v6 = vrot.slane %v191_v54, 6  ;;  %v8115_v54 = vld [vmem:[%s9627_s3 + $0x10] sm:$0xf] }
  0x53   :  { %v291_v3 = vrot.slane %v290_v57, 4  ;;  %v301_v4 = vrot.slane %v299_v58, 4  ;;  %v226_v2 = vsel %vm7898_vm9, %v224_v55, %v225_v59  ;;  %v227_v7 = vrot.slane %v225_v59, 4 }
  0x54   :  { %v479_v9 = vrot.slane %v477_v63, 4  ;;  %v480_v13 = vrot.slane %v232_v62, 7  ;;  %v615_v17 = vpack.c.b16 %v610_v60, %v609_v56  ;;  %v478_v19 = vsel %vm7918_vm11, %v476_v1, %v477_v63 }
  0x55   :  { %v300_v11 = vsel %vm7987_vm13, %v291_v3, %v299_v58  ;;  %v310_v12 = vsel %vm7987_vm13, %v301_v4, %v8076_v61  ;;  %v313_v20 = vshrl.u32 %v190_v47, 16  ;;  %v229_v22 = vsel %vm7898_vm9, %v227_v7, %v228_v6  ;;  %v904_v6 = vld [vmem:[%s9627_s3 + $0x8] sm:$0xe] }
  0x56   :  { %6281 = vmatmul.msk.bf16.gmra.mxu1 %vm345_vm8, %v401_v43  ;;  %6288 = vmatmul.msk.bf16.gmra.mxu2 %vm345_vm8, %v494_v51  ;;  %v337_v21 = vunpack.c.l.b16 %v300_v11  ;;  %v397_v14 = vunpack.c.l.b16 %v226_v2  ;;  %v316_v23 = vshll.u32 %v190_v47, 16  ;;  %v338_v24 = vunpack.c.l.b16 %v310_v12 }
  0x57   :  { %v481_v25 = vsel %vm7918_vm11, %v479_v9, %v480_v13  ;;  %v591_v10 = vrot.slane %v313_v20, 7  ;;  %v596_v18 = vshrl.u32 %v549_v15, 16  ;;  %v490_v26 = vunpack.c.l.b16 %v478_v19 }
  0x58   :  { %v590_v27 = vrot.slane %v8062_v35, 4  ;;  %v599_v28 = vshll.u32 %v549_v15, 16  ;;  %v315_v29 = vrot.slane %v313_v20, 6  ;;  %v398_v31 = vunpack.c.l.b16 %v229_v22  ;;  %v738_v35 = vld [vmem:[%s9627_s3 + $0xc] sm:$0xf] }
  0x59   :  { %v592_v32 = vor.u32 %v591_v10, %v316_v23  ;;  %v594_v33 = vrot.slane %v591_v10, 4  ;;  %v598_v34 = vrot.slane %v596_v18, 7  ;;  %v491_v36 = vunpack.c.l.b16 %v481_v25  ;;  %v8137_v10 = vld [vmem:[%s9627_s3 + $0x14] sm:$0xf] }
  0x5a   :  { %v318_v37 = vrot.slane %v316_v23, 7  ;;  %v323_v38 = vshrl.u32 %v232_v62, 16  ;;  %v326_v40 = vshll.u32 %v232_v62, 16  ;;  %v343_v42 = vpack.c.b16 %v338_v24, %v337_v21 }
  0x5b   :  { %6295 = vmatmul.msk.bf16.gmra.mxu3 %vm345_vm8, %v615_v17  ;;  %v601_v43 = vor.u32 %v599_v28, %v598_v34  ;;  %v311_v44 = vrot.slane %v8076_v61, 4  ;;  %v751_v45 = vshrl.u32 %v737_v30, 16  ;;  %v593_v46 = vsel %vm7946_vm12, %v590_v27, %v592_v32 }
  0x5c   :  { %v319_v47 = vor.u32 %v318_v37, %v315_v29  ;;  %v325_v48 = vrot.slane %v323_v38, 6  ;;  %v328_v49 = vrot.slane %v326_v40, 7  ;;  %v754_v41 = vshll.u32 %v737_v30, 16 }
  0x5d   :  { %v602_v50 = vsel %vm7946_vm12, %v594_v33, %v601_v43  ;;  %v760_v51 = vshll.u32 %v738_v35, 16  ;;  %v402_v52 = vpack.c.b16 %v398_v31, %v397_v14  ;;  %v495_v53 = vpack.c.b16 %v491_v36, %v490_v26 }
  0x5e   :  { %v753_v55 = vrot.slane %v751_v45, 4  ;;  %v611_v56 = vunpack.c.l.b16 %v593_v46  ;;  %v756_v57 = vrot.slane %v754_v41, 5  ;;  %v764_v59 = vshrl.u32 %v738_v35, 16 }
  0x5f   :  { %v762_v58 = vrot.slane %v760_v51, 5  ;;  %v612_v60 = vunpack.c.l.b16 %v602_v50  ;;  %v320_v61 = vsel %vm7987_vm13, %v311_v44, %v319_v47  ;;  %v321_v62 = vrot.slane %v319_v47, 4 }
  0x60   :  { %v329_v1 = vor.u32 %v328_v49, %v325_v48  ;;  %v766_v63 = vrot.slane %v764_v59, 4  ;;  %v770_v3 = vshll.u32 %v8115_v54, 16  ;;  %v757_v4 = vor.u32 %v756_v57, %v753_v55 }
  0x61   :  { %6277 = vmatmul.msk.bf16.gmra.mxu0 %vm345_vm8, %v343_v42  ;;  %v921_v2 = vrot.slane %v738_v35, 5  ;;  %vm747_vm0 = vsmask.f32 3328  ;;  %v6323_v9 = vrot.slane %v904_v6, 9  ;;  %v616_v11 = vpack.c.b16 %v612_v60, %v611_v56 }
  0x62   :  { %v767_v7 = vor.u32 %v766_v63, %v762_v58  ;;  %v330_v12 = vsel %vm7987_vm13, %v321_v62, %v329_v1  ;;  %v339_v13 = vunpack.c.l.b16 %v320_v61  ;;  %v774_v17 = vshrl.u32 %v8115_v54, 16  ;;  %vm8141_vm4 = vmor %vm747_vm0, %vm748_vm1 }
  0x63   :  { %v772_v19 = vrot.slane %v770_v3, 5  ;;  %v923_v20 = vrot.slane %v921_v2, 4  ;;  %v924_v21 = vrot.slane %v8115_v54, 5  ;;  %v1017_v22 = vshrl.u32 %v904_v6, 16 }
  0x64   :  { %v758_v14 = vrot.slane %v757_v4, 4  ;;  %v768_v23 = vrot.slane %v767_v7, 4  ;;  %v1020_v24 = vshll.u32 %v904_v6, 16  ;;  %v1025_v25 = vrot.slane %v764_v59, 5 }
  0x65   :  { %v340_v18 = vunpack.c.l.b16 %v330_v12  ;;  %v922_v27 = vsel %vm8126_vm3, %v6323_v9, %v921_v2  ;;  %v1019_v28 = vrot.slane %v1017_v22, 5  ;;  %v1026_v29 = vrot.slane %v760_v51, 6 }
  0x66   :  { %6282 = vmatmul.msk.bf16.gmra.mxu1 %vm345_vm8, %v402_v52  ;;  %6289 = vmatmul.msk.bf16.gmra.mxu2 %vm345_vm8, %v495_v53  ;;  %v1022_v30 = vrot.slane %v1020_v24, 6  ;;  %v1030_v31 = vrot.slane %v774_v17, 5  ;;  %v1031_v32 = vrot.slane %v770_v3, 6  ;;  %v925_v33 = vsel %vm8126_vm3, %v923_v20, %v924_v21  ;;  %v741_v53 = vld [vmem:[%s9627_s3 + $0x18] sm:$0x1] }
  0x67   :  { %v1027_v34 = vor.u32 %v1026_v29, %v1025_v25  ;;  %v780_v36 = vshll.u32 %v8137_v10, 16  ;;  %v763_v37 = vsel %vm8141_vm4, %v758_v14, %v762_v58  ;;  %v773_v38 = vsel %vm8141_vm4, %v768_v23, %v772_v19  ;;  %v1011_v58 = vld [vmem:[%s9627_s3 + $0x18] sm:$0x3]  ;;  %v742_v20 = vld [vmem:[%s9627_s3 + $0x28] sm:$0xf] }
  0x68   :  { %v1023_v40 = vor.u32 %v1022_v30, %v1019_v28  ;;  %v784_v35 = vshrl.u32 %v8137_v10, 16  ;;  %v344_v42 = vpack.c.b16 %v340_v18, %v339_v13  ;;  %v1032_v44 = vor.u32 %v1031_v32, %v1030_v31 }
  0x69   :  { %v1029_v43 = vrot.slane %v1027_v34, 4  ;;  %v947_v45 = vunpack.c.l.b16 %v922_v27  ;;  %v948_v46 = vunpack.c.l.b16 %v925_v33  ;;  %v776_v49 = vrot.slane %v774_v17, 4 }
  0x6a   :  { %v1024_v48 = vrot.slane %v1023_v40, 4  ;;  %v840_v50 = vunpack.c.l.b16 %v763_v37  ;;  %v841_v41 = vunpack.c.l.b16 %v773_v38  ;;  %v782_v51 = vrot.slane %v780_v36, 5 }
  0x6b   :  { %6296 = vmatmul.msk.bf16.gmra.mxu3 %vm345_vm8, %v616_v11  ;;  %v786_v52 = vrot.slane %v784_v35, 4  ;;  %v1033_v55 = vsel %vm8157_vm7, %v1029_v43, %v1032_v44  ;;  %v955_v56 = vpack.c.b16 %v948_v46, %v947_v45  ;;  %v777_v57 = vor.u32 %v776_v49, %v772_v19  ;;  %v8201_v45 = vld [vmem:[%s9627_s3 + $0x30] sm:$0xf] }
  0x6c   :  { %v1028_v54 = vsel %vm8157_vm7, %v1024_v48, %v1027_v34  ;;  %v848_v59 = vpack.c.b16 %v841_v41, %v840_v50  ;;  %v790_v61 = vshll.u32 %v741_v53, 16  ;;  %v927_v62 = vrot.slane %v8137_v10, 5  ;;  %v905_v34 = vld [vmem:[%s9627_s3 + $0x28] sm:$0xe] }
  0x6d   :  { %v787_v60 = vor.u32 %v786_v52, %v782_v51  ;;  %v1084_v1 = vunpack.c.l.b16 %v1028_v54  ;;  %v1085_v63 = vunpack.c.l.b16 %v1033_v55  ;;  %v1035_v3 = vrot.slane %v784_v35, 5 }
  0x6e   :  { %v1036_v4 = vrot.slane %v780_v36, 6  ;;  %v1041_v6 = vshrl.u32 %v1011_v58, 16  ;;  %v1044_v2 = vshll.u32 %v1011_v58, 16  ;;  %v778_v7 = vrot.slane %v777_v57, 4  ;;  %v7268_v36 = vld [vmem:[%s9627_s3 + $0x8] sm:$0xff] }
  0x6f   :  { %v926_v9 = vrot.slane %v924_v21, 4  ;;  %v788_v11 = vrot.slane %v787_v60, 4  ;;  %v792_v12 = vrot.slane %v790_v61, 5  ;;  %v929_v13 = vrot.slane %v927_v62, 4  ;;  %v743_v21 = vld [vmem:[%s9627_s3 + $0x2c] sm:$0xf] }
  0x70   :  { %v930_v17 = vrot.slane %v741_v53, 5  ;;  %v1092_v19 = vpack.c.b16 %v1085_v63, %v1084_v1  ;;  %v1037_v22 = vor.u32 %v1036_v4, %v1035_v3  ;;  %v1043_v14 = vrot.slane %v1041_v6, 5 }
  0x71   :  { %6278 = vmatmul.msk.bf16.gmra.mxu0 %vm345_vm8, %v344_v42  ;;  %v1046_v23 = vrot.slane %v1044_v2, 6  ;;  %v783_v24 = vsel %vm8141_vm4, %v778_v7, %v782_v51  ;;  %v928_v25 = vsel %vm8126_vm3, %v926_v9, %v927_v62  ;;  %v1034_v10 = vrot.slane %v1032_v44, 4 }
  0x72   :  { %v793_v18 = vsel %vm8141_vm4, %v788_v11, %v792_v12  ;;  %v931_v27 = vsel %vm8126_vm3, %v929_v13, %v930_v17  ;;  %v795_v28 = vshrl.u32 %v742_v20, 16  ;;  %v798_v29 = vshll.u32 %v742_v20, 16 }
  0x73   :  { %v804_v30 = vshll.u32 %v743_v21, 16  ;;  %v808_v31 = vshrl.u32 %v743_v21, 16  ;;  %v1039_v32 = vrot.slane %v1037_v22, 4  ;;  %v1047_v33 = vor.u32 %v1046_v23, %v1043_v14 }
  0x74   :  { %v842_v37 = vunpack.c.l.b16 %v783_v24  ;;  %v843_v38 = vunpack.c.l.b16 %v793_v18  ;;  %v949_v40 = vunpack.c.l.b16 %v928_v25  ;;  %v950_v35 = vunpack.c.l.b16 %v931_v27  ;;  %v7270_v27 = vld [vmem:[%s9627_s3 + $0x10] sm:$0xff] }
  0x75   :  { %v1038_v42 = vsel %vm8157_vm7, %v1034_v10, %v1037_v22  ;;  %v797_v43 = vrot.slane %v795_v28, 4  ;;  %v800_v44 = vrot.slane %v798_v29, 5  ;;  %v806_v46 = vrot.slane %v804_v30, 5 }
  0x76   :  { %6319 = vmatmul.msk.bf16.vlgmr.msrb.gmra.mxu1 %vm345_vm8, %v848_v59  ;;  %6326 = vmatmul.msk.bf16.vlgmr.msrb.gmra.mxu2 %vm345_vm8, %v955_v56  ;;  %v810_v48 = vrot.slane %v808_v31, 4  ;;  %v1050_v49 = vshrl.u32 %v905_v34, 16  ;;  %v1053_v50 = vshll.u32 %v905_v34, 16  ;;  %v1048_v41 = vsel %vm8157_vm7, %v1039_v32, %v1047_v33 }
  0x77   :  { %v849_v51 = vpack.c.b16 %v843_v38, %v842_v37  ;;  %v956_v52 = vpack.c.b16 %v950_v35, %v949_v40  ;;  %v1086_v53 = vunpack.c.l.b16 %v1038_v42  ;;  %v801_v54 = vor.u32 %v800_v44, %v797_v43  ;;  %v746_v38 = vld [vmem:[%s9627_s3 + $0x38] sm:$0x1] }
  0x78   :  { %v814_v55 = vshll.u32 %v8201_v45, 16  ;;  %v934_v56 = vrot.slane %v743_v21, 5  ;;  %v1087_v57 = vunpack.c.l.b16 %v1048_v41  ;;  %v811_v58 = vor.u32 %v810_v48, %v806_v46  ;;  %v1012_v40 = vld [vmem:[%s9627_s3 + $0x38] sm:$0x3] }
  0x79   :  { %v1052_v59 = vrot.slane %v1050_v49, 5  ;;  %v1055_v60 = vrot.slane %v1053_v50, 6  ;;  %v818_v61 = vshrl.u32 %v8201_v45, 16  ;;  %v1058_v62 = vrot.slane %v808_v31, 5 }
  0x7a   :  { %v1059_v1 = vrot.slane %v804_v30, 6  ;;  %v802_v63 = vrot.slane %v801_v54, 4  ;;  %v6324_v3 = vrot.slane %v905_v34, 9  ;;  %v936_v4 = vrot.slane %v934_v56, 4 }
  0x7b   :  { %6331 = vmatmul.msk.bf16.vlgmr.msrb.gmra.mxu3 %vm345_vm8, %v1092_v19  ;;  %v937_v6 = vrot.slane %v8201_v45, 5  ;;  %v1093_v2 = vpack.c.b16 %v1087_v57, %v1086_v53  ;;  %v812_v7 = vrot.slane %v811_v58, 4  ;;  %v816_v9 = vrot.slane %v814_v55, 5  ;;  %v745_v19 = vld [vmem:[%s9627_s3 + $0x34] sm:$0xf] }
  0x7c   :  { %v1056_v11 = vor.u32 %v1055_v60, %v1052_v59  ;;  %v1060_v12 = vor.u32 %v1059_v1, %v1058_v62  ;;  %v1063_v13 = vrot.slane %v818_v61, 5  ;;  %v1064_v17 = vrot.slane %v814_v55, 6 }
  0x7d   :  { %v807_v20 = vsel %vm8141_vm4, %v802_v63, %v806_v46  ;;  %v935_v22 = vsel %vm8126_vm3, %v6324_v3, %v934_v56  ;;  %v938_v14 = vsel %vm8126_vm3, %v936_v4, %v937_v6  ;;  %v817_v23 = vsel %vm8141_vm4, %v812_v7, %v816_v9 }
  0x7e   :  { %v1057_v21 = vrot.slane %v1056_v11, 4  ;;  %v824_v24 = vshll.u32 %v745_v19, 16  ;;  %v828_v25 = vshrl.u32 %v745_v19, 16  ;;  %v1062_v10 = vrot.slane %v1060_v12, 4 }
  0x7f   :  { %v1065_v18 = vor.u32 %v1064_v17, %v1063_v13  ;;  %v844_v28 = vunpack.c.l.b16 %v807_v20  ;;  %v845_v29 = vunpack.c.l.b16 %v817_v23  ;;  %v951_v30 = vunpack.c.l.b16 %v935_v22 }
  0x80   :  { %v952_v31 = vunpack.c.l.b16 %v938_v14  ;;  %v1061_v32 = vsel %vm8157_vm7, %v1057_v21, %v1060_v12  ;;  %v820_v33 = vrot.slane %v818_v61, 4  ;;  %v826_v34 = vrot.slane %v824_v24, 5 }
  0x81   :  { %6314 = vmatmul.msk.bf16.vlgmr.msrb.gmra.mxu0 %vm345_vm8, %v7268_v36  ;;  %v830_v36 = vrot.slane %v828_v25, 4  ;;  %v1066_v37 = vsel %vm8157_vm7, %v1062_v10, %v1065_v18  ;;  %v850_v35 = vpack.c.b16 %v845_v29, %v844_v28  ;;  %v1088_v43 = vunpack.c.l.b16 %v1061_v32 }
  0x82   :  { %v957_v42 = vpack.c.b16 %v952_v31, %v951_v30  ;;  %v940_v44 = vrot.slane %v745_v19, 5  ;;  %v1089_v45 = vunpack.c.l.b16 %v1066_v37  ;;  %v821_v46 = vor.u32 %v820_v33, %v816_v9  ;;  %v7269_v9 = vld [vmem:[%s9627_s3 + $0x28] sm:$0xff]  ;;  %v7285_v37 = vld [vmem:[#allocation4 + $0x58] sm:$0xff] }
  0x83   :  { %v831_v48 = vor.u32 %v830_v36, %v826_v34  ;;  %v834_v49 = vshll.u32 %v746_v38, 16  ;;  %v1068_v50 = vrot.slane %v828_v25, 5  ;;  %v1069_v41 = vrot.slane %v824_v24, 6  ;;  %v7271_v25 = vld [vmem:[%s9627_s3 + $0x30] sm:$0xff]  ;;  %1614 = vmatpush.bf16.msra.mxu2 %v7285_v37  ;;  %v7278_v37 = vld [vmem:[#allocation4 + $0x20] sm:$0xff] }
  0x84   :  { %v939_v53 = vrot.slane %v937_v6, 4  ;;  %v942_v54 = vrot.slane %v940_v44, 4  ;;  %v943_v55 = vrot.slane %v746_v38, 5  ;;  %v1094_v56 = vpack.c.b16 %v1089_v45, %v1088_v43  ;;  %v7277_v43 = vld [vmem:[#allocation4 + $0x18] sm:$0xff] }
  0x85   :  { %v822_v57 = vrot.slane %v821_v46, 4  ;;  %v832_v58 = vrot.slane %v831_v48, 4  ;;  %v836_v59 = vrot.slane %v834_v49, 5  ;;  %v1070_v60 = vor.u32 %v1069_v41, %v1068_v50  ;;  %1496 = vmatpush.bf16.msra.mxu1 %v7277_v43 }
  0x86   :  { %6320 = vmatmul.msk.bf16.gmra.mxu1 %vm345_vm8, %v849_v51  ;;  %6327 = vmatmul.msk.bf16.gmra.mxu2 %vm345_vm8, %v956_v52  ;;  %v1074_v51 = vshrl.u32 %v1012_v40, 16  ;;  %v1077_v52 = vshll.u32 %v1012_v40, 16  ;;  %v941_v1 = vsel %vm8126_vm3, %v939_v53, %v940_v44  ;;  %v944_v63 = vsel %vm8126_vm3, %v942_v54, %v943_v55  ;;  %v7281_v40 = vld [vmem:[#allocation4 + $0x38] sm:$0xff]  ;;  %v7280_v53 = vld [vmem:[#allocation4 + $0x30] sm:$0xff] }
  0x87   :  { %v827_v3 = vsel %vm8141_vm4, %v822_v57, %v826_v34  ;;  %v837_v4 = vsel %vm8141_vm4, %v832_v58, %v836_v59  ;;  %v1067_v6 = vrot.slane %v1065_v18, 4  ;;  %v953_v11 = vunpack.c.l.b16 %v941_v1  ;;  %1419 = vmatpush.bf16.msra.mxu0 %v7281_v40  ;;  %v7290_v54 = vld [vmem:[#allocation4 + $0x70] sm:$0xff] }
  0x88   :  { %v1076_v61 = vrot.slane %v1074_v51, 5  ;;  %v1079_v62 = vrot.slane %v1077_v52, 6  ;;  %v954_v12 = vunpack.c.l.b16 %v944_v63  ;;  %v846_v13 = vunpack.c.l.b16 %v827_v3  ;;  %v7284_v52 = vld [vmem:[#allocation4 + $0x50] sm:$0xff] }
  0x89   :  { %v847_v17 = vunpack.c.l.b16 %v837_v4  ;;  %v1071_v19 = vsel %vm8157_vm7, %v1067_v6, %v1070_v60  ;;  %v7276_v55 = vld [vmem:[#allocation4 + $0x10] sm:$0xff]  ;;  %1615 = vmatpush.bf16.msra.mxu2 %v7284_v52 }
  0x8a   :  { %v1080_v7 = vor.u32 %v1079_v62, %v1076_v61  ;;  %v958_v22 = vpack.c.b16 %v954_v12, %v953_v11  ;;  %v1090_v23 = vunpack.c.l.b16 %v1071_v19  ;;  %1497 = vmatpush.bf16.msra.mxu1 %v7276_v55  ;;  %v7289_v11 = vld [vmem:[#allocation4 + $0x68] sm:$0xff] }
  0x8b   :  { %6332 = vmatmul.msk.bf16.gmra.mxu3 %vm345_vm8, %v1093_v2  ;;  %v1072_v2 = vrot.slane %v1070_v60, 4  ;;  %v851_v14 = vpack.c.b16 %v847_v17, %v846_v13  ;;  %1420 = vmatpush.bf16.msra.mxu0 %v7280_v53 }
  0x8d   :  { %v1081_v20 = vsel %vm8157_vm7, %v1072_v2, %v1080_v7  ;;  %v7738_v2 = vmov 0   ;;  %v7283_v7 = vld [vmem:[#allocation4 + $0x48] sm:$0xff] }
  0x8e   :  { %v1091_v21 = vunpack.c.l.b16 %v1081_v20  ;;  %158 = vst [vmem:[#allocation2 + $0x4] sm:$0xc] %v7738_v2  ;;  %1616 = vmatpush.bf16.msra.mxu2 %v7283_v7 }
  0x8f   :  { %159 = vst [vmem:[#allocation2 + $0x24] sm:$0xc] %v7738_v2 }
  0x90   :  { %v1095_v24 = vpack.c.b16 %v1091_v21, %v1090_v23  ;;  %169 = vst [vmem:[#allocation3 + $0x4] sm:$0xc] %v7738_v2 }
  0x91   :  { %6315 = vmatmul.msk.bf16.gmra.mxu0 %vm345_vm8, %v7270_v27  ;;  %170 = vst [vmem:[#allocation3 + $0x24] sm:$0xc] %v7738_v2  ;;  %v7303_v2 = vld [vmem:[#allocation4 + $0xd8] sm:$0xff] }
  0x95   :  { %v8315_v55 = vld [vmem:[#allocation2 + $0x4] sm:$0xc] }
  0x96   :  { %6321 = vmatmul.msk.bf16.gmra.mxu1 %vm345_vm8, %v850_v35  ;;  %6328 = vmatmul.msk.bf16.gmra.mxu2 %vm345_vm8, %v957_v42  ;;  %v7291_v35 = vld [vmem:[#allocation4 + $0x78] sm:$0xff]  ;;  %v1265_v7 = vshll.u32 %v8315_v55, 16 }
  0x97   :  { %1760 = vmatpush.bf16.msra.mxu3 %v7291_v35  ;;  %v7274_v35 = vld [vmem:[#allocation4] sm:$0xff] }
  0x9b   :  { %6333 = vmatmul.msk.bf16.gmra.mxu3 %vm345_vm8, %v1094_v56 }
  0x9c   :  { %1761 = vmatpush.bf16.msra.mxu3 %v7290_v54 }
  0xa0   :  { %1762 = vmatpush.bf16.msra.mxu3 %v7289_v11  ;;  %v7307_v11 = vld [vmem:[#allocation4 + $0xf8] sm:$0xff] }
  0xa1   :  { %6316 = vmatmul.msk.bf16.gmra.mxu0 %vm345_vm8, %v7269_v9  ;;  %v7279_v9 = vld [vmem:[#allocation4 + $0x28] sm:$0xff] }
  0xa2   :  { %1421 = vmatpush.bf16.msra.mxu0 %v7279_v9  ;;  %v7295_v9 = vld [vmem:[#allocation4 + $0x98] sm:$0xff] }
  0xa6   :  { %6329 = vmatmul.msk.bf16.gmra.mxu2 %vm345_vm8, %v958_v22  ;;  %6322 = vmatmul.msk.bf16.gmra.mxu1 %vm345_vm8, %v851_v14  ;;  %v7275_v14 = vld [vmem:[#allocation4 + $0x8] sm:$0xff] }
  0xa7   :  { %1498 = vmatpush.bf16.msra.mxu1 %v7275_v14  ;;  %1422 = vmatpush.bf16.msra.mxu0 %v7278_v37  ;;  %v1521_v37 = vld [vmem:[#allocation2 + $0x4] sm:$0x8] }
  0xab   :  { %6334 = vmatmul.msk.bf16.gmra.mxu3 %vm345_vm8, %v1095_v24  ;;  %1499 = vmatpush.bf16.msra.mxu1 %v7274_v35  ;;  %v7299_v35 = vld [vmem:[#allocation4 + $0xb8] sm:$0xff] }
  0xac   :  { %1856 = vmatpush.bf16.msrb.mxu0 %v7295_v9 }
  0xaf   :  { %2048 = vmatpush.bf16.msrb.mxu1 %v7299_v35 }
  0xb1   :  { %6317 = vmatmul.msk.bf16.gmra.mxu0 %vm345_vm8, %v7271_v25  ;;  %vm1196_vm8 = vcmask 519168  }
  0xb3   :  { %v427_v10 = vpop.f32.mrf.mxu1 }
  0xb9   :  { %v520_v18 = vpop.f32.mrf.mxu2 }
  0xbb   :  { %v8263_v27 = vpop.f32.mrf.mxu1 }
  0xbe   :  { %v371_v28 = vpop.f32.mrf.mxu0  ;;  %v8265_v29 = vpop.f32.mrf.mxu3 }
  0xbf   :  { %v428_v30 = vadd.f32 %v427_v10, %v371_v28 }
  0xc1   :  { %v8267_v31 = vadd.f32 %v520_v18, %v428_v30  ;;  %v8269_v32 = vpop.f32.mrf.mxu2 }
  0xc3   :  { %v432_v33 = vpop.f32.mrf.mxu1  ;;  %v661_v10 = vadd.f32 %v8265_v29, %v8267_v31  ;;  %v7739_v29 = vmov 0.0|0.0   ;;  %v8307_v31 = vld [vmem:[%s9642_s25] ss:$0 sm:$0xff] }
  0xc4   :  { %1200 = vst.msk [vmem:[#allocation2 + $0x14] sm:$0xf] %vm1196_vm8, %v7739_v29 }
  0xc5   :  { %1204 = vst.msk [vmem:[#allocation2 + $0x34] sm:$0xf] %vm1196_vm8, %v7739_v29 }
  0xc6   :  { %v8271_v34 = vpop.f32.mrf.mxu0  ;;  %v8273_v36 = vpop.f32.mrf.mxu3  ;;  %2426 = vst.msk [vmem:[#allocation3 + $0x14] sm:$0xf] %vm1196_vm8, %v7739_v29 }
  0xc7   :  { %v430_v18 = vadd.f32 %v8263_v27, %v8271_v34  ;;  %2430 = vst.msk [vmem:[#allocation3 + $0x34] sm:$0xf] %vm1196_vm8, %v7739_v29 }
  0xc9   :  { %v525_v38 = vpop.f32.mrf.mxu2 }
  0xcb   :  { %v434_v42 = vpop.f32.mrf.mxu1 }
  0xcc   :  { %v541_v42 = vadd.f32 %v8269_v32, %v430_v18 }
  0xce   :  { %v376_v44 = vpop.f32.mrf.mxu0  ;;  %v8275_v45 = vpop.f32.mrf.mxu3  ;;  %v662_v32 = vadd.f32 %v8273_v36, %v541_v42 }
  0xcf   :  { %v433_v46 = vadd.f32 %v432_v33, %v376_v44  ;;  %v7282_v33 = vld [vmem:[#allocation4 + $0x40] sm:$0xff] }
  0xd0   :  { %1617 = vmatpush.bf16.msra.mxu2 %v7282_v33 }
  0xd1   :  { %v8277_v48 = vadd.f32 %v525_v38, %v433_v46  ;;  %v527_v49 = vpop.f32.mrf.mxu2  ;;  %v7288_v38 = vld [vmem:[#allocation4 + $0x60] sm:$0xff] }
  0xd2   :  { %1763 = vmatpush.bf16.msra.mxu3 %v7288_v38 }
  0xd3   :  { %v437_v50 = vpop.f32.mrf.mxu1  ;;  %v663_v36 = vadd.f32 %v8275_v45, %v8277_v48 }
  0xd4   :  { %2180 = vmatpush.bf16.msrb.mxu2 %v7303_v2 }
  0xd6   :  { %v378_v41 = vpop.f32.mrf.mxu0  ;;  %v648_v51 = vpop.f32.mrf.mxu3  ;;  %2342 = vmatpush.bf16.msrb.mxu3 %v7307_v11 }
  0xd9   :  { %v530_v56 = vpop.f32.mrf.mxu2 }
  0xdb   :  { %v8279_v57 = vpop.f32.mrf.mxu1 }
  0xde   :  { %v381_v58 = vpop.f32.mrf.mxu0  ;;  %v8281_v59 = vpop.f32.mrf.mxu3 }
  0xdf   :  { %v438_v60 = vadd.f32 %v437_v50, %v381_v58 }
  0xe1   :  { %v8283_v61 = vadd.f32 %v530_v56, %v438_v60  ;;  %v8285_v62 = vpop.f32.mrf.mxu2 }
  0xe3   :  { %v442_v1 = vpop.f32.mrf.mxu1  ;;  %v665_v42 = vadd.f32 %v8281_v59, %v8283_v61  ;;  %v6377_v59 = vrot.slane %v1521_v37, 11 }
  0xe6   :  { %v8287_v63 = vpop.f32.mrf.mxu0  ;;  %v8289_v3 = vpop.f32.mrf.mxu3 }
  0xe9   :  { %v535_v4 = vpop.f32.mrf.mxu2 }
  0xeb   :  { %v444_v6 = vpop.f32.mrf.mxu1 }
  0xee   :  { %v386_v12 = vpop.f32.mrf.mxu0  ;;  %v8291_v13 = vpop.f32.mrf.mxu3 }
  0xef   :  { %v443_v17 = vadd.f32 %v442_v1, %v386_v12  ;;  %v177_v1 = vlaneseq }
  0xf1   :  { %v8293_v19 = vadd.f32 %v535_v4, %v443_v17  ;;  %v537_v20 = vpop.f32.mrf.mxu2  ;;  %v1262_v4 = vshrl.u32 %v8315_v55, 16 }
  0xf2   :  { %v440_v20 = vadd.f32 %v8279_v57, %v8287_v63 }
  0xf3   :  { %v876_v22 = vpop.f32.mrf.mxu1 }
  0xf6   :  { %v388_v23 = vpop.f32.mrf.mxu0  ;;  %v658_v21 = vpop.f32.mrf.mxu3 }
  0xf7   :  { %v178_v23 = vshrl.u32 %v177_v1, 7 }
  0xf9   :  { %v983_v24 = vpop.f32.mrf.mxu2  ;;  %v8328_v33 = vadd.s32 16, %v178_v23 }
  0xfb   :  { %v878_v25 = vpop.f32.mrf.mxu1  ;;  %vm1170_vm10 = vcmp.lt.s32.totalorder %v8328_v33, 17 }
  0xfe   :  { %v709_v28 = vpop.f32.mrf.mxu0  ;;  %v1120_v30 = vpop.f32.mrf.mxu3 }
  0xff   :  { %v729_v40 = vadd.f32 %v709_v28, %v661_v10  ;;  %v545_v10 = vadd.f32 %v8285_v62, %v440_v20 }
 0x101   :  { %v896_v43 = vadd.f32 %v876_v22, %v729_v40  ;;  %v985_v44 = vpop.f32.mrf.mxu2 }
 0x103   :  { %v1003_v27 = vadd.f32 %v983_v24, %v896_v43  ;;  %v881_v34 = vpop.f32.mrf.mxu1  ;;  %v1264_v24 = vrot.slane %v1262_v4, 6 }
 0x105   :  { %v1140_v46 = vadd.f32 %v1120_v30, %v1003_v27  ;;  %v1650_v27 = vshrl.u32 %v1521_v37, 16  ;;  %v7306_v37 = vld [vmem:[#allocation4 + $0xf0] sm:$0xff] }
 0x106   :  { %v711_v49 = vpop.f32.mrf.mxu0  ;;  %v1122_v50 = vpop.f32.mrf.mxu3  ;;  %2343 = vmatpush.bf16.msrb.mxu3 %v7306_v37 }
 0x107   :  { %v1152_v41 = vadd.f32 %v8307_v31, %v1140_v46  ;;  %v730_v51 = vadd.f32 %v711_v49, %v662_v32  ;;  %v6335_v46 = vrot.slane %v8315_v55, 10 }
 0x109   :  { %v1160_v52 = vmax.f32 %v1152_v41, 0.0  ;;  %v897_v53 = vadd.f32 %v878_v25, %v730_v51  ;;  %v988_v54 = vpop.f32.mrf.mxu2  ;;  %v1267_v25 = vrot.slane %v1265_v7, 7  ;;  %v8342_v41 = vadd.f32 %v8291_v13, %v8293_v19  ;;  %v8345_v51 = vld [vmem:[#allocation2 + $0x14] sm:$0x7] }
 0x10a   :  { %v1538_v4 = vrot.slane %v8345_v51, 7  ;;  %v1304_v11 = vshll.u32 %v8345_v51, 16 }
 0x10b   :  { %v1188_v56 = vpack.c.bf16 %v1160_v52, %v1160_v52  ;;  %v1004_v58 = vadd.f32 %v985_v44, %v897_v53  ;;  %v883_v60 = vpop.f32.mrf.mxu1  ;;  %v1268_v38 = vor.u32 %v1267_v25, %v1264_v24  ;;  %v7302_v25 = vld [vmem:[#allocation4 + $0xd0] sm:$0xff] }
 0x10c   :  { %2181 = vmatpush.bf16.msrb.mxu2 %v7302_v25 }
 0x10d   :  { %1197 = vst.msk [vmem:[#allocation2 + $0x8] sm:$0xf] %vm1196_vm8, %v1188_v56  ;;  %v1141_v6 = vadd.f32 %v1122_v50, %v1004_v58  ;;  %v8338_v50 = vld [vmem:[#allocation2 + $0x14] sm:$0x3]  ;;  %v8347_v53 = vrot.slane %v1268_v38, 4  ;;  %v8349_v56 = vrot.slane %v1650_v27, 11 }
 0x10e   :  { %v714_v12 = vpop.f32.mrf.mxu0  ;;  %v1125_v17 = vpop.f32.mrf.mxu3  ;;  %v1236_v13 = vrot.slane %v8338_v50, 6  ;;  %v7298_v38 = vld [vmem:[#allocation4 + $0xb0] sm:$0xff] }
 0x10f   :  { %v1153_v22 = vadd.f32 %v8307_v31, %v1141_v6  ;;  %v731_v14 = vadd.f32 %v714_v12, %v663_v36  ;;  %v1301_v36 = vshrl.u32 %v8345_v51, 16  ;;  %2049 = vmatpush.bf16.msrb.mxu1 %v7298_v38 }
 0x111   :  { %v1161_v45 = vmax.f32 %v1153_v22, 0.0  ;;  %v898_v48 = vadd.f32 %v881_v34, %v731_v14  ;;  %v990_v21 = vpop.f32.mrf.mxu2  ;;  %v8334_v34 = vadd.f32 %v8289_v3, %v545_v10  ;;  %v7294_v10 = vld [vmem:[#allocation4 + $0x90] sm:$0xff] }
 0x112   :  { %1857 = vmatpush.bf16.msrb.mxu0 %v7294_v10 }
 0x113   :  { %v1189_v18 = vpack.c.bf16 %v1161_v45, %v1161_v45  ;;  %v1005_v28 = vadd.f32 %v988_v54, %v898_v48  ;;  %v8326_v30 = vpop.f32.mrf.mxu1 }
 0x114   :  { %v1206_v57 = vld [vmem:[#allocation2 + $0x8] sm:$0xf] }
 0x115   :  { %1198 = vst.msk [vmem:[#allocation2 + $0xc] sm:$0xf] %vm1196_vm8, %v1189_v18  ;;  %v1142_v63 = vadd.f32 %v1125_v17, %v1005_v28  ;;  %v1271_v40 = vshrl.u32 %v1206_v57, 16  ;;  %v1274_v62 = vshll.u32 %v1206_v57, 16  ;;  %v1227_v49 = vrot.slane %v1206_v57, 6 }
 0x116   :  { %v716_v43 = vpop.f32.mrf.mxu0  ;;  %v1127_v44 = vpop.f32.mrf.mxu3  ;;  %v1529_v61 = vrot.slane %v1206_v57, 7 }
 0x117   :  { %v1154_v32 = vadd.f32 %v8307_v31, %v1142_v63  ;;  %v1273_v54 = vrot.slane %v1271_v40, 6  ;;  %v1276_v55 = vrot.slane %v1274_v62, 7  ;;  %v8351_v58 = vrot.slane %v1271_v40, 7 }
 0x118   :  { %v1228_v1 = vsel %vm7898_vm9, %v6335_v46, %v1227_v49  ;;  %v1229_v7 = vrot.slane %v1227_v49, 4  ;;  %v1530_v9 = vsel %vm7918_vm11, %v6377_v59, %v1529_v61  ;;  %v1531_v17 = vrot.slane %v1529_v61, 4 }
 0x119   :  { %v1162_v3 = vmax.f32 %v1154_v32, 0.0  ;;  %v993_v52 = vpop.f32.mrf.mxu2  ;;  %v1277_v22 = vor.u32 %v1276_v55, %v1273_v54  ;;  %v1444_v45 = vunpack.c.l.b16 %v1228_v1  ;;  %v1655_v24 = vor.u32 %v8351_v58, %v1274_v62  ;;  %v8381_v62 = vld [vmem:[#allocation2 + $0x14] sm:$0xf] }
 0x11a   :  { %v1562_v63 = vunpack.c.l.b16 %v1530_v9  ;;  %v8404_v9 = vrot.slane %v1301_v36, 6  ;;  %v1670_v38 = vshll.u32 %v8381_v62, 16 }
 0x11b   :  { %v1182_v19 = vsel %vm1170_vm10, %v1162_v3, 0.0  ;;  %v8356_v60 = vpop.f32.mrf.mxu1  ;;  %v1278_v32 = vsel %vm7987_vm13, %v8347_v53, %v1277_v22  ;;  %v1279_v46 = vrot.slane %v1277_v22, 4  ;;  %v1656_v54 = vsel %vm7946_vm12, %v8349_v56, %v1655_v24  ;;  %v7301_v56 = vld [vmem:[#allocation4 + $0xc8] sm:$0xff] }
 0x11c   :  { %v1190_v6 = vpack.c.bf16 %v1182_v19, %v1182_v19  ;;  %v8362_v2 = vld [vmem:[#allocation2 + $0xc] sm:$0xf]  ;;  %v1667_v53 = vshrl.u32 %v8381_v62, 16  ;;  %2182 = vmatpush.bf16.msrb.mxu2 %v7301_v56 }
 0x11d   :  { %v1230_v12 = vrot.slane %v8362_v2, 6  ;;  %v1532_v20 = vrot.slane %v8362_v2, 7  ;;  %v1281_v48 = vshrl.u32 %v8362_v2, 16  ;;  %v1284_v21 = vshll.u32 %v8362_v2, 16 }
 0x11e   :  { %1199 = vst.msk [vmem:[#allocation2 + $0x10] sm:$0xf] %vm1196_vm8, %v1190_v6  ;;  %v719_v14 = vpop.f32.mrf.mxu0  ;;  %v1130_v23 = vpop.f32.mrf.mxu3  ;;  %v1669_v37 = vrot.slane %v1667_v53, 7 }
 0x11f   :  { %v733_v18 = vadd.f32 %v719_v14, %v665_v42  ;;  %v1231_v28 = vsel %vm7898_vm9, %v1229_v7, %v1230_v12  ;;  %v1533_v57 = vsel %vm7918_vm11, %v1531_v17, %v1532_v20  ;;  %v1283_v43 = vrot.slane %v1281_v48, 6 }
 0x120   :  { %v1445_v40 = vunpack.c.l.b16 %v1231_v28  ;;  %v1563_v35 = vunpack.c.l.b16 %v1533_v57  ;;  %v1286_v44 = vrot.slane %v1284_v21, 7  ;;  %v8387_v49 = vrot.slane %v1281_v48, 7 }
 0x121   :  { %v900_v42 = vadd.f32 %v8326_v30, %v733_v18  ;;  %v995_v27 = vpop.f32.mrf.mxu2  ;;  %v1657_v30 = vrot.slane %v8351_v58, 4  ;;  %v1366_v7 = vunpack.c.l.b16 %v1278_v32  ;;  %v1708_v14 = vunpack.c.l.b16 %v1656_v54  ;;  %v8417_v32 = vld [vmem:[#allocation2 + $0x24] sm:$0xc]  ;;  %v7297_v54 = vld [vmem:[#allocation4 + $0xa8] sm:$0xff] }
 0x122   :  { %v1452_v59 = vpack.c.b16 %v1445_v40, %v1444_v45  ;;  %v1570_v61 = vpack.c.b16 %v1563_v35, %v1562_v63  ;;  %v8389_v3 = vor.u32 %v1286_v44, %v1283_v43  ;;  %v1659_v19 = vor.u32 %v8387_v49, %v1284_v21  ;;  %2050 = vmatpush.bf16.msrb.mxu1 %v7297_v54 }
 0x123   :  { %v1007_v55 = vadd.f32 %v993_v52, %v900_v42  ;;  %v8396_v1 = vpop.f32.mrf.mxu1  ;;  %v8406_v52 = vrot.slane %v1304_v11, 7  ;;  %v1232_v44 = vrot.slane %v1230_v12, 4 }
 0x124   :  { %6373 = vmatmul.msk.bf16.vlgmr.msra.gmra.mxu1 %vm1402_vm14, %v1452_v59  ;;  %6395 = vmatmul.msk.bf16.vlgmr.msra.gmra.mxu2 %vm1402_vm14, %v1570_v61  ;;  %v1288_v6 = vsel %vm7987_vm13, %v1279_v46, %v8389_v3  ;;  %v1660_v22 = vsel %vm7946_vm12, %v1657_v30, %v1659_v19  ;;  %v7305_v61 = vld [vmem:[#allocation4 + $0xe8] sm:$0xff] }
 0x125   :  { %v1144_v58 = vadd.f32 %v1130_v23, %v1007_v55  ;;  %v1367_v17 = vunpack.c.l.b16 %v1288_v6  ;;  %v1208_v45 = vld [vmem:[#allocation2 + $0x10] sm:$0xf]  ;;  %v1709_v21 = vunpack.c.l.b16 %v1660_v22  ;;  %v1307_v62 = vor.u32 %v8406_v52, %v8404_v9  ;;  %2344 = vmatpush.bf16.msrb.mxu3 %v7305_v61 }
 0x126   :  { %v721_v48 = vpop.f32.mrf.mxu0  ;;  %v1132_v24 = vpop.f32.mrf.mxu3  ;;  %v1233_v25 = vrot.slane %v1208_v45, 6  ;;  %v1535_v10 = vrot.slane %v1208_v45, 7  ;;  %v1291_v18 = vshrl.u32 %v1208_v45, 16  ;;  %v1294_v57 = vshll.u32 %v1208_v45, 16 }
 0x127   :  { %v1156_v36 = vadd.f32 %v8307_v31, %v1144_v58  ;;  %v734_v11 = vadd.f32 %v721_v48, %v8334_v34  ;;  %v1374_v28 = vpack.c.b16 %v1367_v17, %v1366_v7  ;;  %v1716_v23 = vpack.c.b16 %v1709_v21, %v1708_v14 }
 0x128   :  { %v1235_v63 = vrot.slane %v1233_v25, 4  ;;  %v1537_v42 = vrot.slane %v1535_v10, 4  ;;  %v1534_v34 = vrot.slane %v1532_v20, 4  ;;  %v1293_v46 = vrot.slane %v1291_v18, 6 }
 0x129   :  { %v1164_v40 = vmax.f32 %v1156_v36, 0.0  ;;  %v901_v35 = vadd.f32 %v8356_v60, %v734_v11  ;;  %6353 = vmatmul.msk.bf16.vlgmr.msra.gmra.mxu0 %vm1402_vm14, %v1374_v28  ;;  %v998_v43 = vpop.f32.mrf.mxu2  ;;  %6417 = vmatmul.msk.bf16.vlgmr.msra.gmra.mxu3 %vm1402_vm14, %v1716_v23  ;;  %v1296_v59 = vrot.slane %v1294_v57, 7  ;;  %v7293_v60 = vld [vmem:[#allocation4 + $0x88] sm:$0xff]  ;;  %v1662_v53 = vrot.slane %v1291_v18, 7 }
 0x12a   :  { %v1237_v12 = vsel %vm7898_vm9, %v1235_v63, %v1236_v13  ;;  %v1539_v2 = vsel %vm7918_vm11, %v1537_v42, %v1538_v4  ;;  %v1672_v6 = vor.u32 %v1670_v38, %v1669_v37  ;;  %v1310_v7 = vshrl.u32 %v8417_v32, 16  ;;  %1858 = vmatpush.bf16.msrb.mxu0 %v7293_v60  ;;  %v7300_v42 = vld [vmem:[#allocation4 + $0xc0] sm:$0xff] }
 0x12b   :  { %v1192_v55 = vpack.c.bf16 %v1164_v40, %v1164_v40  ;;  %v1008_v30 = vadd.f32 %v995_v27, %v901_v35  ;;  %v893_v20 = vpop.f32.mrf.mxu1  ;;  %v1297_v19 = vor.u32 %v1296_v59, %v1293_v46  ;;  %v1234_v50 = vsel %vm7898_vm9, %v1232_v44, %v1233_v25  ;;  %v1522_v59 = vld [vmem:[#allocation2 + $0x24] sm:$0x8]  ;;  %2183 = vmatpush.bf16.msrb.mxu2 %v7300_v42 }
 0x12c   :  { %v1536_v51 = vsel %vm7918_vm11, %v1534_v34, %v1535_v10  ;;  %v1313_v13 = vshll.u32 %v8417_v32, 16  ;;  %v1447_v52 = vunpack.c.l.b16 %v1237_v12  ;;  %v1565_v56 = vunpack.c.l.b16 %v1539_v2 }
 0x12d   :  { %1201 = vst.msk [vmem:[#allocation2 + $0x28] sm:$0xf] %vm1196_vm8, %v1192_v55  ;;  %v1145_v27 = vadd.f32 %v1132_v24, %v1008_v30  ;;  %v1299_v58 = vrot.slane %v1297_v19, 4  ;;  %v1663_v17 = vor.u32 %v1662_v53, %v1294_v57  ;;  %v1661_v45 = vrot.slane %v8387_v49, 4 }
 0x12e   :  { %v724_v4 = vpop.f32.mrf.mxu0  ;;  %v1135_v9 = vpop.f32.mrf.mxu3  ;;  %v1665_v48 = vrot.slane %v1662_v53, 4  ;;  %v1446_v21 = vunpack.c.l.b16 %v1234_v50  ;;  %v1564_v24 = vunpack.c.l.b16 %v1536_v51  ;;  %v1289_v25 = vrot.slane %v8389_v3, 4 }
 0x12f   :  { %v1157_v22 = vadd.f32 %v8307_v31, %v1145_v27  ;;  %v735_v14 = vadd.f32 %v724_v4, %v8342_v41  ;;  %v1308_v10 = vsel %vm7987_vm13, %v1299_v58, %v1307_v62  ;;  %v1664_v28 = vsel %vm7946_vm12, %v1661_v45, %v1663_v17  ;;  %v7304_v4 = vld [vmem:[#allocation4 + $0xe0] sm:$0xff] }
 0x130   :  { %v1673_v41 = vsel %vm7946_vm12, %v1665_v48, %v1672_v6  ;;  %v1453_v57 = vpack.c.b16 %v1447_v52, %v1446_v21  ;;  %v1571_v49 = vpack.c.b16 %v1565_v56, %v1564_v24  ;;  %v1298_v23 = vsel %vm7987_vm13, %v1289_v25, %v1297_v19  ;;  %2345 = vmatpush.bf16.msrb.mxu3 %v7304_v4 }
 0x131   :  { %v1165_v18 = vmax.f32 %v1157_v22, 0.0  ;;  %v902_v36 = vadd.f32 %v8396_v1, %v735_v14  ;;  %v1000_v11 = vpop.f32.mrf.mxu2  ;;  %v1312_v63 = vrot.slane %v1310_v7, 6  ;;  %v1369_v38 = vunpack.c.l.b16 %v1308_v10 }
 0x132   :  { %v1315_v40 = vrot.slane %v1313_v13, 7  ;;  %v1710_v1 = vunpack.c.l.b16 %v1664_v28  ;;  %v1711_v35 = vunpack.c.l.b16 %v1673_v41  ;;  %v1368_v46 = vunpack.c.l.b16 %v1298_v23  ;;  %v7292_v13 = vld [vmem:[#allocation4 + $0x80] sm:$0xff] }
 0x133   :  { %v1193_v3 = vpack.c.bf16 %v1165_v18, %v1165_v18  ;;  %v1009_v37 = vadd.f32 %v998_v43, %v902_v36  ;;  %v6336_v30 = vrot.slane %v8417_v32, 10  ;;  %v6378_v19 = vrot.slane %v1522_v59, 11  ;;  %1859 = vmatpush.bf16.msrb.mxu0 %v7292_v13 }
 0x134   :  { %6374 = vmatmul.msk.bf16.gmra.mxu1 %vm1402_vm14, %v1453_v57  ;;  %6396 = vmatmul.msk.bf16.gmra.mxu2 %vm1402_vm14, %v1571_v49  ;;  %v1211_v44 = vld [vmem:[#allocation2 + $0x28] sm:$0xf]  ;;  %v1375_v55 = vpack.c.b16 %v1369_v38, %v1368_v46  ;;  %v1316_v12 = vor.u32 %v1315_v40, %v1312_v63  ;;  %v1717_v2 = vpack.c.b16 %v1711_v35, %v1710_v1  ;;  %v1675_v50 = vshrl.u32 %v1522_v59, 16  ;;  %v1214_v1 = vld [vmem:[#allocation2 + $0x34] sm:$0x3] }
 0x135   :  { %1202 = vst.msk [vmem:[#allocation2 + $0x2c] sm:$0xf] %vm1196_vm8, %v1193_v3  ;;  %v1146_v34 = vadd.f32 %v1135_v9, %v1009_v37  ;;  %v1319_v62 = vshrl.u32 %v1211_v44, 16  ;;  %v1322_v54 = vshll.u32 %v1211_v44, 16  ;;  %v1240_v20 = vrot.slane %v1211_v44, 6 }
 0x136   :  { %v726_v60 = vpop.f32.mrf.mxu0  ;;  %v1137_v61 = vpop.f32.mrf.mxu3  ;;  %v1542_v53 = vrot.slane %v1211_v44, 7  ;;  %v1317_v9 = vrot.slane %v1316_v12, 4  ;;  %v6400_v10 = vrot.slane %v1675_v50, 11  ;;  %v1260_v3 = vld [vmem:[#allocation2 + $0x34] sm:$0x7] }
 0x137   :  { %v1158_v43 = vadd.f32 %v8307_v31, %v1146_v34  ;;  %v1321_v7 = vrot.slane %v1319_v62, 6  ;;  %v1324_v27 = vrot.slane %v1322_v54, 7  ;;  %v1679_v51 = vrot.slane %v1319_v62, 7  ;;  %v7296_v31 = vld [vmem:[#allocation4 + $0xa0] sm:$0xff]  ;;  %v1648_v35 = vld [vmem:[#allocation2 + $0x34] sm:$0xf] }
 0x138   :  { %v1241_v58 = vsel %vm7898_vm9, %v6336_v30, %v1240_v20  ;;  %v1242_v17 = vrot.slane %v1240_v20, 4  ;;  %v1543_v22 = vsel %vm7918_vm11, %v6378_v19, %v1542_v53  ;;  %v1544_v45 = vrot.slane %v1542_v53, 4  ;;  %2051 = vmatpush.bf16.msrb.mxu1 %v7296_v31 }
 0x139   :  { %v1166_v6 = vmax.f32 %v1158_v43, 0.0  ;;  %6354 = vmatmul.msk.bf16.gmra.mxu0 %vm1402_vm14, %v1375_v55  ;;  %6418 = vmatmul.msk.bf16.gmra.mxu3 %vm1402_vm14, %v1717_v2  ;;  %v1325_v21 = vor.u32 %v1324_v27, %v1321_v7  ;;  %v1680_v18 = vor.u32 %v1679_v51, %v1322_v54  ;;  %v1448_v11 = vunpack.c.l.b16 %v1241_v58 }
 0x13a   :  { %v1566_v41 = vunpack.c.l.b16 %v1543_v22  ;;  %v1682_v59 = vrot.slane %v1679_v51, 4  ;;  %v1349_v60 = vshrl.u32 %v1260_v3, 16  ;;  %v1352_v61 = vshll.u32 %v1260_v3, 16 }
 0x13b   :  { %v1186_v32 = vsel %vm1170_vm10, %v1166_v6, 0.0  ;;  %v1326_v37 = vsel %vm7987_vm13, %v1317_v9, %v1325_v21  ;;  %v1327_v38 = vrot.slane %v1325_v21, 4  ;;  %v1681_v46 = vsel %vm7946_vm12, %v6400_v10, %v1680_v18  ;;  %v1889_v21 = vld [vmem:[#allocation2 + $0x8] sm:$0xf] }
 0x13c   :  { %v1194_v52 = vpack.c.bf16 %v1186_v32, %v1186_v32  ;;  %v8461_v56 = vld [vmem:[#allocation2 + $0x2c] sm:$0xf]  ;;  %v1249_v43 = vrot.slane %v1214_v1, 6  ;;  %v1551_v55 = vrot.slane %v1260_v3, 7  ;;  %v1692_v30 = vshrl.u32 %v1648_v35, 16 }
 0x13d   :  { %v1243_v14 = vrot.slane %v8461_v56, 6  ;;  %v1545_v48 = vrot.slane %v8461_v56, 7  ;;  %v1329_v24 = vshrl.u32 %v8461_v56, 16  ;;  %v1332_v25 = vshll.u32 %v8461_v56, 16  ;;  %v8496_v32 = vld [vmem:[#allocation2 + $0xc] sm:$0xf] }
 0x13e   :  { %1203 = vst.msk [vmem:[#allocation2 + $0x30] sm:$0xf] %vm1196_vm8, %v1194_v52  ;;  %v1370_v12 = vunpack.c.l.b16 %v1326_v37  ;;  %v1712_v19 = vunpack.c.l.b16 %v1681_v46  ;;  %v1351_v4 = vrot.slane %v1349_v60, 6  ;;  %v1354_v31 = vrot.slane %v1352_v61, 7 }
 0x13f   :  { %v1244_v36 = vsel %vm7898_vm9, %v1242_v17, %v1243_v14  ;;  %v1546_v28 = vsel %vm7918_vm11, %v1544_v45, %v1545_v48  ;;  %v1331_v23 = vrot.slane %v1329_v24, 6  ;;  %v1334_v63 = vrot.slane %v1332_v25, 7 }
 0x140   :  { %v1449_v57 = vunpack.c.l.b16 %v1244_v36  ;;  %v1567_v49 = vunpack.c.l.b16 %v1546_v28  ;;  %v8482_v40 = vrot.slane %v1329_v24, 7  ;;  %v1694_v58 = vrot.slane %v1692_v30, 7 }
 0x141   :  { %v8484_v34 = vor.u32 %v1334_v63, %v1331_v23  ;;  %v1695_v17 = vshll.u32 %v1648_v35, 16  ;;  %v1909_v10 = vshll.u32 %v8496_v32, 16  ;;  %v1913_v18 = vshrl.u32 %v8496_v32, 16 }
 0x142   :  { %v1454_v44 = vpack.c.b16 %v1449_v57, %v1448_v11  ;;  %v1572_v42 = vpack.c.b16 %v1567_v49, %v1566_v41  ;;  %v1684_v62 = vor.u32 %v8482_v40, %v1332_v25  ;;  %v1245_v36 = vrot.slane %v1243_v14, 4 }
 0x143   :  { %v1336_v54 = vsel %vm7987_vm13, %v1327_v38, %v8484_v34  ;;  %v1547_v28 = vrot.slane %v1545_v48, 4  ;;  %v1355_v49 = vor.u32 %v1354_v31, %v1351_v4  ;;  %v1697_v23 = vor.u32 %v1695_v17, %v1694_v58  ;;  %v163_v48 = vld [vmem:[#allocation2 + $0x18] sm:$0x3] }
 0x144   :  { %6375 = vmatmul.msk.bf16.gmra.mxu1 %vm1402_vm14, %v1454_v44  ;;  %6397 = vmatmul.msk.bf16.gmra.mxu2 %vm1402_vm14, %v1572_v42  ;;  %v1371_v2 = vunpack.c.l.b16 %v1336_v54  ;;  %v1685_v20 = vsel %vm7946_vm12, %v1682_v59, %v1684_v62  ;;  %v1900_v63 = vshrl.u32 %v1889_v21, 16  ;;  %v1903_v56 = vshll.u32 %v1889_v21, 16  ;;  %v8518_v54 = vld [vmem:[#allocation2 + $0x10] sm:$0xf] }
 0x145   :  { %v1213_v53 = vld [vmem:[#allocation2 + $0x30] sm:$0xf]  ;;  %v1713_v6 = vunpack.c.l.b16 %v1685_v20  ;;  %v1686_v42 = vrot.slane %v8482_v40, 4  ;;  %v1911_v46 = vrot.slane %v1909_v10, 5  ;;  %v1915_v59 = vrot.slane %v1913_v18, 4 }
 0x146   :  { %v1246_v7 = vrot.slane %v1213_v53, 6  ;;  %v1548_v27 = vrot.slane %v1213_v53, 7  ;;  %v1339_v50 = vshrl.u32 %v1213_v53, 16  ;;  %v1376_v51 = vpack.c.b16 %v1371_v2, %v1370_v12 }
 0x147   :  { %v1342_v13 = vshll.u32 %v1213_v53, 16  ;;  %v1718_v9 = vpack.c.b16 %v1713_v6, %v1712_v19  ;;  %v1337_v61 = vrot.slane %v8484_v34, 4  ;;  %v1902_v30 = vrot.slane %v1900_v63, 4  ;;  %v2081_v19 = vld [vmem:[#allocation2 + $0x8] sm:$0xe] }
 0x148   :  { %v1248_v52 = vrot.slane %v1246_v7, 4  ;;  %v1550_v22 = vrot.slane %v1548_v27, 4  ;;  %v1341_v45 = vrot.slane %v1339_v50, 6  ;;  %v1687_v25 = vrot.slane %v1339_v50, 7 }
 0x149   :  { %6355 = vmatmul.msk.bf16.gmra.mxu0 %vm1402_vm14, %v1376_v51  ;;  %6419 = vmatmul.msk.bf16.gmra.mxu3 %vm1402_vm14, %v1718_v9  ;;  %v1344_v24 = vrot.slane %v1342_v13, 7  ;;  %v1247_v3 = vsel %vm7898_vm9, %v1245_v36, %v1246_v7  ;;  %v1549_v37 = vsel %vm7918_vm11, %v1547_v28, %v1548_v27  ;;  %v164_v40 = vsel %vm7876_vm2, 0, %v163_v48  ;;  %v8534_v36 = vld [vmem:[#allocation2 + $0x14] sm:$0xf] }
 0x14a   :  { %v1250_v11 = vsel %vm7898_vm9, %v1248_v52, %v1249_v43  ;;  %v1552_v41 = vsel %vm7918_vm11, %v1550_v22, %v1551_v55  ;;  %v1688_v14 = vor.u32 %v1687_v25, %v1342_v13  ;;  %v1690_v38 = vrot.slane %v1687_v25, 4  ;;  %165 = vst [vmem:[#allocation2 + $0x18] sm:$0x3] %v164_v40 }
 0x14b   :  { %v1345_v57 = vor.u32 %v1344_v24, %v1341_v45  ;;  %v1451_v1 = vunpack.c.l.b16 %v1250_v11  ;;  %v1569_v35 = vunpack.c.l.b16 %v1552_v41  ;;  %v1450_v62 = vunpack.c.l.b16 %v1247_v3 }
 0x14c   :  { %v1568_v60 = vunpack.c.l.b16 %v1549_v37  ;;  %v1689_v43 = vsel %vm7946_vm12, %v1686_v42, %v1688_v14  ;;  %v1698_v55 = vsel %vm7946_vm12, %v1690_v38, %v1697_v23  ;;  %v1905_v20 = vrot.slane %v1903_v56, 5 }
 0x14d   :  { %v1347_v44 = vrot.slane %v1345_v57, 4  ;;  %v1455_v12 = vpack.c.b16 %v1451_v1, %v1450_v62  ;;  %v1346_v34 = vsel %vm7987_vm13, %v1337_v61, %v1345_v57  ;;  %v1919_v6 = vshll.u32 %v8518_v54, 16 }
 0x14e   :  { %v1573_v2 = vpack.c.b16 %v1569_v35, %v1568_v60  ;;  %v1714_v7 = vunpack.c.l.b16 %v1689_v43  ;;  %v1715_v27 = vunpack.c.l.b16 %v1698_v55  ;;  %v1916_v50 = vor.u32 %v1915_v59, %v1911_v46 }
 0x14f   :  { %v1356_v8 = vsel %vm7987_vm13, %v1347_v44, %v1355_v49  ;;  %v2095_v51 = vrot.slane %v8496_v32, 5  ;;  %v1372_v13 = vunpack.c.l.b16 %v1346_v34  ;;  %v1923_v4 = vshrl.u32 %v8518_v54, 16 }
 0x150   :  { %v1373_v53 = vunpack.c.l.b16 %v1356_v8  ;;  %v2216_v5 = vshrl.u32 %v2081_v19, 16  ;;  %v2219_v31 = vshll.u32 %v2081_v19, 16  ;;  %v1906_v9 = vor.u32 %v1905_v20, %v1902_v30 }
 0x151   :  { %v2098_v52 = vrot.slane %v8518_v54, 5  ;;  %v1921_v17 = vrot.slane %v1919_v6, 5  ;;  %v2224_v22 = vrot.slane %v1913_v18, 5  ;;  %v2225_v45 = vrot.slane %v1909_v10, 6  ;;  %v1893_v43 = vld [vmem:[#allocation2 + $0x18] sm:$0x1] }
 0x152   :  { %v1377_v58 = vpack.c.b16 %v1373_v53, %v1372_v13  ;;  %v1719_v21 = vpack.c.b16 %v1715_v27, %v1714_v7  ;;  %v1917_v24 = vrot.slane %v1916_v50, 4  ;;  %v2097_v25 = vrot.slane %v2095_v51, 4  ;;  %v2213_v40 = vld [vmem:[#allocation2 + $0x18] sm:$0x3] }
 0x153   :  { %v2218_v32 = vrot.slane %v2216_v5, 5  ;;  %v2221_v11 = vrot.slane %v2219_v31, 6  ;;  %v2229_v28 = vrot.slane %v1923_v4, 5  ;;  %v2230_v41 = vrot.slane %v1919_v6, 6  ;;  %v7272_v5 = vld [vmem:[#allocation2 + $0x8] sm:$0xff] }
 0x154   :  { %6376 = vmatmul.msk.bf16.gmra.mxu1 %vm1402_vm14, %v1455_v12  ;;  %6398 = vmatmul.msk.bf16.gmra.mxu2 %vm1402_vm14, %v1573_v2  ;;  %v1907_v57 = vrot.slane %v1906_v9, 4  ;;  %v6477_v49 = vrot.slane %v2081_v19, 9  ;;  %v2099_v23 = vsel %vm8126_vm3, %v2097_v25, %v2098_v52  ;;  %v1922_v10 = vsel %vm8141_vm4, %v1917_v24, %v1921_v17  ;;  %v166_v19 = vld [vmem:[#allocation2 + $0x38] sm:$0x3]  ;;  %v8561_v25 = vld [vmem:[#allocation2 + $0x2c] sm:$0xf] }
 0x155   :  { %v2226_v18 = vor.u32 %v2225_v45, %v2224_v22  ;;  %v1929_v63 = vshll.u32 %v8534_v36, 16  ;;  %v1933_v3 = vshrl.u32 %v8534_v36, 16  ;;  %v2222_v38 = vor.u32 %v2221_v11, %v2218_v32 }
 0x156   :  { %v1912_v37 = vsel %vm8141_vm4, %v1907_v57, %v1911_v46  ;;  %v2096_v14 = vsel %vm8126_vm3, %v6477_v49, %v2095_v51  ;;  %v8548_v1 = vor.u32 %v2230_v41, %v2229_v28  ;;  %v1997_v35 = vunpack.c.l.b16 %v1922_v10 }
 0x157   :  { %v2129_v44 = vunpack.c.l.b16 %v2099_v23  ;;  %v1925_v56 = vrot.slane %v1923_v4, 4  ;;  %v2228_v48 = vrot.slane %v2226_v18, 4  ;;  %v1931_v42 = vrot.slane %v1929_v63, 5 }
 0x158   :  { %v1935_v59 = vrot.slane %v1933_v3, 4  ;;  %v1996_v62 = vunpack.c.l.b16 %v1912_v37  ;;  %v2128_v60 = vunpack.c.l.b16 %v2096_v14  ;;  %v2223_v61 = vrot.slane %v2222_v38, 4 }
 0x159   :  { %6356 = vmatmul.msk.bf16.gmra.mxu0 %vm1402_vm14, %v1377_v58  ;;  %6420 = vmatmul.msk.bf16.gmra.mxu3 %vm1402_vm14, %v1719_v21  ;;  %v2232_v8 = vsel %vm8157_vm7, %v2228_v48, %v8548_v1  ;;  %v1926_v55 = vor.u32 %v1925_v56, %v1921_v17  ;;  %v2101_v30 = vrot.slane %v8534_v36, 5  ;;  %v1939_v34 = vshll.u32 %v1893_v43, 16  ;;  %v1894_v36 = vld [vmem:[#allocation2 + $0x28] sm:$0xf] }
 0x15a   :  { %v2004_v46 = vpack.c.b16 %v1997_v35, %v1996_v62  ;;  %v2136_v54 = vpack.c.b16 %v2129_v44, %v2128_v60  ;;  %v2227_v12 = vsel %vm8157_vm7, %v2223_v61, %v2226_v18  ;;  %v1936_v2 = vor.u32 %v1935_v59, %v1931_v42  ;;  %v8575_v35 = vld [vmem:[#allocation2 + $0x30] sm:$0xf]  ;;  %v2082_v61 = vld [vmem:[#allocation2 + $0x28] sm:$0xe] }
 0x15b   :  { %v2291_v20 = vunpack.c.l.b16 %v2232_v8  ;;  %v2234_v53 = vrot.slane %v1933_v3, 5  ;;  %v2235_v6 = vrot.slane %v1929_v63, 6  ;;  %v2240_v7 = vshrl.u32 %v2213_v40, 16 }
 0x15c   :  { %v2243_v27 = vshll.u32 %v2213_v40, 16  ;;  %v2290_v50 = vunpack.c.l.b16 %v2227_v12  ;;  %v1927_v51 = vrot.slane %v1926_v55, 4  ;;  %v2100_v13 = vrot.slane %v2098_v52, 4 }
 0x15d   :  { %v2103_v4 = vrot.slane %v2101_v30, 4  ;;  %v1937_v31 = vrot.slane %v1936_v2, 4  ;;  %v1941_v9 = vrot.slane %v1939_v34, 5  ;;  %v2104_v58 = vrot.slane %v1893_v43, 5 }
 0x15e   :  { %v167_v17 = vsel %vm7876_vm2, 0, %v166_v19  ;;  %v2298_v22 = vpack.c.b16 %v2291_v20, %v2290_v50  ;;  %v2236_v45 = vor.u32 %v2235_v6, %v2234_v53  ;;  %v2242_v21 = vrot.slane %v2240_v7, 5  ;;  %v7286_v20 = vld [vmem:[#allocation2 + $0x10] sm:$0xff] }
 0x15f   :  { %168 = vst [vmem:[#allocation2 + $0x38] sm:$0x3] %v167_v17  ;;  %v2245_v24 = vrot.slane %v2243_v27, 6  ;;  %v2102_v52 = vsel %vm8126_vm3, %v2100_v13, %v2101_v30  ;;  %v1932_v32 = vsel %vm8141_vm4, %v1927_v51, %v1931_v42  ;;  %v1942_v11 = vsel %vm8141_vm4, %v1937_v31, %v1941_v9  ;;  %v1897_v51 = vld [vmem:[#allocation2 + $0x34] sm:$0xf] }
 0x160   :  { %v2105_v28 = vsel %vm8126_vm3, %v2103_v4, %v2104_v58  ;;  %v2233_v41 = vrot.slane %v8548_v1, 4  ;;  %v1953_v57 = vshll.u32 %v8561_v25, 16  ;;  %v1957_v49 = vshrl.u32 %v8561_v25, 16 }
 0x161   :  { %v2130_v23 = vunpack.c.l.b16 %v2102_v52  ;;  %v2238_v10 = vrot.slane %v2236_v45, 4  ;;  %v2246_v18 = vor.u32 %v2245_v24, %v2242_v21  ;;  %v1944_v63 = vshrl.u32 %v1894_v36, 16 }
 0x162   :  { %v1998_v3 = vunpack.c.l.b16 %v1932_v32  ;;  %v1999_v37 = vunpack.c.l.b16 %v1942_v11  ;;  %v2131_v14 = vunpack.c.l.b16 %v2105_v28  ;;  %v1947_v38 = vshll.u32 %v1894_v36, 16 }
 0x163   :  { %v1955_v44 = vrot.slane %v1953_v57, 5  ;;  %v1959_v56 = vrot.slane %v1957_v49, 4  ;;  %v2237_v48 = vsel %vm8157_vm7, %v2233_v41, %v2236_v45  ;;  %v2247_v1 = vsel %vm8157_vm7, %v2238_v10, %v2246_v18 }
 0x164   :  { %6473 = vmatmul.msk.bf16.vlgmr.msrb.gmra.mxu1 %vm1402_vm14, %v2004_v46  ;;  %6495 = vmatmul.msk.bf16.vlgmr.msrb.gmra.mxu2 %vm1402_vm14, %v2136_v54  ;;  %v2005_v42 = vpack.c.b16 %v1999_v37, %v1998_v3  ;;  %v2137_v59 = vpack.c.b16 %v2131_v14, %v2130_v23  ;;  %v1946_v62 = vrot.slane %v1944_v63, 4  ;;  %v1949_v60 = vrot.slane %v1947_v38, 5 }
 0x165   :  { %v1963_v8 = vshll.u32 %v8575_v35, 16  ;;  %v2292_v46 = vunpack.c.l.b16 %v2237_v48  ;;  %v2293_v54 = vunpack.c.l.b16 %v2247_v1  ;;  %v1960_v43 = vor.u32 %v1959_v56, %v1955_v44 }
 0x166   :  { %v2108_v55 = vrot.slane %v8561_v25, 5  ;;  %v1967_v30 = vshrl.u32 %v8575_v35, 16  ;;  %v2249_v40 = vshrl.u32 %v2082_v61, 16  ;;  %v2252_v12 = vshll.u32 %v2082_v61, 16  ;;  %v1898_v38 = vld [vmem:[#allocation2 + $0x38] sm:$0x1] }
 0x167   :  { %v1950_v2 = vor.u32 %v1949_v60, %v1946_v62  ;;  %v2111_v34 = vrot.slane %v8575_v35, 5  ;;  %v1965_v19 = vrot.slane %v1963_v8, 5  ;;  %v2257_v53 = vrot.slane %v1957_v49, 5 }
 0x168   :  { %v2258_v6 = vrot.slane %v1953_v57, 6  ;;  %v2299_v7 = vpack.c.b16 %v2293_v54, %v2292_v46  ;;  %v1961_v27 = vrot.slane %v1960_v43, 4  ;;  %v2110_v50 = vrot.slane %v2108_v55, 4 }
 0x169   :  { %6453 = vmatmul.msk.bf16.vlgmr.msrb.gmra.mxu0 %vm1402_vm14, %v7272_v5  ;;  %6515 = vmatmul.msk.bf16.vlgmr.msrb.gmra.mxu3 %vm1402_vm14, %v2298_v22  ;;  %v2251_v13 = vrot.slane %v2249_v40, 5  ;;  %v2254_v4 = vrot.slane %v2252_v12, 6  ;;  %v2262_v5 = vrot.slane %v1967_v30, 5  ;;  %v2263_v31 = vrot.slane %v1963_v8, 6 }
 0x16a   :  { %v1951_v9 = vrot.slane %v1950_v2, 4  ;;  %v6478_v58 = vrot.slane %v2082_v61, 9  ;;  %v2112_v17 = vsel %vm8126_vm3, %v2110_v50, %v2111_v34  ;;  %v1966_v22 = vsel %vm8141_vm4, %v1961_v27, %v1965_v19 }
 0x16b   :  { %v2259_v45 = vor.u32 %v2258_v6, %v2257_v53  ;;  %v1973_v21 = vshll.u32 %v1897_v51, 16  ;;  %v1977_v24 = vshrl.u32 %v1897_v51, 16  ;;  %v2255_v36 = vor.u32 %v2254_v4, %v2251_v13 }
 0x16c   :  { %v1956_v25 = vsel %vm8141_vm4, %v1951_v9, %v1955_v44  ;;  %v2109_v52 = vsel %vm8126_vm3, %v6478_v58, %v2108_v55  ;;  %v2264_v32 = vor.u32 %v2263_v31, %v2262_v5  ;;  %v2001_v11 = vunpack.c.l.b16 %v1966_v22  ;;  %v2214_v44 = vld [vmem:[#allocation2 + $0x38] sm:$0x3]  ;;  %v7273_v55 = vld [vmem:[#allocation2 + $0x28] sm:$0xff] }
 0x16d   :  { %v2133_v28 = vunpack.c.l.b16 %v2112_v17  ;;  %v1969_v41 = vrot.slane %v1967_v30, 4  ;;  %v2261_v57 = vrot.slane %v2259_v45, 4  ;;  %v1975_v49 = vrot.slane %v1973_v21, 5 }
 0x16e   :  { %v1979_v23 = vrot.slane %v1977_v24, 4  ;;  %v2000_v10 = vunpack.c.l.b16 %v1956_v25  ;;  %v2132_v18 = vunpack.c.l.b16 %v2109_v52  ;;  %v2256_v63 = vrot.slane %v2255_v36, 4  ;;  %v7287_v52 = vld [vmem:[#allocation2 + $0x30] sm:$0xff] }
 0x16f   :  { %v2265_v3 = vsel %vm8157_vm7, %v2261_v57, %v2264_v32  ;;  %v1970_v35 = vor.u32 %v1969_v41, %v1965_v19  ;;  %v1983_v1 = vshll.u32 %v1898_v38, 16  ;;  %v2267_v62 = vrot.slane %v1977_v24, 5 }
 0x170   :  { %v2006_v37 = vpack.c.b16 %v2001_v11, %v2000_v10  ;;  %v2138_v14 = vpack.c.b16 %v2133_v28, %v2132_v18  ;;  %v2260_v56 = vsel %vm8157_vm7, %v2256_v63, %v2259_v45  ;;  %v1980_v48 = vor.u32 %v1979_v23, %v1975_v49 }
 0x171   :  { %v2268_v60 = vrot.slane %v1973_v21, 6  ;;  %v2273_v61 = vshrl.u32 %v2214_v44, 16  ;;  %v2276_v8 = vshll.u32 %v2214_v44, 16  ;;  %v2294_v46 = vunpack.c.l.b16 %v2260_v56 }
 0x172   :  { %v1971_v54 = vrot.slane %v1970_v35, 4  ;;  %v2113_v43 = vrot.slane %v2111_v34, 4  ;;  %v1981_v30 = vrot.slane %v1980_v48, 4  ;;  %v1985_v40 = vrot.slane %v1983_v1, 5 }
 0x173   :  { %v2117_v2 = vrot.slane %v1898_v38, 5  ;;  %v2269_v19 = vor.u32 %v2268_v60, %v2267_v62  ;;  %v2275_v53 = vrot.slane %v2273_v61, 5  ;;  %v2278_v6 = vrot.slane %v2276_v8, 6 }
 0x174   :  { %6474 = vmatmul.msk.bf16.gmra.mxu1 %vm1402_vm14, %v2005_v42  ;;  %6496 = vmatmul.msk.bf16.gmra.mxu2 %vm1402_vm14, %v2137_v59  ;;  %v2114_v42 = vrot.slane %v1897_v51, 5  ;;  %v2295_v59 = vunpack.c.l.b16 %v2265_v3  ;;  %v1986_v27 = vsel %vm8141_vm4, %v1981_v30, %v1985_v40  ;;  %v2266_v51 = vrot.slane %v2264_v32, 4  ;;  %v7319_v3 = vld [vmem:[#allocation7 + $0x38] sm:$0xff] }
 0x175   :  { %v2271_v13 = vrot.slane %v2269_v19, 4  ;;  %v2279_v4 = vor.u32 %v2278_v6, %v2275_v53  ;;  %v2003_v31 = vunpack.c.l.b16 %v1986_v27  ;;  %2628 = vmatpush.bf16.msra.mxu0 %v7319_v3  ;;  %vm2397_vm9 = vcmp.lt.s32.totalorder %v8328_v33, 18 }
 0x176   :  { %v2116_v12 = vrot.slane %v2114_v42, 4  ;;  %v2115_v34 = vsel %vm8126_vm3, %v2113_v43, %v2114_v42  ;;  %v2270_v17 = vsel %vm8157_vm7, %v2266_v51, %v2269_v19  ;;  %v7318_v42 = vld [vmem:[#allocation7 + $0x30] sm:$0xff]  ;;  %v7313_v43 = vld [vmem:[#allocation7 + $0x18] sm:$0xff] }
 0x177   :  { %v2134_v9 = vunpack.c.l.b16 %v2115_v34  ;;  %v2280_v22 = vsel %vm8157_vm7, %v2271_v13, %v2279_v4  ;;  %v2296_v24 = vunpack.c.l.b16 %v2270_v17  ;;  %7520 = vmatpush.bf16.msra.mxu2 %v7313_v43  ;;  %2705 = vmatpush.bf16.msra.mxu1 %v7313_v43 }
 0x178   :  { %v2118_v50 = vsel %vm8126_vm3, %v2116_v12, %v2117_v2  ;;  %v2297_v25 = vunpack.c.l.b16 %v2280_v22  ;;  %v7311_v22 = vld [vmem:[#allocation7 + $0x8] sm:$0xff] }
 0x179   :  { %6454 = vmatmul.msk.bf16.gmra.mxu0 %vm1402_vm14, %v7286_v20  ;;  %6516 = vmatmul.msk.bf16.gmra.mxu3 %vm1402_vm14, %v2299_v7  ;;  %v2300_v20 = vpack.c.b16 %v2295_v59, %v2294_v46  ;;  %v1976_v7 = vsel %vm8141_vm4, %v1971_v54, %v1975_v49  ;;  %v2135_v58 = vunpack.c.l.b16 %v2118_v50 }
 0x17a   :  { %v2002_v5 = vunpack.c.l.b16 %v1976_v7  ;;  %v2301_v36 = vpack.c.b16 %v2297_v25, %v2296_v24  ;;  %2629 = vmatpush.bf16.msra.mxu0 %v7318_v42  ;;  %v8654_v24 = vld [vmem:[%s9601_s4] ss:$0 sm:$0xff] }
 0x17b   :  { %v2139_v21 = vpack.c.b16 %v2135_v58, %v2134_v9  ;;  %v7316_v9 = vld [vmem:[#allocation7 + $0x20] sm:$0xff] }
 0x17c   :  { %v2007_v45 = vpack.c.b16 %v2003_v31, %v2002_v5  ;;  %v7312_v5 = vld [vmem:[#allocation7 + $0x10] sm:$0xff] }
 0x17d   :  { %v7326_v31 = vld [vmem:[#allocation7 + $0x70] sm:$0xff]  ;;  %7521 = vmatpush.bf16.msra.mxu2 %v7312_v5  ;;  %2706 = vmatpush.bf16.msra.mxu1 %v7312_v5  ;;  %v7324_v5 = vld [vmem:[#allocation7 + $0x60] sm:$0xff] }
 0x181   :  { %7522 = vmatpush.bf16.msra.mxu2 %v7311_v22  ;;  %2707 = vmatpush.bf16.msra.mxu1 %v7311_v22 }
 0x184   :  { %6475 = vmatmul.msk.bf16.gmra.mxu1 %vm1402_vm14, %v2006_v37  ;;  %6497 = vmatmul.msk.bf16.gmra.mxu2 %vm1402_vm14, %v2138_v14 }
 0x189   :  { %6455 = vmatmul.msk.bf16.gmra.mxu0 %vm1402_vm14, %v7273_v55  ;;  %6517 = vmatmul.msk.bf16.gmra.mxu3 %vm1402_vm14, %v2300_v20  ;;  %v7327_v55 = vld [vmem:[#allocation7 + $0x78] sm:$0xff]  ;;  %v7317_v20 = vld [vmem:[#allocation7 + $0x28] sm:$0xff] }
 0x18a   :  { %2985 = vmatpush.bf16.msra.mxu3 %v7327_v55  ;;  %2630 = vmatpush.bf16.msra.mxu0 %v7317_v20 }
 0x18e   :  { %2986 = vmatpush.bf16.msra.mxu3 %v7326_v31  ;;  %2631 = vmatpush.bf16.msra.mxu0 %v7316_v9 }
 0x194   :  { %6476 = vmatmul.msk.bf16.gmra.mxu1 %vm1402_vm14, %v2007_v45  ;;  %6498 = vmatmul.msk.bf16.gmra.mxu2 %vm1402_vm14, %v2139_v21 }
 0x199   :  { %6456 = vmatmul.msk.bf16.gmra.mxu0 %vm1402_vm14, %v7287_v52  ;;  %6518 = vmatmul.msk.bf16.gmra.mxu3 %vm1402_vm14, %v2301_v36 }
 0x1a1   :  { %v1501_v32 = vpop.f32.mrf.mxu1 }
 0x1a6   :  { %v1424_v11 = vpop.f32.mrf.mxu0 }
 0x1a7   :  { %v1619_v28 = vpop.f32.mrf.mxu2  ;;  %v1502_v19 = vadd.f32 %v1501_v32, %v1424_v11  ;;  %v7310_v11 = vld [vmem:[#allocation7] sm:$0xff] }
 0x1a8   :  { %7523 = vmatpush.bf16.msra.mxu2 %v7310_v11  ;;  %2708 = vmatpush.bf16.msra.mxu1 %v7310_v11 }
 0x1a9   :  { %v1503_v41 = vpop.f32.mrf.mxu1  ;;  %v1639_v7 = vadd.f32 %v1619_v28, %v1502_v19 }
 0x1ac   :  { %v1765_v47 = vpop.f32.mrf.mxu3 }
 0x1ad   :  { %v1785_v27 = vadd.f32 %v1765_v47, %v1639_v7 }
 0x1ae   :  { %v1426_v57 = vpop.f32.mrf.mxu0 }
 0x1af   :  { %v1621_v49 = vpop.f32.mrf.mxu2  ;;  %v1504_v51 = vadd.f32 %v1503_v41, %v1426_v57 }
 0x1b1   :  { %v8621_v23 = vpop.f32.mrf.mxu1  ;;  %v1640_v45 = vadd.f32 %v1621_v49, %v1504_v51 }
 0x1b4   :  { %v1767_v10 = vpop.f32.mrf.mxu3 }
 0x1b5   :  { %v1786_v25 = vadd.f32 %v1767_v10, %v1640_v45 }
 0x1b6   :  { %v1429_v18 = vpop.f32.mrf.mxu0 }
 0x1b7   :  { %v8623_v63 = vpop.f32.mrf.mxu2  ;;  %v1507_v28 = vadd.f32 %v8621_v23, %v1429_v18  ;;  %v7325_v18 = vld [vmem:[#allocation7 + $0x68] sm:$0xff] }
 0x1b8   :  { %2987 = vmatpush.bf16.msra.mxu3 %v7325_v18 }
 0x1b9   :  { %v1508_v37 = vpop.f32.mrf.mxu1 }
 0x1bc   :  { %v8625_v14 = vpop.f32.mrf.mxu3  ;;  %2988 = vmatpush.bf16.msra.mxu3 %v7324_v5  ;;  %v2435_v5 = vld [vmem:[#allocation3 + $0x14] sm:$0x7] }
 0x1be   :  { %v1431_v38 = vpop.f32.mrf.mxu0 }
 0x1bf   :  { %v1626_v35 = vpop.f32.mrf.mxu2  ;;  %v1641_v38 = vadd.f32 %v8623_v63, %v1507_v28 }
 0x1c1   :  { %v8627_v44 = vpop.f32.mrf.mxu1 }
 0x1c4   :  { %v1772_v56 = vpop.f32.mrf.mxu3 }
 0x1c5   :  { %v1787_v56 = vadd.f32 %v8625_v14, %v1641_v38 }
 0x1c6   :  { %v8629_v48 = vpop.f32.mrf.mxu0 }
 0x1c7   :  { %v8631_v1 = vpop.f32.mrf.mxu2  ;;  %v1512_v14 = vadd.f32 %v8627_v44, %v8629_v48 }
 0x1c9   :  { %v8633_v59 = vpop.f32.mrf.mxu1 }
 0x1cc   :  { %v8635_v62 = vpop.f32.mrf.mxu3 }
 0x1ce   :  { %v8637_v60 = vpop.f32.mrf.mxu0 }
 0x1cf   :  { %v8639_v61 = vpop.f32.mrf.mxu2 }
 0x1d1   :  { %v8641_v8 = vpop.f32.mrf.mxu1 }
 0x1d4   :  { %v8643_v46 = vpop.f32.mrf.mxu3 }
 0x1d6   :  { %v8645_v54 = vpop.f32.mrf.mxu0 }
 0x1d7   :  { %v8647_v30 = vpop.f32.mrf.mxu2  ;;  %v1517_v22 = vadd.f32 %v8641_v8, %v8645_v54 }
 0x1d9   :  { %v1518_v40 = vpop.f32.mrf.mxu1 }
 0x1dc   :  { %v8649_v12 = vpop.f32.mrf.mxu3 }
 0x1de   :  { %v1441_v2 = vpop.f32.mrf.mxu0 }
 0x1df   :  { %v1636_v53 = vpop.f32.mrf.mxu2 }
 0x1e1   :  { %v2053_v6 = vpop.f32.mrf.mxu1 }
 0x1e4   :  { %v1782_v34 = vpop.f32.mrf.mxu3 }
 0x1e6   :  { %v1861_v50 = vpop.f32.mrf.mxu0 }
 0x1e7   :  { %v1881_v13 = vadd.f32 %v1861_v50, %v1785_v27  ;;  %v2185_v4 = vpop.f32.mrf.mxu2  ;;  %v2431_v27 = vld [vmem:[#allocation3 + $0x4] sm:$0x8]  ;;  %v1514_v50 = vadd.f32 %v8633_v59, %v8637_v60 }
 0x1e8   :  { %v2488_v9 = vshrl.u32 %v2431_v27, 16  ;;  %v6519_v48 = vrot.slane %v2431_v27, 11 }
 0x1e9   :  { %v2073_v58 = vadd.f32 %v2053_v6, %v1881_v13  ;;  %v2055_v17 = vpop.f32.mrf.mxu1 }
 0x1ea   :  { %v6521_v28 = vrot.slane %v2488_v9, 11 }
 0x1eb   :  { %v2205_v21 = vadd.f32 %v2185_v4, %v2073_v58  ;;  %v7331_v58 = vld [vmem:[#allocation7 + $0x98] sm:$0xff] }
 0x1ec   :  { %v2347_v52 = vpop.f32.mrf.mxu3  ;;  %3117 = vmatpush.bf16.msrb.mxu0 %v7331_v58  ;;  %7524 = vmatpush.bf16.msrb.mxu3 %v7331_v58 }
 0x1ed   :  { %v2367_v36 = vadd.f32 %v2347_v52, %v2205_v21 }
 0x1ee   :  { %v1863_v32 = vpop.f32.mrf.mxu0 }
 0x1ef   :  { %v1882_v41 = vadd.f32 %v1863_v32, %v1786_v25  ;;  %v2187_v47 = vpop.f32.mrf.mxu2  ;;  %v2379_v57 = vadd.f32 %v8654_v24, %v2367_v36  ;;  %v1643_v36 = vadd.f32 %v8631_v1, %v1512_v14  ;;  %v1644_v32 = vadd.f32 %v8639_v61, %v1514_v50  ;;  %v171_v50 = vld [vmem:[#allocation3 + $0x18] sm:$0x3] }
 0x1f1   :  { %v2074_v49 = vadd.f32 %v2055_v17, %v1882_v41  ;;  %v2058_v3 = vpop.f32.mrf.mxu1  ;;  %v2387_v37 = vmax.f32 %v2379_v57, 0.0 }
 0x1f3   :  { %v2206_v10 = vadd.f32 %v2187_v47, %v2074_v49  ;;  %v2415_v35 = vpack.c.bf16 %v2387_v37, %v2387_v37  ;;  %v1789_v47 = vadd.f32 %v8635_v62, %v1643_v36  ;;  %v1790_v49 = vadd.f32 %v8643_v46, %v1644_v32  ;;  %v7323_v32 = vld [vmem:[#allocation7 + $0x58] sm:$0xff] }
 0x1f4   :  { %v2349_v42 = vpop.f32.mrf.mxu3  ;;  %2793 = vmatpush.bf16.msrb.mxu2 %v7323_v32 }
 0x1f5   :  { %2423 = vst.msk [vmem:[#allocation3 + $0x8] sm:$0xf] %vm1196_vm8, %v2415_v35  ;;  %v2368_v43 = vadd.f32 %v2349_v42, %v2206_v10 }
 0x1f6   :  { %v1866_v23 = vpop.f32.mrf.mxu0 }
 0x1f7   :  { %v1883_v55 = vadd.f32 %v1866_v23, %v1787_v56  ;;  %v2190_v40 = vpop.f32.mrf.mxu2  ;;  %v2380_v2 = vadd.f32 %v8654_v24, %v2368_v43 }
 0x1f9   :  { %v2075_v20 = vadd.f32 %v2058_v3, %v1883_v55  ;;  %v2060_v19 = vpop.f32.mrf.mxu1  ;;  %v2388_v53 = vmax.f32 %v2380_v2, 0.0  ;;  %v1645_v3 = vadd.f32 %v8647_v30, %v1517_v22 }
 0x1fb   :  { %v2207_v6 = vadd.f32 %v2190_v40, %v2075_v20  ;;  %v2416_v63 = vpack.c.bf16 %v2388_v53, %v2388_v53  ;;  %v2485_v53 = vld [vmem:[#allocation3 + $0x14] sm:$0xf] }
 0x1fc   :  { %v2352_v7 = vpop.f32.mrf.mxu3  ;;  %v2432_v34 = vld [vmem:[#allocation3 + $0x8] sm:$0xf]  ;;  %v2523_v36 = vshll.u32 %v2485_v53, 16 }
 0x1fd   :  { %2424 = vst.msk [vmem:[#allocation3 + $0xc] sm:$0xf] %vm1196_vm8, %v2416_v63  ;;  %v2369_v51 = vadd.f32 %v2352_v7, %v2207_v6  ;;  %v2493_v4 = vshrl.u32 %v2432_v34, 16  ;;  %v2826_v17 = vld [vmem:[#allocation3 + $0x8] sm:$0xf]  ;;  %v2453_v60 = vrot.slane %v2432_v34, 7 }
 0x1fe   :  { %v1868_v13 = vpop.f32.mrf.mxu0  ;;  %v2496_v21 = vshll.u32 %v2432_v34, 16  ;;  %v2837_v25 = vshrl.u32 %v2826_v17, 16  ;;  %v2840_v52 = vshll.u32 %v2826_v17, 16  ;;  %v7330_v6 = vld [vmem:[#allocation7 + $0x90] sm:$0xff] }
 0x1ff   :  { %v2192_v31 = vpop.f32.mrf.mxu2  ;;  %v2381_v44 = vadd.f32 %v8654_v24, %v2369_v51  ;;  %v2495_v45 = vrot.slane %v2493_v4, 7  ;;  %v2454_v1 = vsel %vm7918_vm11, %v6519_v48, %v2453_v60  ;;  %v2455_v56 = vrot.slane %v2453_v60, 4  ;;  %3118 = vmatpush.bf16.msrb.mxu0 %v7330_v6  ;;  %7525 = vmatpush.bf16.msrb.mxu3 %v7330_v6 }
 0x200   :  { %v2839_v8 = vrot.slane %v2837_v25, 4  ;;  %v2842_v54 = vrot.slane %v2840_v52, 5  ;;  %v2653_v27 = vunpack.c.l.b16 %v2454_v1  ;;  %v8694_v51 = vadd.f32 %v8649_v12, %v1645_v3 }
 0x201   :  { %v2063_v59 = vpop.f32.mrf.mxu1  ;;  %v2389_v11 = vmax.f32 %v2381_v44, 0.0  ;;  %v2498_v41 = vor.u32 %v2496_v21, %v2495_v45  ;;  %v2500_v13 = vrot.slane %v2495_v45, 4  ;;  %v2520_v31 = vshrl.u32 %v2485_v53, 16  ;;  %v8698_v44 = vld [vmem:[#allocation3 + $0x14] sm:$0xf] }
 0x202   :  { %v2843_v18 = vor.u32 %v2842_v54, %v2839_v8  ;;  %v172_v45 = vsel %vm7876_vm2, 0, %v171_v50  ;;  %v2462_v25 = vrot.slane %v2435_v5, 7 }
 0x203   :  { %v2409_v57 = vsel %vm2397_vm9, %v2389_v11, 0.0  ;;  %v2499_v30 = vsel %vm7946_vm12, %v6521_v28, %v2498_v41  ;;  %v2522_v52 = vrot.slane %v2520_v31, 7  ;;  %173 = vst [vmem:[#allocation3 + $0x18] sm:$0x3] %v172_v45 }
 0x204   :  { %v2417_v37 = vpack.c.bf16 %v2409_v57, %v2409_v57  ;;  %v2354_v38 = vpop.f32.mrf.mxu3  ;;  %v2433_v10 = vld [vmem:[#allocation3 + $0xc] sm:$0xf]  ;;  %v2576_v17 = vunpack.c.l.b16 %v2499_v30  ;;  %v2866_v57 = vshll.u32 %v8698_v44, 16 }
 0x205   :  { %v8680_v61 = vld [vmem:[#allocation3 + $0xc] sm:$0xf]  ;;  %v2456_v42 = vrot.slane %v2433_v10, 7  ;;  %v2502_v43 = vshrl.u32 %v2433_v10, 16  ;;  %v2505_v20 = vshll.u32 %v2433_v10, 16 }
 0x206   :  { %v1871_v35 = vpop.f32.mrf.mxu0  ;;  %v2846_v62 = vshll.u32 %v8680_v61, 16  ;;  %2425 = vst.msk [vmem:[#allocation3 + $0x10] sm:$0xf] %vm1196_vm8, %v2417_v37  ;;  %v2850_v55 = vshrl.u32 %v8680_v61, 16 }
 0x207   :  { %v1885_v23 = vadd.f32 %v1871_v35, %v1789_v47  ;;  %v2195_v46 = vpop.f32.mrf.mxu2  ;;  %v2457_v40 = vsel %vm7918_vm11, %v2455_v56, %v2456_v42  ;;  %v8689_v2 = vrot.slane %v2502_v43, 7  ;;  %v2458_v12 = vrot.slane %v2456_v42, 4 }
 0x208   :  { %v8691_v19 = vrot.slane %v2846_v62, 5  ;;  %v2654_v34 = vunpack.c.l.b16 %v2457_v40  ;;  %v2852_v14 = vrot.slane %v2850_v55, 4  ;;  %v2870_v43 = vshrl.u32 %v8698_v44, 16  ;;  %v7329_v55 = vld [vmem:[#allocation7 + $0x88] sm:$0xff] }
 0x209   :  { %v2077_v63 = vadd.f32 %v2063_v59, %v1885_v23  ;;  %v2065_v7 = vpop.f32.mrf.mxu1  ;;  %v2507_v4 = vor.u32 %v2505_v20, %v8689_v2  ;;  %v2844_v59 = vrot.slane %v2843_v18, 4  ;;  %v7322_v18 = vld [vmem:[#allocation7 + $0x50] sm:$0xff]  ;;  %3119 = vmatpush.bf16.msrb.mxu0 %v7329_v55  ;;  %7526 = vmatpush.bf16.msrb.mxu3 %v7329_v55 }
 0x20a   :  { %v2661_v58 = vpack.c.b16 %v2654_v34, %v2653_v27  ;;  %v2853_v22 = vor.u32 %v2852_v14, %v8691_v19  ;;  %2794 = vmatpush.bf16.msrb.mxu2 %v7322_v18 }
 0x20b   :  { %v2209_v9 = vadd.f32 %v2195_v46, %v2077_v63  ;;  %v2508_v48 = vsel %vm7946_vm12, %v2500_v13, %v2507_v4  ;;  %v2849_v8 = vsel %vm8141_vm4, %v2844_v59, %v8691_v19  ;;  %v8720_v13 = vld [vmem:[#allocation3 + $0x18] sm:$0x1]  ;;  %v2868_v4 = vrot.slane %v2866_v57, 5 }
 0x20c   :  { %v2357_v60 = vpop.f32.mrf.mxu3  ;;  %6559 = vmatmul.msk.bf16.vlgmr.msra.gmra.mxu1 %vm1402_vm14, %v2661_v58  ;;  %v2577_v21 = vunpack.c.l.b16 %v2508_v48  ;;  %v2854_v54 = vrot.slane %v2853_v22, 4  ;;  %v2933_v27 = vunpack.c.l.b16 %v2849_v8  ;;  %v2872_v58 = vrot.slane %v2870_v43, 4  ;;  %v2436_v43 = vld [vmem:[#allocation3 + $0x24] sm:$0x8] }
 0x20d   :  { %v2371_v11 = vadd.f32 %v2357_v60, %v2209_v9  ;;  %v8705_v41 = vld [vmem:[#allocation3 + $0x10] sm:$0xf]  ;;  %v2509_v60 = vrot.slane %v8689_v2, 4 }
 0x20e   :  { %v1873_v28 = vpop.f32.mrf.mxu0  ;;  %v2434_v47 = vld [vmem:[#allocation3 + $0x10] sm:$0xf]  ;;  %v2584_v38 = vpack.c.b16 %v2577_v21, %v2576_v17  ;;  %v2856_v10 = vshll.u32 %v8705_v41, 16  ;;  %v2860_v42 = vshrl.u32 %v8705_v41, 16  ;;  %v2876_v17 = vshll.u32 %v8720_v13, 16 }
 0x20f   :  { %v1886_v3 = vadd.f32 %v1873_v28, %v1790_v49  ;;  %v2197_v37 = vpop.f32.mrf.mxu2  ;;  %v2459_v1 = vrot.slane %v2434_v47, 7  ;;  %v2383_v35 = vadd.f32 %v8654_v24, %v2371_v11  ;;  %v2511_v56 = vshrl.u32 %v2434_v47, 16 }
 0x210   :  { %6539 = vmatmul.msk.bf16.vlgmr.msra.gmra.mxu0 %vm1402_vm14, %v2584_v38  ;;  %v2858_v46 = vrot.slane %v2856_v10, 5  ;;  %v2525_v49 = vor.u32 %v2523_v36, %v2522_v52  ;;  %v2514_v19 = vshll.u32 %v2434_v47, 16  ;;  %v2862_v53 = vrot.slane %v2860_v42, 4 }
 0x211   :  { %v2078_v62 = vadd.f32 %v2065_v7, %v1886_v3  ;;  %v2068_v23 = vpop.f32.mrf.mxu1  ;;  %v2461_v30 = vrot.slane %v2459_v1, 4  ;;  %v2391_v40 = vmax.f32 %v2383_v35, 0.0  ;;  %v2513_v20 = vrot.slane %v2511_v56, 7 }
 0x212   :  { %v2859_v63 = vsel %vm8141_vm4, %v2854_v54, %v2858_v46  ;;  %v2863_v9 = vor.u32 %v2862_v53, %v2858_v46  ;;  %v2460_v45 = vsel %vm7918_vm11, %v2458_v12, %v2459_v1  ;;  %v2873_v28 = vor.u32 %v2872_v58, %v2868_v4 }
 0x213   :  { %v2210_v6 = vadd.f32 %v2197_v37, %v2078_v62  ;;  %v2463_v7 = vsel %vm7918_vm11, %v2461_v30, %v2462_v25  ;;  %v2419_v34 = vpack.c.bf16 %v2391_v40, %v2391_v40  ;;  %v2934_v14 = vunpack.c.l.b16 %v2859_v63 }
 0x214   :  { %v2516_v50 = vor.u32 %v2514_v19, %v2513_v20  ;;  %v2359_v5 = vpop.f32.mrf.mxu3  ;;  %v2518_v31 = vrot.slane %v2513_v20, 4  ;;  %v2656_v52 = vunpack.c.l.b16 %v2463_v7  ;;  %v2655_v12 = vunpack.c.l.b16 %v2460_v45 }
 0x215   :  { %2427 = vst.msk [vmem:[#allocation3 + $0x28] sm:$0xf] %vm1196_vm8, %v2419_v34  ;;  %v2372_v22 = vadd.f32 %v2359_v5, %v2210_v6  ;;  %v2941_v59 = vpack.c.b16 %v2934_v14, %v2933_v27  ;;  %v2864_v47 = vrot.slane %v2863_v9, 4  ;;  %v2878_v2 = vrot.slane %v2876_v17, 5  ;;  %v7320_v14 = vld [vmem:[#allocation7 + $0x40] sm:$0xff] }
 0x216   :  { %v1876_v48 = vpop.f32.mrf.mxu0  ;;  %v2517_v32 = vsel %vm7946_vm12, %v2509_v60, %v2516_v50  ;;  %v2526_v11 = vsel %vm7946_vm12, %v2518_v31, %v2525_v49  ;;  %v2662_v37 = vpack.c.b16 %v2656_v52, %v2655_v12  ;;  %v2528_v20 = vshrl.u32 %v2436_v43, 16  ;;  %v7328_v50 = vld [vmem:[#allocation7 + $0x80] sm:$0xff]  ;;  %v174_v31 = vld [vmem:[#allocation3 + $0x38] sm:$0x3] }
 0x217   :  { %v1887_v21 = vadd.f32 %v1876_v48, %v8694_v51  ;;  %v2200_v25 = vpop.f32.mrf.mxu2  ;;  %v2384_v36 = vadd.f32 %v8654_v24, %v2372_v22  ;;  %6615 = vmatmul.msk.bf16.vlgmr.msra.gmra.mxu3 %vm1402_vm14, %v2941_v59  ;;  %v2874_v51 = vrot.slane %v2873_v28, 4  ;;  %v2578_v38 = vunpack.c.l.b16 %v2517_v32  ;;  %3120 = vmatpush.bf16.msrb.mxu0 %v7328_v50 }
 0x218   :  { %v2579_v10 = vunpack.c.l.b16 %v2526_v11  ;;  %v2869_v56 = vsel %vm8141_vm4, %v2864_v47, %v2868_v4  ;;  %v6520_v27 = vrot.slane %v2436_v43, 11  ;;  %v6522_v9 = vrot.slane %v2528_v20, 11  ;;  %7527 = vmatpush.bf16.msrb.mxu3 %v7328_v50 }
 0x219   :  { %v2079_v8 = vadd.f32 %v2068_v23, %v1887_v21  ;;  %v2070_v54 = vpop.f32.mrf.mxu1  ;;  %v2392_v57 = vmax.f32 %v2384_v36, 0.0  ;;  %v2879_v42 = vsel %vm8141_vm4, %v2874_v51, %v2878_v2  ;;  %v7321_v23 = vld [vmem:[#allocation7 + $0x48] sm:$0xff]  ;;  %v2935_v53 = vunpack.c.l.b16 %v2869_v56 }
 0x21a   :  { %v2585_v40 = vpack.c.b16 %v2579_v10, %v2578_v38  ;;  %2795 = vmatpush.bf16.msrb.mxu2 %v7321_v23  ;;  %v2936_v6 = vunpack.c.l.b16 %v2879_v42  ;;  %v175_v58 = vsel %vm7876_vm2, 0, %v174_v31  ;;  %v8756_v10 = vld [vmem:[#allocation3 + $0x34] sm:$0xf]  ;;  %vm6227_vm2 = vcmask 1041409  }
 0x21b   :  { %v2211_v3 = vadd.f32 %v2200_v25, %v2079_v8  ;;  %v2420_v1 = vpack.c.bf16 %v2392_v57, %v2392_v57  ;;  %176 = vst [vmem:[#allocation3 + $0x38] sm:$0x3] %v175_v58  ;;  %v2486_v8 = vld [vmem:[#allocation3 + $0x34] sm:$0xf] }
 0x21c   :  { %v2362_v35 = vpop.f32.mrf.mxu3  ;;  %6560 = vmatmul.msk.bf16.gmra.mxu1 %vm1402_vm14, %v2662_v37  ;;  %v2437_v62 = vld [vmem:[#allocation3 + $0x28] sm:$0xf]  ;;  %v2942_v17 = vpack.c.b16 %v2936_v6, %v2935_v53  ;;  %v2560_v38 = vshrl.u32 %v2486_v8, 16  ;;  %v2440_v23 = vld [vmem:[#allocation3 + $0x34] sm:$0x7] }
 0x21d   :  { %2428 = vst.msk [vmem:[#allocation3 + $0x2c] sm:$0xf] %vm1196_vm8, %v2420_v1  ;;  %v2373_v46 = vadd.f32 %v2362_v35, %v2211_v3  ;;  %v2533_v49 = vshrl.u32 %v2437_v62, 16  ;;  %v2831_v18 = vld [vmem:[#allocation3 + $0x28] sm:$0xf]  ;;  %v2466_v63 = vrot.slane %v2437_v62, 7 }
 0x21e   :  { %v1878_v30 = vpop.f32.mrf.mxu0  ;;  %v2881_v7 = vshrl.u32 %v2831_v18, 16  ;;  %v2884_v34 = vshll.u32 %v2831_v18, 16  ;;  %2796 = vmatpush.bf16.msrb.mxu2 %v7320_v14  ;;  %v2536_v48 = vshll.u32 %v2437_v62, 16  ;;  %v2562_v6 = vrot.slane %v2560_v38, 7 }
 0x21f   :  { %v2202_v55 = vpop.f32.mrf.mxu2  ;;  %v2385_v19 = vadd.f32 %v8654_v24, %v2373_v46  ;;  %v2535_v5 = vrot.slane %v2533_v49, 7  ;;  %v2468_v22 = vrot.slane %v2466_v63, 4  ;;  %v2467_v21 = vsel %vm7918_vm11, %v6520_v27, %v2466_v63 }
 0x220   :  { %6540 = vmatmul.msk.bf16.gmra.mxu0 %vm1402_vm14, %v2585_v40  ;;  %v2883_v52 = vrot.slane %v2881_v7, 4  ;;  %v2886_v36 = vrot.slane %v2884_v34, 5  ;;  %v2657_v47 = vunpack.c.l.b16 %v2467_v21  ;;  %v2563_v46 = vshll.u32 %v2486_v8, 16 }
 0x221   :  { %v2393_v4 = vmax.f32 %v2385_v19, 0.0  ;;  %v2538_v32 = vor.u32 %v2536_v48, %v2535_v5  ;;  %v2540_v35 = vrot.slane %v2535_v5, 4  ;;  %v2910_v30 = vshll.u32 %v8756_v10, 16 }
 0x222   :  { %v2887_v42 = vor.u32 %v2886_v36, %v2883_v52  ;;  %v2914_v40 = vshrl.u32 %v8756_v10, 16  ;;  %v2475_v34 = vrot.slane %v2440_v23, 7  ;;  %v2565_v48 = vor.u32 %v2563_v46, %v2562_v6 }
 0x223   :  { %v2413_v24 = vsel %vm2397_vm9, %v2393_v4, 0.0  ;;  %v2539_v1 = vsel %vm7946_vm12, %v6522_v9, %v2538_v32  ;;  %v2912_v5 = vrot.slane %v2910_v30, 5 }
 0x224   :  { %v2421_v59 = vpack.c.bf16 %v2413_v24, %v2413_v24  ;;  %v2364_v45 = vpop.f32.mrf.mxu3  ;;  %v2438_v60 = vld [vmem:[#allocation3 + $0x2c] sm:$0xf]  ;;  %v2580_v49 = vunpack.c.l.b16 %v2539_v1  ;;  %v2888_v19 = vrot.slane %v2887_v42, 4  ;;  %v2916_v24 = vrot.slane %v2914_v40, 4  ;;  %v3018_v40 = vld [vmem:[#allocation3 + $0x8] sm:$0xe] }
 0x225   :  { %v8748_v25 = vld [vmem:[#allocation3 + $0x2c] sm:$0xf]  ;;  %v2469_v0 = vrot.slane %v2438_v60, 7  ;;  %v2542_v11 = vshrl.u32 %v2438_v60, 16  ;;  %v2545_v57 = vshll.u32 %v2438_v60, 16  ;;  %v6619_v6 = vrot.slane %v3018_v40, 9 }
 0x226   :  { %v2890_v28 = vshll.u32 %v8748_v25, 16  ;;  %2429 = vst.msk [vmem:[#allocation3 + $0x30] sm:$0xf] %vm1196_vm8, %v2421_v59  ;;  %v2894_v54 = vshrl.u32 %v8748_v25, 16  ;;  %v2917_v8 = vor.u32 %v2916_v24, %v2912_v5 }
 0x227   :  { %6616 = vmatmul.msk.bf16.gmra.mxu3 %vm1402_vm14, %v2942_v17  ;;  %v2470_v12 = vsel %vm7918_vm11, %v2468_v22, %v2469_v0  ;;  %v2544_v2 = vrot.slane %v2542_v11, 7  ;;  %v2471_v60 = vrot.slane %v2469_v0, 4 }
 0x228   :  { %v2658_v51 = vunpack.c.l.b16 %v2470_v12  ;;  %v2892_v3 = vrot.slane %v2890_v28, 5  ;;  %v2896_v37 = vrot.slane %v2894_v54, 4  ;;  %v8776_v28 = vld [vmem:[#allocation3 + $0x38] sm:$0x1]  ;;  %v2918_v1 = vrot.slane %v2917_v8, 4 }
 0x229   :  { %v2547_v56 = vor.u32 %v2545_v57, %v2544_v2  ;;  %v2920_v57 = vshll.u32 %v8776_v28, 16  ;;  %v3054_v8 = vrot.slane %v8776_v28, 5 }
 0x22a   :  { %v2663_v43 = vpack.c.b16 %v2658_v51, %v2657_v47  ;;  %v2897_v55 = vor.u32 %v2896_v37, %v2892_v3  ;;  %v2893_v14 = vsel %vm8141_vm4, %v2888_v19, %v2892_v3  ;;  %v2549_v47 = vrot.slane %v2544_v2, 4 }
 0x22b   :  { %v2548_v62 = vsel %vm7946_vm12, %v2540_v35, %v2547_v56  ;;  %v2937_v45 = vunpack.c.l.b16 %v2893_v14  ;;  %v2922_v35 = vrot.slane %v2920_v57, 5  ;;  %v7308_v14 = vld [vmem:[#allocation3 + $0x8] sm:$0xff] }
 0x22c   :  { %6561 = vmatmul.msk.bf16.vlgmr.msra.gmra.mxu2 %vm1402_vm14, %v2663_v43  ;;  %v2581_v18 = vunpack.c.l.b16 %v2548_v62  ;;  %v2898_v31 = vrot.slane %v2897_v55, 4  ;;  %v3035_v55 = vrot.slane %v8705_v41, 5 }
 0x22d   :  { %v8765_v20 = vld [vmem:[#allocation3 + $0x30] sm:$0xf]  ;;  %v2923_v46 = vsel %vm8141_vm4, %v2918_v1, %v2922_v35 }
 0x22e   :  { %v2439_v53 = vld [vmem:[#allocation3 + $0x30] sm:$0xf]  ;;  %v2586_v63 = vpack.c.b16 %v2581_v18, %v2580_v49  ;;  %v2900_v27 = vshll.u32 %v8765_v20, 16  ;;  %v2904_v4 = vshrl.u32 %v8765_v20, 16  ;;  %v2940_v49 = vunpack.c.l.b16 %v2923_v46 }
 0x22f   :  { %v2472_v7 = vrot.slane %v2439_v53, 7  ;;  %v2551_v50 = vshrl.u32 %v2439_v53, 16  ;;  %v2554_v22 = vshll.u32 %v2439_v53, 16  ;;  %v3032_v18 = vrot.slane %v8680_v61, 5  ;;  %v7315_v28 = vld [vmem:[#allocation3 + $0x30] sm:$0xff] }
 0x230   :  { %6541 = vmatmul.msk.bf16.gmra.mxu0 %vm1402_vm14, %v2586_v63  ;;  %v2902_v9 = vrot.slane %v2900_v27, 5  ;;  %v2906_v21 = vrot.slane %v2904_v4, 4  ;;  %v3045_v27 = vrot.slane %v8748_v25, 5  ;;  %v3037_v24 = vrot.slane %v3035_v55, 4 }
 0x231   :  { %v2474_v58 = vrot.slane %v2472_v7, 4  ;;  %v2553_v17 = vrot.slane %v2551_v50, 7  ;;  %v2473_v12 = vsel %vm7918_vm11, %v2471_v60, %v2472_v7  ;;  %v3034_v53 = vrot.slane %v3032_v18, 4  ;;  %v3019_v50 = vld [vmem:[#allocation3 + $0x28] sm:$0xe] }
 0x232   :  { %v2903_v59 = vsel %vm8141_vm4, %v2898_v31, %v2902_v9  ;;  %v2907_v3 = vor.u32 %v2906_v21, %v2902_v9  ;;  %v2659_v38 = vunpack.c.l.b16 %v2473_v12  ;;  %v3033_v7 = vsel %vm8126_vm3, %v6619_v6, %v3032_v18  ;;  %v7341_v6 = vld [vmem:[%s9604_s7 + $0x38] sm:$0xff] }
 0x233   :  { %v2938_v52 = vunpack.c.l.b16 %v2903_v59  ;;  %v2476_v36 = vsel %vm7918_vm11, %v2474_v58, %v2475_v34  ;;  %v2556_v32 = vor.u32 %v2554_v22, %v2553_v17  ;;  %v2558_v11 = vrot.slane %v2553_v17, 4  ;;  %3512 = vmatpush.bf16.msra.mxu2 %v7341_v6 }
 0x234   :  { %v2660_v51 = vunpack.c.l.b16 %v2476_v36  ;;  %v2908_v62 = vrot.slane %v2907_v3, 4  ;;  %v3036_v63 = vsel %vm8126_vm3, %v3034_v53, %v3035_v55  ;;  %v3048_v34 = vrot.slane %v8765_v20, 5  ;;  %v7359_v53 = vld [vmem:[%s9604_s7 + $0xb8] sm:$0xff] }
 0x235   :  { %v2943_v54 = vpack.c.b16 %v2938_v52, %v2937_v45  ;;  %v2557_v0 = vsel %vm7946_vm12, %v2549_v47, %v2556_v32  ;;  %v2566_v37 = vsel %vm7946_vm12, %v2558_v11, %v2565_v48  ;;  %v3066_v61 = vunpack.c.l.b16 %v3036_v63  ;;  %v7314_v52 = vld [vmem:[#allocation3 + $0x10] sm:$0xff]  ;;  %3624 = vmatpush.bf16.msra.mxu3 %v7359_v53  ;;  %v7344_v53 = vld [vmem:[%s9604_s7 + $0x40] sm:$0xff] }
 0x236   :  { %v2664_v56 = vpack.c.b16 %v2660_v51, %v2659_v38  ;;  %v2582_v42 = vunpack.c.l.b16 %v2557_v0  ;;  %v2583_v43 = vunpack.c.l.b16 %v2566_v37  ;;  %v2913_v23 = vsel %vm8141_vm4, %v2908_v62, %v2912_v5  ;;  %v7309_v51 = vld [vmem:[#allocation3 + $0x28] sm:$0xff] }
 0x237   :  { %6617 = vmatmul.msk.bf16.gmra.mxu3 %vm1402_vm14, %v2943_v54  ;;  %v2939_v30 = vunpack.c.l.b16 %v2913_v23  ;;  %v3065_v41 = vunpack.c.l.b16 %v3033_v7  ;;  %v3047_v4 = vrot.slane %v3045_v27, 4  ;;  %v6620_v31 = vrot.slane %v3019_v50, 9  ;;  %v7357_v50 = vld [vmem:[%s9604_s7 + $0xa8] sm:$0xff] }
 0x238   :  { %v2587_v2 = vpack.c.b16 %v2583_v43, %v2582_v42  ;;  %v3038_v58 = vrot.slane %v8698_v44, 5  ;;  %v3041_v48 = vrot.slane %v8720_v13, 5  ;;  %v3051_v60 = vrot.slane %v8756_v10, 5 }
 0x239   :  { %v2944_v19 = vpack.c.b16 %v2940_v49, %v2939_v30  ;;  %v3073_v5 = vpack.c.b16 %v3066_v61, %v3065_v41  ;;  %v3049_v9 = vsel %vm8126_vm3, %v3047_v4, %v3048_v34  ;;  %v3046_v25 = vsel %vm8126_vm3, %v6620_v31, %v3045_v27  ;;  %v7358_v27 = vld [vmem:[%s9604_s7 + $0xb0] sm:$0xff]  ;;  %v7351_v61 = vld [vmem:[%s9604_s7 + $0x78] sm:$0xff]  ;;  %v7356_v31 = vld [vmem:[%s9604_s7 + $0xa0] sm:$0xff] }
 0x23a   :  { %v3070_v20 = vunpack.c.l.b16 %v3049_v9  ;;  %v3069_v17 = vunpack.c.l.b16 %v3046_v25  ;;  %v3040_v22 = vrot.slane %v3038_v58, 4  ;;  %v3039_v45 = vsel %vm8126_vm3, %v3037_v24, %v3038_v58  ;;  %3625 = vmatpush.bf16.msra.mxu3 %v7358_v27  ;;  %v7340_v41 = vld [vmem:[%s9604_s7 + $0x30] sm:$0xff]  ;;  %3419 = vmatpush.bf16.msrb.mxu1 %v7351_v61  ;;  %v7339_v58 = vld [vmem:[%s9604_s7 + $0x28] sm:$0xff] }
 0x23b   :  { %v3067_v21 = vunpack.c.l.b16 %v3039_v45  ;;  %v3050_v32 = vrot.slane %v3048_v34, 4  ;;  %v3053_v11 = vrot.slane %v3051_v60, 4  ;;  %3513 = vmatpush.bf16.msra.mxu2 %v7340_v41  ;;  %v7349_v24 = vld [vmem:[%s9604_s7 + $0x68] sm:$0xff]  ;;  %v7348_v45 = vld [vmem:[%s9604_s7 + $0x60] sm:$0xff] }
 0x23c   :  { %6562 = vmatmul.msk.bf16.gmra.mxu2 %vm1402_vm14, %v2664_v56  ;;  %v3075_v59 = vpack.c.b16 %v3070_v20, %v3069_v17  ;;  %v3042_v44 = vsel %vm8126_vm3, %v3040_v22, %v3041_v48  ;;  %v7355_v17 = vld [vmem:[%s9604_s7 + $0x98] sm:$0xff]  ;;  %v7338_v48 = vld [vmem:[%s9604_s7 + $0x20] sm:$0xff] }
 0x23d   :  { %v3068_v36 = vunpack.c.l.b16 %v3042_v44  ;;  %v3052_v54 = vsel %vm8126_vm3, %v3050_v32, %v3051_v60  ;;  %v3055_v10 = vsel %vm8126_vm3, %v3053_v11, %v3054_v8  ;;  %v7367_v22 = vld [vmem:[%s9604_s7 + $0xf8] sm:$0xff]  ;;  %v7354_v60 = vld [vmem:[%s9604_s7 + $0x90] sm:$0xff]  ;;  %v7353_v11 = vld [vmem:[%s9604_s7 + $0x88] sm:$0xff] }
 0x23e   :  { %v3071_v12 = vunpack.c.l.b16 %v3052_v54  ;;  %v3072_v47 = vunpack.c.l.b16 %v3055_v10  ;;  %3626 = vmatpush.bf16.msra.mxu3 %v7357_v50  ;;  %3840 = vmatpush.bf16.msra.mxu0 %v7367_v22  ;;  %v7347_v32 = vld [vmem:[%s9604_s7 + $0x58] sm:$0xff]  ;;  %v7336_v54 = vld [vmem:[%s9604_s7 + $0x10] sm:$0xff] }
 0x23f   :  { %v3074_v13 = vpack.c.b16 %v3068_v36, %v3067_v21  ;;  %3514 = vmatpush.bf16.msra.mxu2 %v7339_v58  ;;  %v7366_v21 = vld [vmem:[%s9604_s7 + $0xf0] sm:$0xff] }
 0x240   :  { %6542 = vmatmul.msk.bf16.gmra.mxu0 %vm1402_vm14, %v2587_v2  ;;  %v3076_v57 = vpack.c.b16 %v3072_v47, %v3071_v12  ;;  %v7362_v50 = vld [vmem:[%s9604_s7 + $0xd0] sm:$0xff] }
 0x242   :  { %3627 = vmatpush.bf16.msra.mxu3 %v7356_v31  ;;  %3841 = vmatpush.bf16.msra.mxu0 %v7366_v21 }
 0x243   :  { %3515 = vmatpush.bf16.msra.mxu2 %v7338_v48 }
 0x246   :  { %3628 = vmatpush.bf16.msra.mxu3 %v7355_v17  ;;  %v3194_v17 = vld [vmem:[#allocation2 + $0x4] sm:$0x8] }
 0x247   :  { %6618 = vmatmul.msk.bf16.gmra.mxu3 %vm1402_vm14, %v2944_v19  ;;  %v3259_v48 = vshrl.u32 %v3194_v17, 16 }
 0x24a   :  { %3629 = vmatpush.bf16.msra.mxu3 %v7354_v60 }
 0x24c   :  { %6595 = vmatmul.msk.bf16.vlgmr.msrb.gmra.mxu2 %vm1402_vm14, %v7308_v14 }
 0x24e   :  { %3630 = vmatpush.bf16.msra.mxu3 %v7353_v11 }
 0x250   :  { %6637 = vmatmul.msk.bf16.vlgmr.msrb.gmra.mxu0 %vm1402_vm14, %v3073_v5  ;;  %v7350_v5 = vld [vmem:[%s9604_s7 + $0x70] sm:$0xff] }
 0x251   :  { %3420 = vmatpush.bf16.msrb.mxu1 %v7350_v5 }
 0x255   :  { %3421 = vmatpush.bf16.msrb.mxu1 %v7349_v24 }
 0x257   :  { %6639 = vmatmul.msk.bf16.vlgmr.msrb.gmra.mxu3 %vm1402_vm14, %v3075_v59 }
 0x259   :  { %3422 = vmatpush.bf16.msrb.mxu1 %v7348_v45 }
 0x25c   :  { %6596 = vmatmul.msk.bf16.gmra.mxu2 %vm1402_vm14, %v7314_v52  ;;  %v7337_v52 = vld [vmem:[%s9604_s7 + $0x18] sm:$0xff] }
 0x25d   :  { %3516 = vmatpush.bf16.msra.mxu2 %v7337_v52  ;;  %3423 = vmatpush.bf16.msrb.mxu1 %v7347_v32 }
 0x260   :  { %6638 = vmatmul.msk.bf16.gmra.mxu0 %vm1402_vm14, %v3074_v13  ;;  %v7365_v13 = vld [vmem:[%s9604_s7 + $0xe8] sm:$0xff] }
 0x261   :  { %3842 = vmatpush.bf16.msra.mxu0 %v7365_v13  ;;  %3517 = vmatpush.bf16.msra.mxu2 %v7336_v54  ;;  %v6643_v13 = vrot.slane %v3259_v48, 11 }
 0x267   :  { %6640 = vmatmul.msk.bf16.gmra.mxu3 %vm1402_vm14, %v3076_v57  ;;  %v7346_v57 = vld [vmem:[%s9604_s7 + $0x50] sm:$0xff] }
 0x268   :  { %3424 = vmatpush.bf16.msrb.mxu1 %v7346_v57 }
 0x26c   :  { %6597 = vmatmul.msk.bf16.gmra.mxu2 %vm1402_vm14, %v7309_v51  ;;  %v7352_v51 = vld [vmem:[%s9604_s7 + $0x80] sm:$0xff] }
 0x26d   :  { %3631 = vmatpush.bf16.msra.mxu3 %v7352_v51 }
 0x27c   :  { %6598 = vmatmul.msk.bf16.gmra.mxu2 %vm1402_vm14, %v7315_v28 }
 0x289   :  { %v2710_v3 = vpop.f32.mrf.mxu1 }
 0x28d   :  { %v2633_v0 = vpop.f32.mrf.mxu0 }
 0x28e   :  { %v2711_v37 = vadd.f32 %v2710_v3, %v2633_v0  ;;  %v8925_v3 = vld [vmem:[%s9603_s6] ss:$0 sm:$0xff] }
 0x291   :  { %v8825_v38 = vpop.f32.mrf.mxu1 }
 0x295   :  { %v8827_v1 = vpop.f32.mrf.mxu0 }
 0x296   :  { %v2713_v12 = vadd.f32 %v8825_v38, %v8827_v1  ;;  %v7335_v38 = vld [vmem:[%s9604_s7 + $0x8] sm:$0xff] }
 0x297   :  { %3518 = vmatpush.bf16.msra.mxu2 %v7335_v38 }
 0x299   :  { %v2715_v35 = vpop.f32.mrf.mxu1 }
 0x29a   :  { %v2990_v56 = vpop.f32.mrf.mxu3 }
 0x29d   :  { %v2638_v42 = vpop.f32.mrf.mxu0 }
 0x29e   :  { %v8829_v43 = vadd.f32 %v2715_v35, %v2638_v42 }
 0x2a1   :  { %v2717_v62 = vpop.f32.mrf.mxu1 }
 0x2a2   :  { %v8831_v2 = vpop.f32.mrf.mxu3 }
 0x2a5   :  { %v2640_v23 = vpop.f32.mrf.mxu0 }
 0x2a6   :  { %v7363_v23 = vld [vmem:[%s9604_s7 + $0xd8] sm:$0xff] }
 0x2aa   :  { %v8833_v46 = vpop.f32.mrf.mxu3 }
 0x2ad   :  { %v2643_v30 = vpop.f32.mrf.mxu0 }
 0x2af   :  { %v2720_v49 = vpop.f32.mrf.mxu2 }
 0x2b0   :  { %v8835_v18 = vadd.f32 %v2720_v49, %v2643_v30 }
 0x2b2   :  { %v2997_v55 = vpop.f32.mrf.mxu3 }
 0x2b5   :  { %v8837_v40 = vpop.f32.mrf.mxu0 }
 0x2b7   :  { %v8839_v19 = vpop.f32.mrf.mxu2 }
 0x2ba   :  { %v8847_v63 = vpop.f32.mrf.mxu3 }
 0x2bd   :  { %v8852_v7 = vpop.f32.mrf.mxu0 }
 0x2bf   :  { %v8854_v34 = vpop.f32.mrf.mxu2 }
 0x2c2   :  { %v8856_v14 = vpop.f32.mrf.mxu3 }
 0x2c5   :  { %v2650_v4 = vpop.f32.mrf.mxu0 }
 0x2c7   :  { %v2727_v9 = vpop.f32.mrf.mxu2 }
 0x2c8   :  { %v7361_v9 = vld [vmem:[%s9604_s7 + $0xc8] sm:$0xff] }
 0x2ca   :  { %v8876_v25 = vpop.f32.mrf.mxu3 }
 0x2cd   :  { %v3122_v20 = vpop.f32.mrf.mxu0 }
 0x2cf   :  { %v2798_v59 = vpop.f32.mrf.mxu2 }
 0x2d0   :  { %v2818_v44 = vadd.f32 %v2798_v59, %v2711_v37  ;;  %v7364_v37 = vld [vmem:[%s9604_s7 + $0xe0] sm:$0xff] }
 0x2d1   :  { %3843 = vmatpush.bf16.msra.mxu0 %v7364_v37  ;;  %v7360_v59 = vld [vmem:[%s9604_s7 + $0xc0] sm:$0xff] }
 0x2d2   :  { %v3007_v36 = vpop.f32.mrf.mxu3  ;;  %v3010_v8 = vadd.f32 %v2990_v56, %v2818_v44  ;;  %v7345_v56 = vld [vmem:[%s9604_s7 + $0x48] sm:$0xff]  ;;  %v6641_v44 = vrot.slane %v3194_v17, 11 }
 0x2d3   :  { %3425 = vmatpush.bf16.msrb.mxu1 %v7345_v56 }
 0x2d4   :  { %v3142_v28 = vadd.f32 %v3122_v20, %v3010_v8 }
 0x2d5   :  { %v3124_v10 = vpop.f32.mrf.mxu0  ;;  %3844 = vmatpush.bf16.msra.mxu0 %v7363_v23 }
 0x2d6   :  { %v3154_v42 = vadd.f32 %v8925_v3, %v3142_v28 }
 0x2d7   :  { %v2800_v47 = vpop.f32.mrf.mxu2  ;;  %3426 = vmatpush.bf16.msrb.mxu1 %v7344_v53 }
 0x2d8   :  { %v2819_v0 = vadd.f32 %v2800_v47, %v2713_v12  ;;  %v3162_v6 = vmax.f32 %v3154_v42, 0.0 }
 0x2d9   :  { %3845 = vmatpush.bf16.msra.mxu0 %v7362_v50 }
 0x2da   :  { %v3011_v1 = vadd.f32 %v8831_v2, %v2819_v0  ;;  %v8934_v35 = vpop.f32.mrf.mxu3  ;;  %v7334_v2 = vld [vmem:[%s9604_s7] sm:$0xff] }
 0x2db   :  { %3519 = vmatpush.bf16.msra.mxu2 %v7334_v2 }
 0x2dc   :  { %v3143_v62 = vadd.f32 %v3124_v10, %v3011_v1  ;;  %v7374_v1 = vld [vmem:[%s9604_s7 + $0x130] sm:$0xff] }
 0x2dd   :  { %v3127_v30 = vpop.f32.mrf.mxu0  ;;  %3846 = vmatpush.bf16.msra.mxu0 %v7361_v9 }
 0x2de   :  { %v3155_v49 = vadd.f32 %v8925_v3, %v3143_v62 }
 0x2df   :  { %v2803_v55 = vpop.f32.mrf.mxu2 }
 0x2e0   :  { %v3163_v27 = vmax.f32 %v3155_v49, 0.0  ;;  %v2820_v61 = vadd.f32 %v2803_v55, %v8829_v43  ;;  %v7375_v43 = vld [vmem:[%s9604_s7 + $0x138] sm:$0xff] }
 0x2e1   :  { %3996 = vmatpush.bf16.msra.mxu1 %v7375_v43  ;;  %3847 = vmatpush.bf16.msra.mxu0 %v7360_v59 }
 0x2e2   :  { %v7455_v41 = vpack.c.bf16 %v3163_v27, %v3162_v6  ;;  %v3012_v4 = vadd.f32 %v8833_v46, %v2820_v61  ;;  %v8955_v5 = vpop.f32.mrf.mxu3  ;;  %v8965_v46 = vunpack.c.l.bf16 %v7739_v29  ;;  %v7373_v6 = vld [vmem:[%s9604_s7 + $0x128] sm:$0xff] }
 0x2e4   :  { %7508 = vst [vmem:[#allocation2 + $0x8] sm:$0xff] %v7455_v41   ;;  %v3144_v31 = vadd.f32 %v3127_v30, %v3012_v4 }
 0x2e5   :  { %v3129_v58 = vpop.f32.mrf.mxu0  ;;  %3997 = vmatpush.bf16.msra.mxu1 %v7374_v1 }
 0x2e6   :  { %v3156_v20 = vadd.f32 %v8925_v3, %v3144_v31 }
 0x2e7   :  { %v2805_v24 = vpop.f32.mrf.mxu2 }
 0x2e8   :  { %v3164_v22 = vmax.f32 %v3156_v20, 0.0 }
 0x2e9   :  { %3998 = vmatpush.bf16.msra.mxu1 %v7373_v6 }
 0x2ea   :  { %v3172_v45 = vsel %vm2397_vm9, %v3164_v22, 0.0  ;;  %v8972_v60 = vpop.f32.mrf.mxu3 }
 0x2eb   :  { %v7460_v21 = vpack.c.bf16 %v8965_v46, %v3172_v45  ;;  %v7332_v52 = vld [vmem:[#allocation2 + $0x8] sm:$0xff] }
 0x2ec   :  { %v3195_v36 = vld [vmem:[#allocation2 + $0x8] sm:$0xf]  ;;  %v8975_v32 = vld [vmem:[#allocation2 + $0xc] sm:$0xf]  ;;  %3632 = vmatmul.bf16.vlgmr.msra.gmra.mxu3 %v7332_v52 }
 0x2ed   :  { %v3216_v11 = vrot.slane %v3195_v36, 7  ;;  %v3219_v8 = vrot.slane %v8975_v32, 7  ;;  %v3264_v54 = vshrl.u32 %v3195_v36, 16  ;;  %v3661_v10 = vld [vmem:[#allocation2 + $0x8] sm:$0xf]  ;;  %7509 = vst [vmem:[#allocation2 + $0x10] sm:$0xff] %v7460_v21  }
 0x2ee   :  { %v3267_v12 = vshll.u32 %v3195_v36, 16  ;;  %v3273_v47 = vshrl.u32 %v8975_v32, 16  ;;  %v8979_v57 = vld [vmem:[#allocation2 + $0xc] sm:$0xf]  ;;  %v3672_v51 = vshrl.u32 %v3661_v10, 16  ;;  %v3675_v38 = vshll.u32 %v3661_v10, 16 }
 0x2ef   :  { %v3217_v28 = vsel %vm7918_vm11, %v6641_v44, %v3216_v11  ;;  %v3218_v0 = vrot.slane %v3216_v11, 4  ;;  %v3266_v37 = vrot.slane %v3264_v54, 7  ;;  %v2808_v56 = vpop.f32.mrf.mxu2  ;;  %v3276_v62 = vshll.u32 %v8975_v32, 16  ;;  %v7372_v32 = vld [vmem:[%s9604_s7 + $0x120] sm:$0xff] }
 0x2f0   :  { %v8986_v42 = vrot.slane %v3273_v47, 7  ;;  %v3674_v23 = vrot.slane %v3672_v51, 4  ;;  %v3681_v2 = vshll.u32 %v8979_v57, 16  ;;  %v2822_v30 = vadd.f32 %v2808_v56, %v8835_v18  ;;  %3999 = vmatpush.bf16.msra.mxu1 %v7372_v32 }
 0x2f1   :  { %v3220_v49 = vsel %vm7918_vm11, %v3218_v0, %v3219_v8  ;;  %v3269_v55 = vor.u32 %v3267_v12, %v3266_v37  ;;  %v3271_v53 = vrot.slane %v3266_v37, 4  ;;  %v3448_v27 = vunpack.c.l.b16 %v3217_v28 }
 0x2f2   :  { %v3449_v61 = vunpack.c.l.b16 %v3220_v49  ;;  %v3278_v50 = vor.u32 %v3276_v62, %v8986_v42  ;;  %v3677_v41 = vrot.slane %v3675_v38, 5  ;;  %v3014_v4 = vadd.f32 %v8847_v63, %v2822_v30  ;;  %v3139_v31 = vpop.f32.mrf.mxu3 }
 0x2f3   :  { %v3270_v18 = vsel %vm7946_vm12, %v6643_v13, %v3269_v55  ;;  %v3683_v9 = vrot.slane %v3681_v2, 5  ;;  %v3685_v43 = vshrl.u32 %v8979_v57, 16  ;;  %v2723_v11 = vadd.f32 %v8839_v19, %v8837_v40 }
 0x2f4   :  { %v3456_v58 = vpack.c.b16 %v3449_v61, %v3448_v27  ;;  %v3279_v20 = vsel %vm7946_vm12, %v3271_v53, %v3278_v50  ;;  %v3355_v24 = vunpack.c.l.b16 %v3270_v18  ;;  %v3678_v17 = vor.u32 %v3677_v41, %v3674_v23  ;;  %v9003_v48 = vld [vmem:[#allocation2 + $0x10] sm:$0xf]  ;;  %v3198_v52 = vld [vmem:[#allocation2 + $0x14] sm:$0x7] }
 0x2f5   :  { %v3356_v22 = vunpack.c.l.b16 %v3279_v20  ;;  %v3687_v59 = vrot.slane %v3685_v43, 4  ;;  %v3197_v45 = vld [vmem:[#allocation2 + $0x10] sm:$0xf]  ;;  %v3146_v63 = vadd.f32 %v8934_v35, %v3014_v4  ;;  %v3691_v21 = vshll.u32 %v9003_v48, 16  ;;  %v3256_v35 = vld [vmem:[#allocation2 + $0x14] sm:$0xf] }
 0x2f6   :  { %3520 = vmatmul.bf16.vlgmr.msra.gmra.mxu2 %v3456_v58  ;;  %v3679_v44 = vrot.slane %v3678_v17, 4  ;;  %v3222_v36 = vrot.slane %v3197_v45, 7  ;;  %v2726_v13 = vadd.f32 %v8854_v34, %v8852_v7  ;;  %v7342_v10 = vld [vmem:[#allocation2 + $0x10] sm:$0xff]  ;;  %v3221_v37 = vrot.slane %v3219_v8, 4  ;;  %v7371_v8 = vld [vmem:[%s9604_s7 + $0x118] sm:$0xff] }
 0x2f7   :  { %v3363_v54 = vpack.c.b16 %v3356_v22, %v3355_v24  ;;  %v3688_v12 = vor.u32 %v3687_v59, %v3683_v9  ;;  %v9014_v47 = vld [vmem:[#allocation2 + $0x14] sm:$0xf]  ;;  %v2810_v51 = vpop.f32.mrf.mxu2  ;;  %v3693_v0 = vrot.slane %v3691_v21, 5  ;;  %v3225_v7 = vrot.slane %v3198_v52, 7  ;;  %4000 = vmatpush.bf16.msra.mxu1 %v7371_v8  ;;  %v9036_v24 = vld [vmem:[#allocation2 + $0x18] sm:$0x1] }
 0x2f8   :  { %v3684_v28 = vsel %vm8141_vm4, %v3679_v44, %v3683_v9  ;;  %v3224_v38 = vrot.slane %v3222_v36, 4  ;;  %4649 = vst.msk [vmem:[#allocation2 + $0x14] sm:$0xf] %vm1196_vm8, %v7739_v29  ;;  %v2823_v40 = vadd.f32 %v2810_v51, %v2723_v11  ;;  %v3280_v34 = vrot.slane %v8986_v42, 4  ;;  %v7370_v44 = vld [vmem:[%s9604_s7 + $0x110] sm:$0xff] }
 0x2f9   :  { %3427 = vmatmul.bf16.vlgmr.msrb.gmra.mxu1 %v3363_v54  ;;  %v3689_v19 = vrot.slane %v3688_v12, 4  ;;  %v3158_v1 = vadd.f32 %v8925_v3, %v3146_v63  ;;  %v3776_v56 = vunpack.c.l.b16 %v3684_v28  ;;  %v3223_v62 = vsel %vm7918_vm11, %v3221_v37, %v3222_v36 }
 0x2fa   :  { %v3282_v23 = vshrl.u32 %v3197_v45, 16  ;;  %v3015_v2 = vadd.f32 %v8856_v14, %v2823_v40  ;;  %v3226_v42 = vsel %vm7918_vm11, %v3224_v38, %v3225_v7  ;;  %v3291_v49 = vshrl.u32 %v3256_v35, 16 }
 0x2fb   :  { %v3694_v30 = vsel %vm8141_vm4, %v3689_v19, %v3693_v0  ;;  %v3285_v6 = vshll.u32 %v3197_v45, 16  ;;  %v3695_v27 = vshrl.u32 %v9003_v48, 16  ;;  %v3294_v41 = vshll.u32 %v3256_v35, 16  ;;  %4001 = vmatpush.bf16.msra.mxu1 %v7370_v44  ;;  %v7368_v44 = vld [vmem:[%s9604_s7 + $0x100] sm:$0xff] }
 0x2fc   :  { %v3777_v55 = vunpack.c.l.b16 %v3694_v30  ;;  %v3284_v53 = vrot.slane %v3282_v23, 7  ;;  %v3147_v61 = vadd.f32 %v8955_v5, %v3015_v2  ;;  %v3293_v50 = vrot.slane %v3291_v49, 7  ;;  %3637 = vmatmul.bf16.gmra.mxu3 %v7342_v10 }
 0x2fd   :  { %v3701_v4 = vshll.u32 %v9014_v47, 16  ;;  %v3697_v9 = vrot.slane %v3695_v27, 4  ;;  %v3451_v58 = vunpack.c.l.b16 %v3226_v42  ;;  %v3705_v17 = vshrl.u32 %v9014_v47, 16 }
 0x2fe   :  { %v3784_v14 = vpack.c.b16 %v3777_v55, %v3776_v56  ;;  %v3287_v31 = vor.u32 %v3285_v6, %v3284_v53  ;;  %v3289_v18 = vrot.slane %v3284_v53, 4  ;;  %v3159_v43 = vadd.f32 %v8925_v3, %v3147_v61 }
 0x2ff   :  { %v3296_v20 = vor.u32 %v3294_v41, %v3293_v50  ;;  %v2813_v5 = vpop.f32.mrf.mxu2  ;;  %v3698_v59 = vor.u32 %v3697_v9, %v3693_v0  ;;  %v3703_v45 = vrot.slane %v3701_v4, 5  ;;  %v3711_v63 = vshll.u32 %v9036_v24, 16 }
 0x300   :  { %3848 = vmatmul.bf16.vlgmr.msra.gmra.mxu0 %v3784_v14  ;;  %v3288_v22 = vsel %vm7946_vm12, %v3280_v34, %v3287_v31  ;;  %v3166_v21 = vmax.f32 %v3158_v1, 0.0  ;;  %v3167_v52 = vmax.f32 %v3159_v43, 0.0  ;;  %v2824_v36 = vadd.f32 %v2813_v5, %v2726_v13  ;;  %v3199_v1 = vld [vmem:[#allocation2 + $0x24] sm:$0x8] }
 0x301   :  { %v3297_v32 = vsel %vm7946_vm12, %v3289_v18, %v3296_v20  ;;  %v3450_v11 = vunpack.c.l.b16 %v3223_v62  ;;  %v3357_v54 = vunpack.c.l.b16 %v3288_v22  ;;  %v3707_v10 = vrot.slane %v3705_v17, 4 }
 0x302   :  { %v7465_v12 = vpack.c.bf16 %v3167_v52, %v3166_v21  ;;  %v3016_v35 = vadd.f32 %v8876_v25, %v2824_v36  ;;  %v3358_v51 = vunpack.c.l.b16 %v3297_v32  ;;  %v3699_v28 = vrot.slane %v3698_v59, 4 }
 0x303   :  { %v3457_v0 = vpack.c.b16 %v3451_v58, %v3450_v11  ;;  %v3708_v37 = vor.u32 %v3707_v10, %v3703_v45  ;;  %v3713_v38 = vrot.slane %v3711_v63, 5  ;;  %v3299_v62 = vshrl.u32 %v3199_v1, 16 }
 0x304   :  { %7510 = vst [vmem:[#allocation2 + $0x28] sm:$0xff] %v7465_v12   ;;  %v3148_v40 = vadd.f32 %v8972_v60, %v3016_v35  ;;  %v3364_v7 = vpack.c.b16 %v3358_v51, %v3357_v54  ;;  %v3704_v34 = vsel %vm8141_vm4, %v3699_v28, %v3703_v45  ;;  %v7369_v60 = vld [vmem:[%s9604_s7 + $0x108] sm:$0xff]  ;;  %v6642_v30 = vrot.slane %v3199_v1, 11 }
 0x305   :  { %v3709_v13 = vrot.slane %v3708_v37, 4  ;;  %v3778_v8 = vunpack.c.l.b16 %v3704_v34  ;;  %4002 = vmatpush.bf16.msra.mxu1 %v7369_v60  ;;  %v6644_v6 = vrot.slane %v3299_v62, 11 }
 0x306   :  { %3525 = vmatmul.bf16.gmra.mxu2 %v3457_v0  ;;  %v3160_v19 = vadd.f32 %v8925_v3, %v3148_v40 }
 0x307   :  { %v2815_v56 = vpop.f32.mrf.mxu2  ;;  %v3714_v25 = vsel %vm8141_vm4, %v3709_v13, %v3713_v38 }
 0x308   :  { %v3168_v23 = vmax.f32 %v3160_v19, 0.0  ;;  %v3779_v2 = vunpack.c.l.b16 %v3714_v25 }
 0x309   :  { %3432 = vmatmul.bf16.gmra.mxu1 %v3364_v7 }
 0x30a   :  { %v3176_v3 = vsel %vm2397_vm9, %v3168_v23, 0.0  ;;  %v3785_v14 = vpack.c.b16 %v3779_v2, %v3778_v8  ;;  %4003 = vmatpush.bf16.msra.mxu1 %v7368_v44  ;;  %v9102_v44 = vld [vmem:[#allocation2 + $0x38] sm:$0x1] }
 0x30b   :  { %v7470_v42 = vpack.c.bf16 %v8965_v46, %v3176_v3  ;;  %v7333_v49 = vld [vmem:[#allocation2 + $0x28] sm:$0xff] }
 0x30c   :  { %v3200_v55 = vld [vmem:[#allocation2 + $0x28] sm:$0xf]  ;;  %v9060_v53 = vld [vmem:[#allocation2 + $0x2c] sm:$0xf]  ;;  %3642 = vmatmul.bf16.gmra.mxu3 %v7333_v49 }
 0x30d   :  { %v3229_v27 = vrot.slane %v3200_v55, 7  ;;  %v3232_v61 = vrot.slane %v9060_v53, 7  ;;  %v3304_v50 = vshrl.u32 %v3200_v55, 16  ;;  %v3307_v41 = vshll.u32 %v3200_v55, 16  ;;  %v3666_v4 = vld [vmem:[#allocation2 + $0x28] sm:$0xf] }
 0x30e   :  { %7511 = vst [vmem:[#allocation2 + $0x30] sm:$0xff] %v7470_v42   ;;  %v3313_v31 = vshrl.u32 %v9060_v53, 16  ;;  %v3316_v18 = vshll.u32 %v9060_v53, 16  ;;  %v9065_v9 = vld [vmem:[#allocation2 + $0x2c] sm:$0xf]  ;;  %v3716_v43 = vshrl.u32 %v3666_v4, 16 }
 0x30f   :  { %v3230_v58 = vsel %vm7918_vm11, %v6642_v30, %v3229_v27  ;;  %v3231_v20 = vrot.slane %v3229_v27, 4  ;;  %v3306_v17 = vrot.slane %v3304_v50, 7  ;;  %v3719_v5 = vshll.u32 %v3666_v4, 16 }
 0x310   :  { %3853 = vmatmul.bf16.gmra.mxu0 %v3785_v14  ;;  %v3452_v22 = vunpack.c.l.b16 %v3230_v58  ;;  %v9069_v59 = vrot.slane %v3313_v31, 7  ;;  %v3718_v45 = vrot.slane %v3716_v43, 4  ;;  %v3725_v63 = vshll.u32 %v9065_v9, 16 }
 0x311   :  { %v3233_v21 = vsel %vm7918_vm11, %v3231_v20, %v3232_v61  ;;  %v3309_v52 = vor.u32 %v3307_v41, %v3306_v17  ;;  %v3311_v36 = vrot.slane %v3306_v17, 4  ;;  %v3721_v32 = vrot.slane %v3719_v5, 5 }
 0x312   :  { %v3453_v11 = vunpack.c.l.b16 %v3233_v21  ;;  %v3318_v54 = vor.u32 %v3316_v18, %v9069_v59  ;;  %v3727_v10 = vrot.slane %v3725_v63, 5  ;;  %v3729_v12 = vshrl.u32 %v9065_v9, 16 }
 0x313   :  { %v3310_v35 = vsel %vm7946_vm12, %v6644_v6, %v3309_v52  ;;  %v3722_v51 = vor.u32 %v3721_v32, %v3718_v45  ;;  %v3234_v45 = vrot.slane %v3232_v61, 4  ;;  %v3320_v52 = vrot.slane %v9069_v59, 4 }
 0x314   :  { %v3458_v28 = vpack.c.b16 %v3453_v11, %v3452_v22  ;;  %v3319_v0 = vsel %vm7946_vm12, %v3311_v36, %v3318_v54  ;;  %v3359_v37 = vunpack.c.l.b16 %v3310_v35  ;;  %v3731_v38 = vrot.slane %v3729_v12, 4 }
 0x315   :  { %v3360_v40 = vunpack.c.l.b16 %v3319_v0  ;;  %v9085_v13 = vld [vmem:[#allocation2 + $0x30] sm:$0xf]  ;;  %v3723_v19 = vrot.slane %v3722_v51, 4  ;;  %v3203_v56 = vld [vmem:[#allocation2 + $0x34] sm:$0x7]  ;;  %v3755_v32 = vshll.u32 %v9102_v44, 16 }
 0x316   :  { %v3202_v7 = vld [vmem:[#allocation2 + $0x30] sm:$0xf]  ;;  %3530 = vmatmul.bf16.gmra.mxu2 %v3458_v28  ;;  %v3732_v34 = vor.u32 %v3731_v38, %v3727_v10  ;;  %v3735_v1 = vshll.u32 %v9085_v13, 16  ;;  %v3257_v60 = vld [vmem:[#allocation2 + $0x34] sm:$0xf]  ;;  %v3238_v50 = vrot.slane %v3203_v56, 7 }
 0x317   :  { %v3235_v25 = vrot.slane %v3202_v7, 7  ;;  %v3365_v62 = vpack.c.b16 %v3360_v40, %v3359_v37  ;;  %v7343_v23 = vld [vmem:[#allocation2 + $0x30] sm:$0xff]  ;;  %v3322_v8 = vshrl.u32 %v3202_v7, 16  ;;  %v3728_v3 = vsel %vm8141_vm4, %v3723_v19, %v3727_v10 }
 0x318   :  { %v9088_v2 = vld [vmem:[#allocation2 + $0x34] sm:$0xf]  ;;  %v3733_v30 = vrot.slane %v3732_v34, 4  ;;  %v3737_v42 = vrot.slane %v3735_v1, 5  ;;  %v3325_v6 = vshll.u32 %v3202_v7, 16  ;;  %v3331_v41 = vshrl.u32 %v3257_v60, 16 }
 0x319   :  { %4653 = vst.msk [vmem:[#allocation2 + $0x34] sm:$0xf] %vm1196_vm8, %v7739_v29  ;;  %3437 = vmatmul.bf16.gmra.mxu1 %v3365_v62  ;;  %v3237_v49 = vrot.slane %v3235_v25, 4  ;;  %v3324_v55 = vrot.slane %v3322_v8, 7  ;;  %v3739_v4 = vshrl.u32 %v9085_v13, 16  ;;  %v3780_v14 = vunpack.c.l.b16 %v3728_v3 }
 0x31a   :  { %v3738_v27 = vsel %vm8141_vm4, %v3733_v30, %v3737_v42  ;;  %v3334_v43 = vshll.u32 %v3257_v60, 16  ;;  %v3333_v20 = vrot.slane %v3331_v41, 7  ;;  %v3745_v5 = vshll.u32 %v9088_v2, 16  ;;  %v3877_v62 = vld [vmem:[#allocation2 + $0x8] sm:$0xe] }
 0x31b   :  { %v3781_v31 = vunpack.c.l.b16 %v3738_v27  ;;  %v3327_v18 = vor.u32 %v3325_v6, %v3324_v55  ;;  %v3329_v58 = vrot.slane %v3324_v55, 4  ;;  %v3741_v17 = vrot.slane %v3739_v4, 4 }
 0x31c   :  { %v3239_v63 = vsel %vm7918_vm11, %v3237_v49, %v3238_v50  ;;  %v3749_v21 = vshrl.u32 %v9088_v2, 16  ;;  %3647 = vmatmul.bf16.gmra.mxu3 %v7343_v23  ;;  %v3336_v36 = vor.u32 %v3334_v43, %v3333_v20  ;;  %v3236_v11 = vsel %vm7918_vm11, %v3234_v45, %v3235_v25 }
 0x31d   :  { %v3786_v22 = vpack.c.b16 %v3781_v31, %v3780_v14  ;;  %v3742_v54 = vor.u32 %v3741_v17, %v3737_v42  ;;  %v3747_v10 = vrot.slane %v3745_v5, 5  ;;  %v3455_v61 = vunpack.c.l.b16 %v3239_v63 }
 0x31e   :  { %v3751_v53 = vrot.slane %v3749_v21, 4  ;;  %v3328_v12 = vsel %vm7946_vm12, %v3320_v52, %v3327_v18  ;;  %v3337_v35 = vsel %vm7946_vm12, %v3329_v58, %v3336_v36  ;;  %v3454_v28 = vunpack.c.l.b16 %v3236_v11  ;;  %v3878_v58 = vld [vmem:[#allocation2 + $0x28] sm:$0xe] }
 0x31f   :  { %v3757_v59 = vrot.slane %v3755_v32, 5  ;;  %v3361_v0 = vunpack.c.l.b16 %v3328_v12  ;;  %v3362_v37 = vunpack.c.l.b16 %v3337_v35  ;;  %v3743_v38 = vrot.slane %v3742_v54, 4 }
 0x320   :  { %3858 = vmatmul.bf16.gmra.mxu0 %v3786_v22  ;;  %v3752_v51 = vor.u32 %v3751_v53, %v3747_v10  ;;  %v3459_v16 = vpack.c.b16 %v3455_v61, %v3454_v28  ;;  %v3891_v25 = vrot.slane %v8979_v57, 5  ;;  %v3894_v23 = vrot.slane %v9003_v48, 5 }
 0x321   :  { %v3366_v19 = vpack.c.b16 %v3362_v37, %v3361_v0  ;;  %v3748_v7 = vsel %vm8141_vm4, %v3743_v38, %v3747_v10  ;;  %v6837_v8 = vrot.slane %v3877_v62, 9  ;;  %v3897_v27 = vrot.slane %v9014_v47, 5  ;;  %v7394_v38 = vld [vmem:[%s9606_s9 + $0x70] sm:$0xff] }
 0x322   :  { %v3753_v40 = vrot.slane %v3752_v51, 4  ;;  %v3782_v1 = vunpack.c.l.b16 %v3748_v7  ;;  %v3893_v3 = vrot.slane %v3891_v25, 4  ;;  %v3896_v57 = vrot.slane %v3894_v23, 4  ;;  %v7387_v51 = vld [vmem:[%s9606_s9 + $0x38] sm:$0xff]  ;;  %v7402_v62 = vld [vmem:[%s9606_s9 + $0xb0] sm:$0xff] }
 0x323   :  { %v3892_v42 = vsel %vm8126_vm3, %v6837_v8, %v3891_v25  ;;  %v3899_v50 = vrot.slane %v3897_v27, 4  ;;  %v3900_v48 = vrot.slane %v9036_v24, 5  ;;  %v3904_v43 = vrot.slane %v9065_v9, 5  ;;  %4365 = vmatpush.bf16.msrb.mxu3 %v7387_v51  ;;  %v7385_v25 = vld [vmem:[%s9606_s9 + $0x28] sm:$0xff]  ;;  %v9258_v51 = vld [vmem:[%s9605_s8] ss:$0 sm:$0xff] }
 0x324   :  { %v3758_v34 = vsel %vm8141_vm4, %v3753_v40, %v3757_v59  ;;  %v3895_v30 = vsel %vm8126_vm3, %v3893_v3, %v3894_v23  ;;  %v3932_v55 = vunpack.c.l.b16 %v3892_v42  ;;  %v3898_v41 = vsel %vm8126_vm3, %v3896_v57, %v3897_v27  ;;  %v7386_v40 = vld [vmem:[%s9606_s9 + $0x30] sm:$0xff]  ;;  %v7384_v42 = vld [vmem:[%s9606_s9 + $0x20] sm:$0xff] }
 0x325   :  { %v3783_v56 = vunpack.c.l.b16 %v3758_v34  ;;  %v3933_v49 = vunpack.c.l.b16 %v3895_v30  ;;  %v3901_v4 = vsel %vm8126_vm3, %v3899_v50, %v3900_v48  ;;  %v3934_v14 = vunpack.c.l.b16 %v3898_v41  ;;  %v7392_v30 = vld [vmem:[%s9606_s9 + $0x60] sm:$0xff]  ;;  %v7391_v48 = vld [vmem:[%s9606_s9 + $0x58] sm:$0xff] }
 0x326   :  { %3535 = vmatmul.bf16.gmra.mxu2 %v3459_v16  ;;  %v3935_v31 = vunpack.c.l.b16 %v3901_v4  ;;  %v3907_v47 = vrot.slane %v9085_v13, 5  ;;  %v6838_v20 = vrot.slane %v3878_v58, 9  ;;  %v3906_v17 = vrot.slane %v3904_v43, 4  ;;  %v7403_v16 = vld [vmem:[%s9606_s9 + $0xb8] sm:$0xff]  ;;  %v7400_v4 = vld [vmem:[%s9606_s9 + $0xa0] sm:$0xff] }
 0x327   :  { %v3787_v60 = vpack.c.b16 %v3783_v56, %v3782_v1  ;;  %v3940_v6 = vpack.c.b16 %v3933_v49, %v3932_v55  ;;  %v3910_v21 = vrot.slane %v9088_v2, 5  ;;  %v3913_v9 = vrot.slane %v9102_v44, 5  ;;  %v7395_v44 = vld [vmem:[%s9606_s9 + $0x78] sm:$0xff]  ;;  %4366 = vmatpush.bf16.msrb.mxu3 %v7386_v40  ;;  %4573 = vmatpush.bf16.msrb.mxu0 %v7403_v16  ;;  %v7393_v56 = vld [vmem:[%s9606_s9 + $0x68] sm:$0xff] }
 0x328   :  { %v3941_v18 = vpack.c.b16 %v3935_v31, %v3934_v14  ;;  %v3908_v24 = vsel %vm8126_vm3, %v3906_v17, %v3907_v47  ;;  %v3905_v5 = vsel %vm8126_vm3, %v6838_v20, %v3904_v43  ;;  %v3909_v52 = vrot.slane %v3907_v47, 4  ;;  %4272 = vmatpush.bf16.msrb.mxu2 %v7395_v44  ;;  %v7401_v49 = vld [vmem:[%s9606_s9 + $0xa8] sm:$0xff]  ;;  %v7383_v41 = vld [vmem:[%s9606_s9 + $0x18] sm:$0xff]  ;;  %v7390_v17 = vld [vmem:[%s9606_s9 + $0x50] sm:$0xff] }
 0x329   :  { %3442 = vmatmul.bf16.gmra.mxu1 %v3366_v19  ;;  %v3937_v22 = vunpack.c.l.b16 %v3908_v24  ;;  %v3936_v45 = vunpack.c.l.b16 %v3905_v5  ;;  %v3912_v36 = vrot.slane %v3910_v21, 4  ;;  %v7382_v24 = vld [vmem:[%s9606_s9 + $0x10] sm:$0xff]  ;;  %v7399_v5 = vld [vmem:[%s9606_s9 + $0x98] sm:$0xff] }
 0x32a   :  { %v3911_v13 = vsel %vm8126_vm3, %v3909_v52, %v3910_v21  ;;  %v7389_v52 = vld [vmem:[%s9606_s9 + $0x48] sm:$0xff] }
 0x32b   :  { %v3942_v63 = vpack.c.b16 %v3937_v22, %v3936_v45  ;;  %v3914_v32 = vsel %vm8126_vm3, %v3912_v36, %v3913_v9  ;;  %v3938_v11 = vunpack.c.l.b16 %v3911_v13  ;;  %4367 = vmatpush.bf16.msrb.mxu3 %v7385_v25  ;;  %4574 = vmatpush.bf16.msrb.mxu0 %v7402_v62  ;;  %v7381_v36 = vld [vmem:[%s9606_s9 + $0x8] sm:$0xff]  ;;  %v7398_v9 = vld [vmem:[%s9606_s9 + $0x90] sm:$0xff] }
 0x32c   :  { %v3939_v54 = vunpack.c.l.b16 %v3914_v32  ;;  %4273 = vmatpush.bf16.msrb.mxu2 %v7394_v38  ;;  %v7388_v32 = vld [vmem:[%s9606_s9 + $0x40] sm:$0xff] }
 0x32e   :  { %v3943_v10 = vpack.c.b16 %v3939_v54, %v3938_v11  ;;  %v7380_v11 = vld [vmem:[%s9606_s9] sm:$0xff]  ;;  %v7397_v54 = vld [vmem:[%s9606_s9 + $0x88] sm:$0xff] }
 0x32f   :  { %4368 = vmatpush.bf16.msrb.mxu3 %v7384_v42  ;;  %4575 = vmatpush.bf16.msrb.mxu0 %v7401_v49 }
 0x330   :  { %3863 = vmatmul.bf16.gmra.mxu0 %v3787_v60  ;;  %4274 = vmatpush.bf16.msrb.mxu2 %v7393_v56 }
 0x333   :  { %4369 = vmatpush.bf16.msrb.mxu3 %v7383_v41  ;;  %4576 = vmatpush.bf16.msrb.mxu0 %v7400_v4 }
 0x334   :  { %4275 = vmatpush.bf16.msrb.mxu2 %v7392_v30 }
 0x337   :  { %4370 = vmatpush.bf16.msrb.mxu3 %v7382_v24  ;;  %4577 = vmatpush.bf16.msrb.mxu0 %v7399_v5 }
 0x338   :  { %4276 = vmatpush.bf16.msrb.mxu2 %v7391_v48 }
 0x339   :  { %4004 = vmatmul.bf16.vlgmr.msra.gmra.mxu1 %v3940_v6 }
 0x33b   :  { %4371 = vmatpush.bf16.msrb.mxu3 %v7381_v36  ;;  %4578 = vmatpush.bf16.msrb.mxu0 %v7398_v9 }
 0x33c   :  { %4277 = vmatpush.bf16.msrb.mxu2 %v7390_v17 }
 0x33f   :  { %4372 = vmatpush.bf16.msrb.mxu3 %v7380_v11  ;;  %4579 = vmatpush.bf16.msrb.mxu0 %v7397_v54 }
 0x340   :  { %4278 = vmatpush.bf16.msrb.mxu2 %v7389_v52 }
 0x344   :  { %4279 = vmatpush.bf16.msrb.mxu2 %v7388_v32 }
 0x349   :  { %4009 = vmatmul.bf16.gmra.mxu1 %v3941_v18 }
 0x359   :  { %4014 = vmatmul.bf16.gmra.mxu1 %v3942_v63 }
 0x369   :  { %4019 = vmatmul.bf16.gmra.mxu1 %v3943_v10 }
 0x36f   :  { %v3633_v53 = vpop.f32.mrf.mxu3 }
 0x376   :  { %v3428_v61 = vpop.f32.mrf.mxu1 }
 0x377   :  { %v9141_v35 = vpop.f32.mrf.mxu3 }
 0x379   :  { %v3521_v12 = vpop.f32.mrf.mxu2 }
 0x37a   :  { %v3522_v2 = vadd.f32 %v3521_v12, %v3428_v61 }
 0x37c   :  { %v9149_v15 = vadd.f32 %v3633_v53, %v3522_v2 }
 0x37d   :  { %v9151_v28 = vpop.f32.mrf.mxu0 }
 0x37e   :  { %v9153_v59 = vpop.f32.mrf.mxu1  ;;  %v3869_v12 = vadd.f32 %v9151_v28, %v9149_v15 }
 0x37f   :  { %v9157_v37 = vpop.f32.mrf.mxu3 }
 0x381   :  { %v9155_v0 = vpop.f32.mrf.mxu2 }
 0x382   :  { %v3524_v10 = vadd.f32 %v9155_v0, %v9153_v59  ;;  %v7396_v59 = vld [vmem:[%s9606_s9 + $0x80] sm:$0xff] }
 0x383   :  { %4580 = vmatpush.bf16.msrb.mxu0 %v7396_v59 }
 0x384   :  { %v3654_v2 = vadd.f32 %v9141_v35, %v3524_v10 }
 0x385   :  { %v9168_v19 = vpop.f32.mrf.mxu0 }
 0x386   :  { %v9170_v7 = vpop.f32.mrf.mxu1  ;;  %v3870_v0 = vadd.f32 %v9168_v19, %v3654_v2 }
 0x387   :  { %v3640_v1 = vpop.f32.mrf.mxu3 }
 0x389   :  { %v9172_v34 = vpop.f32.mrf.mxu2 }
 0x38a   :  { %v3527_v38 = vadd.f32 %v9172_v34, %v9170_v7 }
 0x38c   :  { %v3655_v28 = vadd.f32 %v9157_v37, %v3527_v38 }
 0x38d   :  { %v9183_v23 = vpop.f32.mrf.mxu0 }
 0x38e   :  { %v3435_v60 = vpop.f32.mrf.mxu1  ;;  %v3871_v25 = vadd.f32 %v9183_v23, %v3655_v28 }
 0x38f   :  { %v3643_v3 = vpop.f32.mrf.mxu3 }
 0x391   :  { %v3528_v8 = vpop.f32.mrf.mxu2 }
 0x392   :  { %v4077_v8 = vld [vmem:[#allocation3 + $0x4] sm:$0x8] }
 0x395   :  { %v3856_v55 = vpop.f32.mrf.mxu0 }
 0x396   :  { %v3438_v6 = vpop.f32.mrf.mxu1 }
 0x397   :  { %v9194_v57 = vpop.f32.mrf.mxu3 }
 0x399   :  { %v3531_v27 = vpop.f32.mrf.mxu2 }
 0x39a   :  { %v3532_v50 = vadd.f32 %v3531_v27, %v3438_v6 }
 0x39c   :  { %v9205_v14 = vadd.f32 %v3643_v3, %v3532_v50  ;;  %v4088_v3 = vshrl.u32 %v4077_v8, 16 }
 0x39d   :  { %v9207_v31 = vpop.f32.mrf.mxu0 }
 0x39e   :  { %v9209_v18 = vpop.f32.mrf.mxu1  ;;  %v6887_v27 = vrot.slane %v4088_v3, 11 }
 0x39f   :  { %v9213_v58 = vpop.f32.mrf.mxu3 }
 0x3a1   :  { %v9211_v43 = vpop.f32.mrf.mxu2 }
 0x3a2   :  { %v3534_v4 = vadd.f32 %v9211_v43, %v9209_v18 }
 0x3a4   :  { %v3658_v18 = vadd.f32 %v9194_v57, %v3534_v4 }
 0x3a5   :  { %v9215_v47 = vpop.f32.mrf.mxu0 }
 0x3a6   :  { %v9217_v20 = vpop.f32.mrf.mxu1  ;;  %v3874_v57 = vadd.f32 %v9215_v47, %v3658_v18 }
 0x3a7   :  { %v3650_v45 = vpop.f32.mrf.mxu3 }
 0x3a9   :  { %v9228_v22 = vpop.f32.mrf.mxu2 }
 0x3ad   :  { %v9230_v63 = vpop.f32.mrf.mxu0 }
 0x3ae   :  { %v3445_v21 = vpop.f32.mrf.mxu1 }
 0x3b1   :  { %v3538_v13 = vpop.f32.mrf.mxu2 }
 0x3b5   :  { %v3866_v53 = vpop.f32.mrf.mxu0 }
 0x3b6   :  { %v4005_v61 = vpop.f32.mrf.mxu1 }
 0x3b7   :  { %v4025_v44 = vadd.f32 %v4005_v61, %v3869_v12 }
 0x3b9   :  { %v4037_v15 = vadd.f32 %v9258_v51, %v4025_v44 }
 0x3bb   :  { %v4045_v1 = vmax.f32 %v4037_v15, 0.0  ;;  %v3873_v15 = vadd.f32 %v9207_v31, %v9205_v14 }
 0x3be   :  { %v4007_v40 = vpop.f32.mrf.mxu1 }
 0x3bf   :  { %v4026_v35 = vadd.f32 %v4007_v40, %v3870_v0 }
 0x3c1   :  { %v4038_v16 = vadd.f32 %v9258_v51, %v4026_v35 }
 0x3c3   :  { %v4046_v56 = vmax.f32 %v4038_v16, 0.0 }
 0x3c5   :  { %v7475_v62 = vpack.c.bf16 %v4046_v56, %v4045_v1 }
 0x3c6   :  { %v4010_v60 = vpop.f32.mrf.mxu1 }
 0x3c7   :  { %7512 = vst [vmem:[#allocation3 + $0x8] sm:$0xff] %v7475_v62   ;;  %v4027_v19 = vadd.f32 %v4010_v60, %v3871_v25 }
 0x3c9   :  { %v4039_v7 = vadd.f32 %v9258_v51, %v4027_v19  ;;  %v3537_v19 = vadd.f32 %v9228_v22, %v9217_v20 }
 0x3cb   :  { %v4047_v34 = vmax.f32 %v4039_v7, 0.0 }
 0x3cd   :  { %v4055_v30 = vsel %vm2397_vm9, %v4047_v34, 0.0 }
 0x3ce   :  { %v7480_v37 = vpack.c.bf16 %v8965_v46, %v4055_v30  ;;  %v4012_v42 = vpop.f32.mrf.mxu1  ;;  %v7376_v49 = vld [vmem:[#allocation3 + $0x8] sm:$0xff] }
 0x3cf   :  { %v4078_v55 = vld [vmem:[#allocation3 + $0x8] sm:$0xf]  ;;  %v4079_v6 = vld [vmem:[#allocation3 + $0xc] sm:$0xf]  ;;  %4280 = vmatmul.bf16.vlgmr.msrb.gmra.mxu2 %v7376_v49  ;;  %v4398_v42 = vld [vmem:[#allocation3 + $0x18] sm:$0x1] }
 0x3d0   :  { %v4093_v23 = vshrl.u32 %v4078_v55, 16  ;;  %v4096_v50 = vshll.u32 %v4078_v55, 16  ;;  %v4102_v48 = vshrl.u32 %v4079_v6, 16  ;;  %v4394_v41 = vld [vmem:[#allocation3 + $0x8] sm:$0xf]  ;;  %7513 = vst [vmem:[#allocation3 + $0x10] sm:$0xff] %v7480_v37  }
 0x3d1   :  { %v4105_v17 = vshll.u32 %v4079_v6, 16  ;;  %v4395_v24 = vld [vmem:[#allocation3 + $0xc] sm:$0xf]  ;;  %v4405_v5 = vshrl.u32 %v4394_v41, 16  ;;  %v4408_v45 = vshll.u32 %v4394_v41, 16 }
 0x3d2   :  { %v4095_v21 = vrot.slane %v4093_v23, 7  ;;  %v9276_v52 = vrot.slane %v4102_v48, 7  ;;  %v4414_v36 = vshll.u32 %v4395_v24, 16  ;;  %v4418_v9 = vshrl.u32 %v4395_v24, 16 }
 0x3d3   :  { %v4407_v13 = vrot.slane %v4405_v5, 4  ;;  %v4410_v32 = vrot.slane %v4408_v45, 5  ;;  %v4444_v5 = vshll.u32 %v4398_v42, 16 }
 0x3d4   :  { %v4098_v11 = vor.u32 %v4096_v50, %v4095_v21  ;;  %v4100_v54 = vrot.slane %v4095_v21, 4  ;;  %v4107_v10 = vor.u32 %v4105_v17, %v9276_v52  ;;  %v4416_v53 = vrot.slane %v4414_v36, 5 }
 0x3d5   :  { %v4411_v43 = vor.u32 %v4410_v32, %v4407_v13  ;;  %v4420_v61 = vrot.slane %v4418_v9, 4  ;;  %v4109_v9 = vrot.slane %v9276_v52, 4 }
 0x3d6   :  { %v4099_v12 = vsel %vm7946_vm12, %v6887_v27, %v4098_v11  ;;  %v4108_v2 = vsel %vm7946_vm12, %v4100_v54, %v4107_v10  ;;  %v4015_v44 = vpop.f32.mrf.mxu1  ;;  %v3659_v11 = vadd.f32 %v9213_v58, %v3537_v19 }
 0x3d7   :  { %v4301_v59 = vunpack.c.l.b16 %v4099_v12  ;;  %v4302_v0 = vunpack.c.l.b16 %v4108_v2  ;;  %v4412_v38 = vrot.slane %v4411_v43, 4  ;;  %v4421_v40 = vor.u32 %v4420_v61, %v4416_v53  ;;  %v4396_v35 = vld [vmem:[#allocation3 + $0x10] sm:$0xf]  ;;  %v4081_v62 = vld [vmem:[#allocation3 + $0x14] sm:$0xf] }
 0x3d8   :  { %v4080_v28 = vld [vmem:[#allocation3 + $0x10] sm:$0xf]  ;;  %v4424_v25 = vshll.u32 %v4396_v35, 16  ;;  %v4397_v60 = vld [vmem:[#allocation3 + $0x14] sm:$0xf]  ;;  %v4029_v8 = vadd.f32 %v4015_v44, %v3873_v15  ;;  %v4120_v47 = vshrl.u32 %v4081_v62, 16 }
 0x3d9   :  { %v4309_v16 = vpack.c.b16 %v4302_v0, %v4301_v59  ;;  %v7377_v1 = vld [vmem:[#allocation3 + $0x10] sm:$0xff]  ;;  %v4417_v56 = vsel %vm8141_vm4, %v4412_v38, %v4416_v53  ;;  %v4422_v7 = vrot.slane %v4421_v40, 4  ;;  %v4111_v34 = vshrl.u32 %v4080_v28, 16  ;;  %v4082_v40 = vld [vmem:[#allocation3 + $0x24] sm:$0x8] }
 0x3da   :  { %5154 = vst.msk [vmem:[#allocation3 + $0x14] sm:$0xf] %vm1196_vm8, %v7739_v29  ;;  %v4426_v14 = vrot.slane %v4424_v25, 5  ;;  %v4509_v31 = vunpack.c.l.b16 %v4417_v56  ;;  %v4428_v3 = vshrl.u32 %v4396_v35, 16  ;;  %v4114_v37 = vshll.u32 %v4080_v28, 16 }
 0x3db   :  { %4373 = vmatmul.bf16.vlgmr.msrb.gmra.mxu3 %v4309_v16  ;;  %v4113_v30 = vrot.slane %v4111_v34, 7  ;;  %v4434_v49 = vshll.u32 %v4397_v60, 16  ;;  %v4438_v55 = vshrl.u32 %v4397_v60, 16  ;;  %v4122_v20 = vrot.slane %v4120_v47, 7 }
 0x3dc   :  { %v4427_v6 = vsel %vm8141_vm4, %v4422_v7, %v4426_v14  ;;  %v4123_v22 = vshll.u32 %v4081_v62, 16  ;;  %v4430_v27 = vrot.slane %v4428_v3, 4  ;;  %v4041_v45 = vadd.f32 %v9258_v51, %v4029_v8 }
 0x3dd   :  { %v4510_v23 = vunpack.c.l.b16 %v4427_v6  ;;  %v4116_v50 = vor.u32 %v4114_v37, %v4113_v30  ;;  %v4118_v48 = vrot.slane %v4113_v30, 4  ;;  %v4436_v41 = vrot.slane %v4434_v49, 5 }
 0x3de   :  { %v4017_v4 = vpop.f32.mrf.mxu1  ;;  %v4125_v17 = vor.u32 %v4123_v22, %v4122_v20  ;;  %v4440_v24 = vrot.slane %v4438_v55, 4  ;;  %v4431_v13 = vor.u32 %v4430_v27, %v4426_v14  ;;  %v4049_v18 = vmax.f32 %v4041_v45, 0.0  ;;  %v7411_v22 = vld [vmem:[#allocation9 + $0x18] sm:$0xff] }
 0x3df   :  { %v4030_v21 = vadd.f32 %v4017_v4, %v3874_v57  ;;  %v4517_v36 = vpack.c.b16 %v4510_v23, %v4509_v31  ;;  %4285 = vmatmul.bf16.gmra.mxu2 %v7377_v1  ;;  %v4117_v10 = vsel %vm7946_vm12, %v4109_v9, %v4116_v50  ;;  %v4446_v61 = vrot.slane %v4444_v5, 5  ;;  %v7419_v27 = vld [vmem:[#allocation9 + $0x58] sm:$0xff] }
 0x3e0   :  { %v4441_v32 = vor.u32 %v4440_v24, %v4436_v41  ;;  %v4126_v53 = vsel %vm7946_vm12, %v4118_v48, %v4125_v17  ;;  %v4303_v12 = vunpack.c.l.b16 %v4117_v10  ;;  %v4432_v52 = vrot.slane %v4431_v13, 4  ;;  %v7415_v48 = vld [vmem:[#allocation9 + $0x38] sm:$0xff]  ;;  %4898 = vmatpush.bf16.msra.mxu2 %v7411_v22  ;;  %5082 = vmatpush.bf16.msra.mxu3 %v7419_v27 }
 0x3e1   :  { %v4042_v54 = vadd.f32 %v9258_v51, %v4030_v21  ;;  %4581 = vmatmul.bf16.vlgmr.msrb.gmra.mxu0 %v4517_v36  ;;  %v4304_v2 = vunpack.c.l.b16 %v4126_v53  ;;  %v3875_v59 = vadd.f32 %v9230_v63, %v3659_v11  ;;  %v4128_v16 = vshrl.u32 %v4082_v40, 16  ;;  %4821 = vmatpush.bf16.msrb.mxu1 %v7415_v48  ;;  %v7410_v48 = vld [vmem:[#allocation9 + $0x10] sm:$0xff] }
 0x3e2   :  { %v4442_v44 = vrot.slane %v4441_v32, 4  ;;  %v4437_v35 = vsel %vm8141_vm4, %v4432_v52, %v4436_v41 }
 0x3e3   :  { %v4050_v43 = vmax.f32 %v4042_v54, 0.0  ;;  %v4310_v15 = vpack.c.b16 %v4304_v2, %v4303_v12  ;;  %v4511_v56 = vunpack.c.l.b16 %v4437_v35  ;;  %v6888_v34 = vrot.slane %v4128_v16, 11 }
 0x3e4   :  { %v4447_v28 = vsel %vm8141_vm4, %v4442_v44, %v4446_v61  ;;  %4899 = vmatpush.bf16.msra.mxu2 %v7410_v48 }
 0x3e5   :  { %v7485_v0 = vpack.c.bf16 %v4050_v43, %v4049_v18  ;;  %v4512_v25 = vunpack.c.l.b16 %v4447_v28 }
 0x3e6   :  { %v4020_v58 = vpop.f32.mrf.mxu1 }
 0x3e7   :  { %7514 = vst [vmem:[#allocation3 + $0x28] sm:$0xff] %v7485_v0   ;;  %v4031_v38 = vadd.f32 %v4020_v58, %v3875_v59  ;;  %v4518_v14 = vpack.c.b16 %v4512_v25, %v4511_v56  ;;  %v4403_v56 = vld [vmem:[#allocation3 + $0x38] sm:$0x1] }
 0x3e9   :  { %v4043_v57 = vadd.f32 %v9258_v51, %v4031_v38 }
 0x3eb   :  { %4378 = vmatmul.bf16.gmra.mxu3 %v4310_v15  ;;  %v4051_v1 = vmax.f32 %v4043_v57, 0.0 }
 0x3ed   :  { %v4059_v63 = vsel %vm2397_vm9, %v4051_v1, 0.0 }
 0x3ee   :  { %v7490_v62 = vpack.c.bf16 %v8965_v46, %v4059_v63  ;;  %v4022_v60 = vpop.f32.mrf.mxu1  ;;  %v7378_v19 = vld [vmem:[#allocation3 + $0x28] sm:$0xff] }
 0x3ef   :  { %v4083_v8 = vld [vmem:[#allocation3 + $0x28] sm:$0xf]  ;;  %v4084_v7 = vld [vmem:[#allocation3 + $0x2c] sm:$0xf]  ;;  %4290 = vmatmul.bf16.gmra.mxu2 %v7378_v19 }
 0x3f0   :  { %v4133_v31 = vshrl.u32 %v4083_v8, 16  ;;  %v4136_v47 = vshll.u32 %v4083_v8, 16  ;;  %v4142_v3 = vshrl.u32 %v4084_v7, 16  ;;  %v4399_v51 = vld [vmem:[#allocation3 + $0x28] sm:$0xf]  ;;  %7515 = vst [vmem:[#allocation3 + $0x30] sm:$0xff] %v7490_v62  }
 0x3f1   :  { %v4145_v30 = vshll.u32 %v4084_v7, 16  ;;  %v4400_v37 = vld [vmem:[#allocation3 + $0x2c] sm:$0xf]  ;;  %v4449_v42 = vshrl.u32 %v4399_v51, 16  ;;  %v4452_v49 = vshll.u32 %v4399_v51, 16  ;;  %4586 = vmatmul.bf16.gmra.mxu0 %v4518_v14 }
 0x3f2   :  { %v4135_v55 = vrot.slane %v4133_v31, 7  ;;  %v9312_v6 = vrot.slane %v4142_v3, 7  ;;  %v4458_v46 = vshll.u32 %v4400_v37, 16  ;;  %v4462_v20 = vshrl.u32 %v4400_v37, 16 }
 0x3f3   :  { %v4451_v23 = vrot.slane %v4449_v42, 4  ;;  %v4454_v50 = vrot.slane %v4452_v49, 5  ;;  %v4488_v31 = vshll.u32 %v4403_v56, 16 }
 0x3f4   :  { %v4138_v41 = vor.u32 %v4136_v47, %v4135_v55  ;;  %v4140_v4 = vrot.slane %v4135_v55, 4  ;;  %v4147_v17 = vor.u32 %v4145_v30, %v9312_v6  ;;  %v4460_v24 = vrot.slane %v4458_v46, 5 }
 0x3f5   :  { %v4455_v5 = vor.u32 %v4454_v50, %v4451_v23  ;;  %v4464_v45 = vrot.slane %v4462_v20, 4  ;;  %v4149_v14 = vrot.slane %v9312_v6, 4  ;;  %v4490_v37 = vrot.slane %v4488_v31, 5 }
 0x3f6   :  { %v4139_v21 = vsel %vm7946_vm12, %v6888_v34, %v4138_v41  ;;  %v4148_v36 = vsel %vm7946_vm12, %v4140_v4, %v4147_v17  ;;  %v7418_v41 = vld [vmem:[#allocation9 + $0x50] sm:$0xff]  ;;  %v7409_v17 = vld [vmem:[#allocation9 + $0x8] sm:$0xff] }
 0x3f7   :  { %v4305_v9 = vunpack.c.l.b16 %v4139_v21  ;;  %v4306_v13 = vunpack.c.l.b16 %v4148_v36  ;;  %v4456_v32 = vrot.slane %v4455_v5, 4  ;;  %v4465_v11 = vor.u32 %v4464_v45, %v4460_v24  ;;  %v4401_v54 = vld [vmem:[#allocation3 + $0x30] sm:$0xf]  ;;  %v4086_v61 = vld [vmem:[#allocation3 + $0x34] sm:$0xf]  ;;  %5083 = vmatpush.bf16.msra.mxu3 %v7418_v41  ;;  %4900 = vmatpush.bf16.msra.mxu2 %v7409_v17  ;;  %v7413_v45 = vld [vmem:[#allocation9 + $0x28] sm:$0xff] }
 0x3f8   :  { %v4085_v10 = vld [vmem:[#allocation3 + $0x30] sm:$0xf]  ;;  %v4468_v43 = vshll.u32 %v4401_v54, 16  ;;  %v4402_v12 = vld [vmem:[#allocation3 + $0x34] sm:$0xf]  ;;  %v4160_v59 = vshrl.u32 %v4086_v61, 16 }
 0x3f9   :  { %v4311_v53 = vpack.c.b16 %v4306_v13, %v4305_v9  ;;  %v7379_v18 = vld [vmem:[#allocation3 + $0x30] sm:$0xff]  ;;  %v4461_v2 = vsel %vm8141_vm4, %v4456_v32, %v4460_v24  ;;  %v4466_v52 = vrot.slane %v4465_v11, 4  ;;  %v4151_v44 = vshrl.u32 %v4085_v10, 16  ;;  %v7417_v24 = vld [vmem:[#allocation9 + $0x48] sm:$0xff]  ;;  %v7408_v21 = vld [vmem:[#allocation9] sm:$0xff] }
 0x3fa   :  { %5158 = vst.msk [vmem:[#allocation3 + $0x34] sm:$0xf] %vm1196_vm8, %v7739_v29  ;;  %v4470_v0 = vrot.slane %v4468_v43, 5  ;;  %v4154_v58 = vshll.u32 %v4085_v10, 16  ;;  %v4472_v38 = vshrl.u32 %v4401_v54, 16  ;;  %v4478_v40 = vshll.u32 %v4402_v12, 16 }
 0x3fb   :  { %4383 = vmatmul.bf16.gmra.mxu3 %v4311_v53  ;;  %v4153_v15 = vrot.slane %v4151_v44, 7  ;;  %v4162_v35 = vrot.slane %v4160_v59, 7  ;;  %v4163_v28 = vshll.u32 %v4086_v61, 16  ;;  %v4482_v57 = vshrl.u32 %v4402_v12, 16  ;;  %v7414_v4 = vld [vmem:[#allocation9 + $0x30] sm:$0xff]  ;;  %v7416_v36 = vld [vmem:[#allocation9 + $0x40] sm:$0xff]  ;;  %4901 = vmatpush.bf16.msra.mxu2 %v7408_v21 }
 0x3fc   :  { %v4471_v16 = vsel %vm8141_vm4, %v4466_v52, %v4470_v0  ;;  %v4513_v1 = vunpack.c.l.b16 %v4461_v2  ;;  %v4474_v25 = vrot.slane %v4472_v38, 4  ;;  %v4480_v63 = vrot.slane %v4478_v40, 5  ;;  %4822 = vmatpush.bf16.msrb.mxu1 %v7414_v4  ;;  %5084 = vmatpush.bf16.msra.mxu3 %v7417_v24  ;;  %v7412_v13 = vld [vmem:[#allocation9 + $0x20] sm:$0xff]  ;;  %v4658_v41 = vld [vmem:[#allocation2 + $0x14] sm:$0xf] }
 0x3fd   :  { %v4514_v62 = vunpack.c.l.b16 %v4471_v16  ;;  %v4156_v60 = vor.u32 %v4154_v58, %v4153_v15  ;;  %v4158_v19 = vrot.slane %v4153_v15, 4  ;;  %v4165_v8 = vor.u32 %v4163_v28, %v4162_v35  ;;  %v9337_v10 = vld [vmem:[%s9607_s10] ss:$0 sm:$0xff] }
 0x3fe   :  { %v4484_v7 = vrot.slane %v4482_v57, 4  ;;  %v4475_v47 = vor.u32 %v4474_v25, %v4470_v0  ;;  %v4654_v57 = vld [vmem:[#allocation2 + $0x4] sm:$0x8] }
 0x3ff   :  { %v4519_v34 = vpack.c.b16 %v4514_v62, %v4513_v1  ;;  %4295 = vmatmul.bf16.gmra.mxu2 %v7379_v18  ;;  %v4157_v51 = vsel %vm7946_vm12, %v4149_v14, %v4156_v60  ;;  %v4166_v30 = vsel %vm7946_vm12, %v4158_v19, %v4165_v8  ;;  %v4665_v8 = vshrl.u32 %v4654_v57, 16 }
 0x400   :  { %v4485_v3 = vor.u32 %v4484_v7, %v4480_v63  ;;  %v4307_v42 = vunpack.c.l.b16 %v4157_v51  ;;  %v4308_v49 = vunpack.c.l.b16 %v4166_v30  ;;  %v4476_v55 = vrot.slane %v4475_v47, 4  ;;  %4823 = vmatpush.bf16.msrb.mxu1 %v7413_v45  ;;  %5085 = vmatpush.bf16.msra.mxu3 %v7416_v36  ;;  %v4926_v36 = vld [vmem:[#allocation2 + $0x14] sm:$0xf] }
 0x401   :  { %4591 = vmatmul.bf16.gmra.mxu0 %v4519_v34 }
 0x402   :  { %v4486_v46 = vrot.slane %v4485_v3, 4  ;;  %v4312_v20 = vpack.c.b16 %v4308_v49, %v4307_v42  ;;  %v4481_v6 = vsel %vm8141_vm4, %v4476_v55, %v4480_v63  ;;  %v7033_v55 = vrot.slane %v4665_v8, 11 }
 0x403   :  { %v4515_v27 = vunpack.c.l.b16 %v4481_v6 }
 0x404   :  { %v4491_v22 = vsel %vm8141_vm4, %v4486_v46, %v4490_v37  ;;  %4824 = vmatpush.bf16.msrb.mxu1 %v7412_v13  ;;  %v4697_v13 = vshrl.u32 %v4658_v41, 16 }
 0x405   :  { %v4516_v23 = vunpack.c.l.b16 %v4491_v22 }
 0x407   :  { %v4520_v50 = vpack.c.b16 %v4516_v23, %v4515_v27 }
 0x40b   :  { %4388 = vmatmul.bf16.gmra.mxu3 %v4312_v20 }
 0x411   :  { %4596 = vmatmul.bf16.gmra.mxu0 %v4520_v50 }
 0x452   :  { %v4281_v5 = vpop.f32.mrf.mxu2 }
 0x45a   :  { %v4283_v9 = vpop.f32.mrf.mxu2 }
 0x45e   :  { %v4374_v32 = vpop.f32.mrf.mxu3  ;;  %v4582_v54 = vpop.f32.mrf.mxu0 }
 0x45f   :  { %v4375_v11 = vadd.f32 %v4374_v32, %v4281_v5 }
 0x461   :  { %v4602_v53 = vadd.f32 %v4582_v54, %v4375_v11 }
 0x462   :  { %v4286_v43 = vpop.f32.mrf.mxu2 }
 0x463   :  { %v4614_v18 = vadd.f32 %v9337_v10, %v4602_v53 }
 0x465   :  { %v4622_v61 = vmax.f32 %v4614_v18, 0.0 }
 0x466   :  { %v4376_v12 = vpop.f32.mrf.mxu3  ;;  %v4584_v44 = vpop.f32.mrf.mxu0 }
 0x467   :  { %v4638_v2 = vpack.c.bf16 %v4622_v61, %v4622_v61  ;;  %v4377_v52 = vadd.f32 %v4376_v12, %v4283_v9  ;;  %v4700_v12 = vshll.u32 %v4658_v41, 16 }
 0x469   :  { %4646 = vst.msk [vmem:[#allocation2 + $0x8] sm:$0xf] %vm1196_vm8, %v4638_v2  ;;  %v4603_v59 = vadd.f32 %v4584_v44, %v4377_v52  ;;  %v4963_v2 = vshll.u32 %v4926_v36, 16 }
 0x46a   :  { %v4288_v58 = vpop.f32.mrf.mxu2 }
 0x46b   :  { %v4615_v0 = vadd.f32 %v9337_v10, %v4603_v59  ;;  %v4967_v58 = vshrl.u32 %v4926_v36, 16 }
 0x46d   :  { %v4623_v38 = vmax.f32 %v4615_v0, 0.0 }
 0x46e   :  { %v4379_v40 = vpop.f32.mrf.mxu3  ;;  %v4587_v28 = vpop.f32.mrf.mxu0 }
 0x46f   :  { %v4639_v15 = vpack.c.bf16 %v4623_v38, %v4623_v38  ;;  %v4380_v35 = vadd.f32 %v4379_v40, %v4286_v43 }
 0x470   :  { %v4655_v16 = vld [vmem:[#allocation2 + $0x8] sm:$0xf] }
 0x471   :  { %4647 = vst.msk [vmem:[#allocation2 + $0xc] sm:$0xf] %vm1196_vm8, %v4639_v15  ;;  %v4604_v1 = vadd.f32 %v4587_v28, %v4380_v35  ;;  %v4670_v56 = vshrl.u32 %v4655_v16, 16  ;;  %v4923_v25 = vld [vmem:[#allocation2 + $0x8] sm:$0xf]  ;;  %v4673_v31 = vshll.u32 %v4655_v16, 16 }
 0x472   :  { %v4934_v62 = vshrl.u32 %v4923_v25, 16  ;;  %v4937_v60 = vshll.u32 %v4923_v25, 16  ;;  %v4291_v19 = vpop.f32.mrf.mxu2  ;;  %v4699_v35 = vrot.slane %v4697_v13, 7 }
 0x473   :  { %v4616_v63 = vadd.f32 %v9337_v10, %v4604_v1  ;;  %v4672_v7 = vrot.slane %v4670_v56, 7 }
 0x474   :  { %v4936_v51 = vrot.slane %v4934_v62, 4  ;;  %v4939_v30 = vrot.slane %v4937_v60, 5 }
 0x475   :  { %v4624_v34 = vmax.f32 %v4616_v63, 0.0  ;;  %v4675_v46 = vor.u32 %v4673_v31, %v4672_v7  ;;  %v4677_v45 = vrot.slane %v4672_v7, 4  ;;  %v4965_v7 = vrot.slane %v4963_v2, 5 }
 0x476   :  { %v4381_v14 = vpop.f32.mrf.mxu3  ;;  %v4589_v3 = vpop.f32.mrf.mxu0  ;;  %v4940_v48 = vor.u32 %v4939_v30, %v4936_v51  ;;  %v4702_v51 = vor.u32 %v4700_v12, %v4699_v35 }
 0x477   :  { %v4632_v47 = vsel %vm2397_vm9, %v4624_v34, 0.0  ;;  %v4676_v17 = vsel %vm7946_vm12, %v7033_v55, %v4675_v46  ;;  %v4969_v34 = vrot.slane %v4967_v58, 4 }
 0x478   :  { %v4640_v37 = vpack.c.bf16 %v4632_v47, %v4632_v47  ;;  %v7404_v42 = vld [vmem:[#allocation2 + $0x8] sm:$0xff]  ;;  %v4846_v53 = vunpack.c.l.b16 %v4676_v17  ;;  %v4941_v18 = vrot.slane %v4940_v48, 4 }
 0x479   :  { %v4656_v49 = vld [vmem:[#allocation2 + $0xc] sm:$0xf]  ;;  %7067 = vmatmul.msk.bf16.vlgmr.msrb.gmra.mxu1 %vm1402_vm14, %v7404_v42 }
 0x47a   :  { %v4924_v20 = vld [vmem:[#allocation2 + $0xc] sm:$0xf]  ;;  %v4679_v6 = vshrl.u32 %v4656_v49, 16  ;;  %4648 = vst.msk [vmem:[#allocation2 + $0x10] sm:$0xf] %vm1196_vm8, %v4640_v37  ;;  %v4682_v50 = vshll.u32 %v4656_v49, 16  ;;  %v4293_v4 = vpop.f32.mrf.mxu2 }
 0x47b   :  { %v4943_v22 = vshll.u32 %v4924_v20, 16  ;;  %v4947_v27 = vshrl.u32 %v4924_v20, 16 }
 0x47c   :  { %v9348_v23 = vrot.slane %v4679_v6, 7 }
 0x47d   :  { %v4945_v24 = vrot.slane %v4943_v22, 5  ;;  %v4949_v5 = vrot.slane %v4947_v27, 4 }
 0x47e   :  { %v4684_v21 = vor.u32 %v4682_v50, %v9348_v23  ;;  %v4384_v9 = vpop.f32.mrf.mxu3  ;;  %v4592_v11 = vpop.f32.mrf.mxu0  ;;  %v4686_v46 = vrot.slane %v9348_v23, 4  ;;  %v4970_v50 = vor.u32 %v4969_v34, %v4965_v7 }
 0x47f   :  { %v4385_v32 = vadd.f32 %v4384_v9, %v4291_v19  ;;  %v4950_v61 = vor.u32 %v4949_v5, %v4945_v24  ;;  %v4946_v57 = vsel %vm8141_vm4, %v4941_v18, %v4945_v24  ;;  %v4927_v19 = vld [vmem:[#allocation2 + $0x18] sm:$0x1] }
 0x480   :  { %v4685_v54 = vsel %vm7946_vm12, %v4677_v45, %v4684_v21  ;;  %v5030_v47 = vunpack.c.l.b16 %v4946_v57  ;;  %v4973_v20 = vshll.u32 %v4927_v19, 16  ;;  %v4971_v5 = vrot.slane %v4970_v50, 4 }
 0x481   :  { %v4847_v43 = vunpack.c.l.b16 %v4685_v54  ;;  %v4606_v52 = vadd.f32 %v4592_v11, %v4385_v32  ;;  %v7405_v44 = vld [vmem:[#allocation2 + $0x10] sm:$0xff]  ;;  %v4951_v56 = vrot.slane %v4950_v61, 4  ;;  %v4659_v61 = vld [vmem:[#allocation2 + $0x24] sm:$0x8] }
 0x482   :  { %v4925_v59 = vld [vmem:[#allocation2 + $0x10] sm:$0xf]  ;;  %5659 = vst.msk [vmem:[#allocation2 + $0x14] sm:$0xf] %vm1196_vm8, %v7739_v29  ;;  %v4296_v1 = vpop.f32.mrf.mxu2  ;;  %v4975_v45 = vrot.slane %v4973_v20, 5  ;;  %v4705_v58 = vshrl.u32 %v4659_v61, 16 }
 0x483   :  { %v4657_v0 = vld [vmem:[#allocation2 + $0x10] sm:$0xf]  ;;  %v4854_v38 = vpack.c.b16 %v4847_v43, %v4846_v53  ;;  %v4953_v40 = vshll.u32 %v4925_v59, 16  ;;  %v4618_v28 = vadd.f32 %v9337_v10, %v4606_v52  ;;  %v4957_v16 = vshrl.u32 %v4925_v59, 16  ;;  %v4931_v20 = vld [vmem:[#allocation2 + $0x34] sm:$0xf] }
 0x484   :  { %v4688_v15 = vshrl.u32 %v4657_v0, 16  ;;  %v4691_v62 = vshll.u32 %v4657_v0, 16  ;;  %v4976_v43 = vsel %vm8141_vm4, %v4971_v5, %v4975_v45  ;;  %v5011_v45 = vshrl.u32 %v4931_v20, 16 }
 0x485   :  { %7087 = vmatmul.msk.bf16.vlgmr.msra.gmra.mxu2 %vm1402_vm14, %v4854_v38  ;;  %v4955_v25 = vrot.slane %v4953_v40, 5  ;;  %v4626_v60 = vmax.f32 %v4618_v28, 0.0  ;;  %v4959_v8 = vrot.slane %v4957_v16, 4  ;;  %v5033_v0 = vunpack.c.l.b16 %v4976_v43 }
 0x486   :  { %v4690_v63 = vrot.slane %v4688_v15, 7  ;;  %v4386_v14 = vpop.f32.mrf.mxu3  ;;  %v4594_v42 = vpop.f32.mrf.mxu0 }
 0x487   :  { %v4956_v31 = vsel %vm8141_vm4, %v4951_v56, %v4955_v25  ;;  %v4642_v30 = vpack.c.bf16 %v4626_v60, %v4626_v60  ;;  %v4387_v37 = vadd.f32 %v4386_v14, %v4293_v4  ;;  %v4960_v27 = vor.u32 %v4959_v8, %v4955_v25  ;;  %v4663_v56 = vld [vmem:[#allocation2 + $0x34] sm:$0xf] }
 0x488   :  { %v4693_v3 = vor.u32 %v4691_v62, %v4690_v63  ;;  %v5031_v49 = vunpack.c.l.b16 %v4956_v31  ;;  %v4695_v55 = vrot.slane %v4690_v63, 4  ;;  %v7034_v60 = vrot.slane %v4705_v58, 11 }
 0x489   :  { %4650 = vst.msk [vmem:[#allocation2 + $0x28] sm:$0xf] %vm1196_vm8, %v4642_v30  ;;  %v4607_v6 = vadd.f32 %v4594_v42, %v4387_v37  ;;  %7068 = vmatmul.msk.bf16.gmra.mxu1 %vm1402_vm14, %v7405_v44  ;;  %v4961_v24 = vrot.slane %v4960_v27, 4  ;;  %v4737_v30 = vshrl.u32 %v4663_v56, 16  ;;  %v4740_v50 = vshll.u32 %v4663_v56, 16 }
 0x48a   :  { %v5038_v22 = vpack.c.b16 %v5031_v49, %v5030_v47  ;;  %v4694_v41 = vsel %vm7946_vm12, %v4686_v46, %v4693_v3  ;;  %v4703_v4 = vsel %vm7946_vm12, %v4695_v55, %v4702_v51  ;;  %v4298_v23 = vpop.f32.mrf.mxu2 }
 0x48b   :  { %v4619_v48 = vadd.f32 %v9337_v10, %v4607_v6  ;;  %v4848_v36 = vunpack.c.l.b16 %v4694_v41  ;;  %v4849_v9 = vunpack.c.l.b16 %v4703_v4  ;;  %v4966_v18 = vsel %vm8141_vm4, %v4961_v24, %v4965_v7 }
 0x48c   :  { %7107 = vmatmul.msk.bf16.vlgmr.msra.gmra.mxu3 %vm1402_vm14, %v5038_v22  ;;  %v5032_v59 = vunpack.c.l.b16 %v4966_v18  ;;  %v4739_v27 = vrot.slane %v4737_v30, 7  ;;  %v5007_v23 = vshll.u32 %v4931_v20, 16  ;;  %v7434_v30 = vld [vmem:[#allocation10 + $0x50] sm:$0xff]  ;;  %v7429_v20 = vld [vmem:[#allocation10 + $0x28] sm:$0xff] }
 0x48d   :  { %v4627_v17 = vmax.f32 %v4619_v48, 0.0  ;;  %v4855_v2 = vpack.c.b16 %v4849_v9, %v4848_v36 }
 0x48e   :  { %v4389_v21 = vpop.f32.mrf.mxu3  ;;  %v4597_v11 = vpop.f32.mrf.mxu0  ;;  %v4742_v61 = vor.u32 %v4740_v50, %v4739_v27  ;;  %v7428_v50 = vld [vmem:[#allocation10 + $0x20] sm:$0xff] }
 0x48f   :  { %v4643_v13 = vpack.c.bf16 %v4627_v17, %v4627_v17  ;;  %v4390_v32 = vadd.f32 %v4389_v21, %v4296_v1 }
 0x490   :  { %v4660_v54 = vld [vmem:[#allocation2 + $0x28] sm:$0xf] }
 0x491   :  { %4651 = vst.msk [vmem:[#allocation2 + $0x2c] sm:$0xf] %vm1196_vm8, %v4643_v13  ;;  %v4608_v53 = vadd.f32 %v4597_v11, %v4390_v32  ;;  %v4710_v12 = vshrl.u32 %v4660_v54, 16  ;;  %v4928_v44 = vld [vmem:[#allocation2 + $0x28] sm:$0xf]  ;;  %v4713_v1 = vshll.u32 %v4660_v54, 16 }
 0x492   :  { %v4978_v35 = vshrl.u32 %v4928_v44, 16  ;;  %v4981_v28 = vshll.u32 %v4928_v44, 16  ;;  %v5009_v44 = vrot.slane %v5007_v23, 5  ;;  %v9410_v23 = vld [vmem:[%s9609_s12] ss:$0 sm:$0xff] }
 0x493   :  { %v4620_v52 = vadd.f32 %v9337_v10, %v4608_v53  ;;  %v4712_v40 = vrot.slane %v4710_v12, 7  ;;  %v5039_v10 = vpack.c.b16 %v5033_v0, %v5032_v59  ;;  %v5013_v59 = vrot.slane %v5011_v45, 4 }
 0x494   :  { %v4980_v31 = vrot.slane %v4978_v35, 4  ;;  %v4983_v47 = vrot.slane %v4981_v28, 5 }
 0x495   :  { %7088 = vmatmul.msk.bf16.gmra.mxu2 %vm1402_vm14, %v4855_v2  ;;  %v4628_v38 = vmax.f32 %v4620_v52, 0.0  ;;  %v4715_v8 = vor.u32 %v4713_v1, %v4712_v40  ;;  %v4717_v55 = vrot.slane %v4712_v40, 4  ;;  %v4932_v2 = vld [vmem:[#allocation2 + $0x38] sm:$0x1] }
 0x496   :  { %v4391_v15 = vpop.f32.mrf.mxu3  ;;  %v4599_v16 = vpop.f32.mrf.mxu0  ;;  %v4984_v6 = vor.u32 %v4983_v47, %v4980_v31  ;;  %v5017_v28 = vshll.u32 %v4932_v2, 16  ;;  %v7435_v47 = vld [vmem:[#allocation10 + $0x58] sm:$0xff] }
 0x497   :  { %v4636_v57 = vsel %vm2397_vm9, %v4628_v38, 0.0  ;;  %v4716_v49 = vsel %vm7946_vm12, %v7034_v60, %v4715_v8  ;;  %v5014_v16 = vor.u32 %v5013_v59, %v5009_v44  ;;  %5587 = vmatpush.bf16.msrb.mxu2 %v7435_v47 }
 0x498   :  { %v4644_v25 = vpack.c.bf16 %v4636_v57, %v4636_v57  ;;  %v7406_v63 = vld [vmem:[#allocation2 + $0x28] sm:$0xff]  ;;  %v4850_v48 = vunpack.c.l.b16 %v4716_v49  ;;  %v4985_v36 = vrot.slane %v4984_v6, 4 }
 0x499   :  { %v4661_v62 = vld [vmem:[#allocation2 + $0x2c] sm:$0xf]  ;;  %7069 = vmatmul.msk.bf16.gmra.mxu1 %vm1402_vm14, %v7406_v63  ;;  %v5015_v60 = vrot.slane %v5014_v16, 4 }
 0x49a   :  { %v4929_v19 = vld [vmem:[#allocation2 + $0x2c] sm:$0xf]  ;;  %v4719_v7 = vshrl.u32 %v4661_v62, 16  ;;  %4652 = vst.msk [vmem:[#allocation2 + $0x30] sm:$0xf] %vm1196_vm8, %v4644_v25  ;;  %v4722_v51 = vshll.u32 %v4661_v62, 16 }
 0x49b   :  { %v4987_v34 = vshll.u32 %v4929_v19, 16  ;;  %v4991_v14 = vshrl.u32 %v4929_v19, 16  ;;  %v5019_v25 = vrot.slane %v5017_v28, 5  ;;  %5588 = vmatpush.bf16.msrb.mxu2 %v7434_v30  ;;  %v7425_v6 = vld [vmem:[#allocation10 + $0x8] sm:$0xff] }
 0x49c   :  { %7108 = vmatmul.msk.bf16.gmra.mxu3 %vm1402_vm14, %v5039_v10  ;;  %v4721_v3 = vrot.slane %v4719_v7, 7 }
 0x49d   :  { %v4989_v37 = vrot.slane %v4987_v34, 5  ;;  %v4993_v42 = vrot.slane %v4991_v14, 4  ;;  %v5020_v7 = vsel %vm8141_vm4, %v5015_v60, %v5019_v25 }
 0x49e   :  { %v4724_v46 = vor.u32 %v4722_v51, %v4721_v3  ;;  %v4726_v35 = vrot.slane %v4721_v3, 4  ;;  %v5037_v14 = vunpack.c.l.b16 %v5020_v7  ;;  %v7431_v3 = vld [vmem:[#allocation10 + $0x38] sm:$0xff] }
 0x49f   :  { %v4994_v4 = vor.u32 %v4993_v42, %v4989_v37  ;;  %v4990_v11 = vsel %vm8141_vm4, %v4985_v36, %v4989_v37  ;;  %v7427_v51 = vld [vmem:[#allocation10 + $0x18] sm:$0xff]  ;;  %5326 = vmatpush.bf16.msra.mxu0 %v7431_v3  ;;  %v7430_v37 = vld [vmem:[#allocation10 + $0x30] sm:$0xff] }
 0x4a0   :  { %v4725_v22 = vsel %vm7946_vm12, %v4717_v55, %v4724_v46  ;;  %v5034_v0 = vunpack.c.l.b16 %v4990_v11  ;;  %5403 = vmatpush.bf16.msra.mxu1 %v7427_v51  ;;  %v7426_v42 = vld [vmem:[#allocation10 + $0x10] sm:$0xff]  ;;  %v7433_v46 = vld [vmem:[#allocation10 + $0x48] sm:$0xff] }
 0x4a1   :  { %v4851_v41 = vunpack.c.l.b16 %v4725_v22  ;;  %v7407_v17 = vld [vmem:[#allocation2 + $0x30] sm:$0xff]  ;;  %v4995_v54 = vrot.slane %v4994_v4, 4  ;;  %5589 = vmatpush.bf16.msrb.mxu2 %v7433_v46 }
 0x4a2   :  { %v4930_v24 = vld [vmem:[#allocation2 + $0x30] sm:$0xf]  ;;  %5663 = vst.msk [vmem:[#allocation2 + $0x34] sm:$0xf] %vm1196_vm8, %v7739_v29 }
 0x4a3   :  { %v4662_v5 = vld [vmem:[#allocation2 + $0x30] sm:$0xf]  ;;  %v4856_v21 = vpack.c.b16 %v4851_v41, %v4850_v48  ;;  %v4997_v9 = vshll.u32 %v4930_v24, 16  ;;  %v5001_v32 = vshrl.u32 %v4930_v24, 16  ;;  %5327 = vmatpush.bf16.msra.mxu0 %v7430_v37  ;;  %v7432_v48 = vld [vmem:[#allocation10 + $0x40] sm:$0xff] }
 0x4a4   :  { %v4728_v13 = vshrl.u32 %v4662_v5, 16  ;;  %v4731_v43 = vshll.u32 %v4662_v5, 16  ;;  %5404 = vmatpush.bf16.msra.mxu1 %v7426_v42  ;;  %v7424_v41 = vld [vmem:[#allocation10] sm:$0xff] }
 0x4a5   :  { %7089 = vmatmul.msk.bf16.gmra.mxu2 %vm1402_vm14, %v4856_v21  ;;  %v4999_v53 = vrot.slane %v4997_v9, 5  ;;  %v5003_v52 = vrot.slane %v5001_v32, 4 }
 0x4a6   :  { %v4730_v18 = vrot.slane %v4728_v13, 7  ;;  %5590 = vmatpush.bf16.msrb.mxu2 %v7432_v48 }
 0x4a7   :  { %v5000_v12 = vsel %vm8141_vm4, %v4995_v54, %v4999_v53  ;;  %v5004_v57 = vor.u32 %v5003_v52, %v4999_v53  ;;  %5328 = vmatpush.bf16.msra.mxu0 %v7429_v20  ;;  %v5159_v52 = vld [vmem:[#allocation3 + $0x4] sm:$0x8] }
 0x4a8   :  { %v5035_v58 = vunpack.c.l.b16 %v5000_v12  ;;  %v4733_v38 = vor.u32 %v4731_v43, %v4730_v18  ;;  %v4735_v40 = vrot.slane %v4730_v18, 4  ;;  %5405 = vmatpush.bf16.msra.mxu1 %v7425_v6 }
 0x4a9   :  { %7070 = vmatmul.msk.bf16.gmra.mxu1 %vm1402_vm14, %v7407_v17  ;;  %v5005_v62 = vrot.slane %v5004_v57, 4  ;;  %v5170_v57 = vshrl.u32 %v5159_v52, 16 }
 0x4aa   :  { %v5040_v15 = vpack.c.b16 %v5035_v58, %v5034_v0  ;;  %v4734_v1 = vsel %vm7946_vm12, %v4726_v35, %v4733_v38  ;;  %v4743_v56 = vsel %vm7946_vm12, %v4735_v40, %v4742_v61 }
 0x4ab   :  { %v4852_v63 = vunpack.c.l.b16 %v4734_v1  ;;  %v4853_v10 = vunpack.c.l.b16 %v4743_v56  ;;  %v5010_v8 = vsel %vm8141_vm4, %v5005_v62, %v5009_v44  ;;  %5329 = vmatpush.bf16.msra.mxu0 %v7428_v50  ;;  %v7111_v7 = vrot.slane %v5170_v57, 11  ;;  %v5431_v50 = vld [vmem:[#allocation3 + $0x14] sm:$0xf] }
 0x4ac   :  { %7109 = vmatmul.msk.bf16.gmra.mxu3 %vm1402_vm14, %v5040_v15  ;;  %v5036_v34 = vunpack.c.l.b16 %v5010_v8  ;;  %5406 = vmatpush.bf16.msra.mxu1 %v7424_v41 }
 0x4ad   :  { %v4857_v19 = vpack.c.b16 %v4853_v10, %v4852_v63 }
 0x4ae   :  { %v5041_v31 = vpack.c.b16 %v5037_v14, %v5036_v34 }
 0x4b5   :  { %7090 = vmatmul.msk.bf16.gmra.mxu2 %vm1402_vm14, %v4857_v19 }
 0x4bc   :  { %7110 = vmatmul.msk.bf16.gmra.mxu3 %vm1402_vm14, %v5041_v31 }
 0x4f6   :  { %v4826_v49 = vpop.f32.mrf.mxu1 }
 0x4fe   :  { %v4828_v55 = vpop.f32.mrf.mxu1 }
 0x506   :  { %v4831_v27 = vpop.f32.mrf.mxu1 }
 0x508   :  { %v4903_v22 = vpop.f32.mrf.mxu2 }
 0x509   :  { %v4904_v4 = vadd.f32 %v4903_v22, %v4826_v49 }
 0x50e   :  { %v4833_v45 = vpop.f32.mrf.mxu1 }
 0x50f   :  { %v5087_v17 = vpop.f32.mrf.mxu3 }
 0x510   :  { %v5107_v24 = vadd.f32 %v5087_v17, %v4904_v4  ;;  %v4905_v5 = vpop.f32.mrf.mxu2 }
 0x511   :  { %v4906_v13 = vadd.f32 %v4905_v5, %v4828_v55  ;;  %v5163_v55 = vld [vmem:[#allocation3 + $0x14] sm:$0xf] }
 0x512   :  { %v5119_v21 = vadd.f32 %v9410_v23, %v5107_v24  ;;  %v5202_v48 = vshrl.u32 %v5163_v55, 16 }
 0x514   :  { %v5127_v36 = vmax.f32 %v5119_v21, 0.0  ;;  %v5204_v52 = vrot.slane %v5202_v48, 7 }
 0x516   :  { %v5143_v9 = vpack.c.bf16 %v5127_v36, %v5127_v36  ;;  %v4836_v53 = vpop.f32.mrf.mxu1  ;;  %v5205_v36 = vshll.u32 %v5163_v55, 16 }
 0x517   :  { %v5089_v32 = vpop.f32.mrf.mxu3 }
 0x518   :  { %5151 = vst.msk [vmem:[#allocation3 + $0x8] sm:$0xf] %vm1196_vm8, %v5143_v9  ;;  %v5108_v11 = vadd.f32 %v5089_v32, %v4906_v13  ;;  %v4908_v54 = vpop.f32.mrf.mxu2  ;;  %v5468_v9 = vshll.u32 %v5431_v50, 16 }
 0x519   :  { %v4909_v12 = vadd.f32 %v4908_v54, %v4831_v27 }
 0x51a   :  { %v5120_v18 = vadd.f32 %v9410_v23, %v5108_v11 }
 0x51c   :  { %v5128_v43 = vmax.f32 %v5120_v18, 0.0 }
 0x51e   :  { %v5144_v61 = vpack.c.bf16 %v5128_v43, %v5128_v43  ;;  %v9416_v58 = vpop.f32.mrf.mxu1 }
 0x51f   :  { %v5092_v2 = vpop.f32.mrf.mxu3  ;;  %v5160_v44 = vld [vmem:[#allocation3 + $0x8] sm:$0xf] }
 0x520   :  { %5152 = vst.msk [vmem:[#allocation3 + $0xc] sm:$0xf] %vm1196_vm8, %v5144_v61  ;;  %v5109_v59 = vadd.f32 %v5092_v2, %v4909_v12  ;;  %v4910_v0 = vpop.f32.mrf.mxu2  ;;  %v5175_v38 = vshrl.u32 %v5160_v44, 16  ;;  %v5428_v40 = vld [vmem:[#allocation3 + $0x8] sm:$0xf]  ;;  %v5178_v56 = vshll.u32 %v5160_v44, 16 }
 0x521   :  { %v5439_v35 = vshrl.u32 %v5428_v40, 16  ;;  %v5442_v28 = vshll.u32 %v5428_v40, 16  ;;  %v5472_v61 = vshrl.u32 %v5431_v50, 16 }
 0x522   :  { %v5121_v15 = vadd.f32 %v9410_v23, %v5109_v59  ;;  %v5177_v16 = vrot.slane %v5175_v38, 7 }
 0x523   :  { %v5441_v63 = vrot.slane %v5439_v35, 4  ;;  %v5444_v10 = vrot.slane %v5442_v28, 5  ;;  %v5470_v35 = vrot.slane %v5468_v9, 5 }
 0x524   :  { %v5129_v1 = vmax.f32 %v5121_v15, 0.0  ;;  %v5180_v34 = vor.u32 %v5178_v56, %v5177_v16  ;;  %v5182_v22 = vrot.slane %v5177_v16, 4  ;;  %v5432_v16 = vld [vmem:[#allocation3 + $0x18] sm:$0x1]  ;;  %v5474_v56 = vrot.slane %v5472_v61, 4 }
 0x525   :  { %v5445_v49 = vor.u32 %v5444_v10, %v5441_v63 }
 0x526   :  { %v5137_v25 = vsel %vm2397_vm9, %v5129_v1, 0.0  ;;  %v9421_v47 = vpop.f32.mrf.mxu1  ;;  %v5181_v46 = vsel %vm7946_vm12, %v7111_v7, %v5180_v34 }
 0x527   :  { %v5145_v62 = vpack.c.bf16 %v5137_v25, %v5137_v25  ;;  %v5094_v60 = vpop.f32.mrf.mxu3  ;;  %v7420_v19 = vld [vmem:[#allocation3 + $0x8] sm:$0xff]  ;;  %v5351_v17 = vunpack.c.l.b16 %v5181_v46  ;;  %v5446_v24 = vrot.slane %v5445_v49, 4 }
 0x528   :  { %v5161_v8 = vld [vmem:[#allocation3 + $0xc] sm:$0xf]  ;;  %v4913_v31 = vpop.f32.mrf.mxu2  ;;  %7145 = vmatmul.msk.bf16.vlgmr.msra.gmra.mxu0 %vm1402_vm14, %v7420_v19 }
 0x529   :  { %v5429_v14 = vld [vmem:[#allocation3 + $0xc] sm:$0xf]  ;;  %v5184_v3 = vshrl.u32 %v5161_v8, 16  ;;  %5153 = vst.msk [vmem:[#allocation3 + $0x10] sm:$0xf] %vm1196_vm8, %v5145_v62  ;;  %v5187_v42 = vshll.u32 %v5161_v8, 16  ;;  %v4914_v41 = vadd.f32 %v4913_v31, %v4836_v53  ;;  %v5207_v62 = vor.u32 %v5205_v36, %v5204_v52 }
 0x52a   :  { %v5448_v51 = vshll.u32 %v5429_v14, 16  ;;  %v5452_v30 = vshrl.u32 %v5429_v14, 16  ;;  %v5478_v31 = vshll.u32 %v5432_v16, 16  ;;  %v5164_v36 = vld [vmem:[#allocation3 + $0x24] sm:$0x8] }
 0x52b   :  { %v9425_v37 = vrot.slane %v5184_v3, 7 }
 0x52c   :  { %v5450_v20 = vrot.slane %v5448_v51, 5  ;;  %v5454_v6 = vrot.slane %v5452_v30, 4 }
 0x52d   :  { %v5189_v27 = vor.u32 %v5187_v42, %v9425_v37  ;;  %v5191_v14 = vrot.slane %v9425_v37, 4 }
 0x52e   :  { %v5455_v21 = vor.u32 %v5454_v6, %v5450_v20  ;;  %v4843_v11 = vpop.f32.mrf.mxu1  ;;  %v5451_v59 = vsel %vm8141_vm4, %v5446_v24, %v5450_v20 }
 0x52f   :  { %v5190_v4 = vsel %vm7946_vm12, %v5182_v22, %v5189_v27  ;;  %v5097_v5 = vpop.f32.mrf.mxu3  ;;  %v5535_v10 = vunpack.c.l.b16 %v5451_v59  ;;  %v5480_v22 = vrot.slane %v5478_v31, 5 }
 0x530   :  { %v5352_v45 = vunpack.c.l.b16 %v5190_v4  ;;  %v5111_v13 = vadd.f32 %v5097_v5, %v4914_v41  ;;  %v4915_v32 = vpop.f32.mrf.mxu2  ;;  %v7421_v54 = vld [vmem:[#allocation3 + $0x10] sm:$0xff]  ;;  %v5456_v38 = vrot.slane %v5455_v21, 4 }
 0x531   :  { %v5430_v18 = vld [vmem:[#allocation3 + $0x10] sm:$0xf]  ;;  %6164 = vst.msk [vmem:[#allocation3 + $0x14] sm:$0xf] %vm1196_vm8, %v7739_v29  ;;  %v4916_v25 = vadd.f32 %v4915_v32, %v9416_v58  ;;  %v5475_v58 = vor.u32 %v5474_v56, %v5470_v35 }
 0x532   :  { %v5162_v43 = vld [vmem:[#allocation3 + $0x10] sm:$0xf]  ;;  %v5359_v12 = vpack.c.b16 %v5352_v45, %v5351_v17  ;;  %v5458_v2 = vshll.u32 %v5430_v18, 16  ;;  %v5123_v44 = vadd.f32 %v9410_v23, %v5111_v13  ;;  %v5462_v0 = vshrl.u32 %v5430_v18, 16 }
 0x533   :  { %v5193_v53 = vshrl.u32 %v5162_v43, 16  ;;  %v5196_v57 = vshll.u32 %v5162_v43, 16  ;;  %v5476_v6 = vrot.slane %v5475_v58, 4  ;;  %v5210_v18 = vshrl.u32 %v5164_v36, 16 }
 0x534   :  { %7165 = vmatmul.msk.bf16.vlgmr.msra.gmra.mxu1 %vm1402_vm14, %v5359_v12  ;;  %v5460_v40 = vrot.slane %v5458_v2, 5  ;;  %v5131_v28 = vmax.f32 %v5123_v44, 0.0  ;;  %v5464_v1 = vrot.slane %v5462_v0, 4  ;;  %v5168_v44 = vld [vmem:[#allocation3 + $0x34] sm:$0xf] }
 0x535   :  { %v5195_v15 = vrot.slane %v5193_v53, 7  ;;  %v5481_v21 = vsel %vm8141_vm4, %v5476_v6, %v5480_v22  ;;  %v5245_v58 = vshll.u32 %v5168_v44, 16 }
 0x536   :  { %v5461_v63 = vsel %vm8141_vm4, %v5456_v38, %v5460_v40  ;;  %v5147_v60 = vpack.c.bf16 %v5131_v28, %v5131_v28  ;;  %v5465_v42 = vor.u32 %v5464_v1, %v5460_v40 }
 0x537   :  { %v5536_v19 = vunpack.c.l.b16 %v5461_v63  ;;  %v5198_v8 = vor.u32 %v5196_v57, %v5195_v15  ;;  %v5200_v7 = vrot.slane %v5195_v15, 4  ;;  %v5099_v34 = vpop.f32.mrf.mxu3  ;;  %v7112_v15 = vrot.slane %v5210_v18, 11 }
 0x538   :  { %5155 = vst.msk [vmem:[#allocation3 + $0x28] sm:$0xf] %vm1196_vm8, %v5147_v60  ;;  %v5112_v3 = vadd.f32 %v5099_v34, %v4916_v25  ;;  %v4918_v51 = vpop.f32.mrf.mxu2  ;;  %7146 = vmatmul.msk.bf16.gmra.mxu0 %vm1402_vm14, %v7421_v54  ;;  %v5466_v20 = vrot.slane %v5465_v42, 4  ;;  %v5538_v54 = vunpack.c.l.b16 %v5481_v21  ;;  %v7447_v60 = vld [vmem:[#allocation12 + $0x38] sm:$0xff] }
 0x539   :  { %v5543_v30 = vpack.c.b16 %v5536_v19, %v5535_v10  ;;  %v5199_v55 = vsel %vm7946_vm12, %v5191_v14, %v5198_v8  ;;  %v5208_v37 = vsel %vm7946_vm12, %v5200_v7, %v5207_v62  ;;  %v4919_v41 = vadd.f32 %v4918_v51, %v9421_v47  ;;  %v7443_v19 = vld [vmem:[#allocation12 + $0x18] sm:$0xff]  ;;  %5831 = vmatpush.bf16.msrb.mxu3 %v7447_v60  ;;  %v7450_v60 = vld [vmem:[#allocation12 + $0x50] sm:$0xff] }
 0x53a   :  { %v5124_v49 = vadd.f32 %v9410_v23, %v5112_v3  ;;  %v5353_v27 = vunpack.c.l.b16 %v5199_v55  ;;  %v5354_v50 = vunpack.c.l.b16 %v5208_v37  ;;  %v5471_v45 = vsel %vm8141_vm4, %v5466_v20, %v5470_v35  ;;  %v5436_v3 = vld [vmem:[#allocation3 + $0x34] sm:$0xf]  ;;  %5908 = vmatpush.bf16.msrb.mxu0 %v7443_v19 }
 0x53b   :  { %7185 = vmatmul.msk.bf16.vlgmr.msrb.gmra.mxu2 %vm1402_vm14, %v5543_v30  ;;  %v5537_v47 = vunpack.c.l.b16 %v5471_v45  ;;  %v5242_v62 = vshrl.u32 %v5168_v44, 16 }
 0x53c   :  { %v5132_v46 = vmax.f32 %v5124_v49, 0.0  ;;  %v5360_v13 = vpack.c.b16 %v5354_v50, %v5353_v27  ;;  %v5516_v27 = vshrl.u32 %v5436_v3, 16 }
 0x53d   :  { %v5544_v40 = vpack.c.b16 %v5538_v54, %v5537_v47  ;;  %v5244_v42 = vrot.slane %v5242_v62, 7  ;;  %v7442_v62 = vld [vmem:[#allocation12 + $0x10] sm:$0xff] }
 0x53e   :  { %v5148_v48 = vpack.c.bf16 %v5132_v46, %v5132_v46  ;;  %v5512_v46 = vshll.u32 %v5436_v3, 16  ;;  %v5518_v54 = vrot.slane %v5516_v27, 4  ;;  %5909 = vmatpush.bf16.msrb.mxu0 %v7442_v62 }
 0x53f   :  { %v5102_v4 = vpop.f32.mrf.mxu3  ;;  %v5165_v17 = vld [vmem:[#allocation3 + $0x28] sm:$0xf] }
 0x540   :  { %5156 = vst.msk [vmem:[#allocation3 + $0x2c] sm:$0xf] %vm1196_vm8, %v5148_v48  ;;  %v5113_v24 = vadd.f32 %v5102_v4, %v4919_v41  ;;  %v4920_v5 = vpop.f32.mrf.mxu2  ;;  %v5215_v9 = vshrl.u32 %v5165_v17, 16  ;;  %v5433_v11 = vld [vmem:[#allocation3 + $0x28] sm:$0xf]  ;;  %v5218_v52 = vshll.u32 %v5165_v17, 16 }
 0x541   :  { %v5483_v12 = vshrl.u32 %v5433_v11, 16  ;;  %v5486_v2 = vshll.u32 %v5433_v11, 16  ;;  %v5514_v47 = vrot.slane %v5512_v46, 5 }
 0x542   :  { %v5125_v32 = vadd.f32 %v9410_v23, %v5113_v24  ;;  %v5217_v61 = vrot.slane %v5215_v9, 7  ;;  %v5247_v9 = vor.u32 %v5245_v58, %v5244_v42  ;;  %v7448_v58 = vld [vmem:[#allocation12 + $0x40] sm:$0xff] }
 0x543   :  { %v5485_v56 = vrot.slane %v5483_v12, 4  ;;  %v5488_v25 = vrot.slane %v5486_v2, 5  ;;  %v5519_v44 = vor.u32 %v5518_v54, %v5514_v47 }
 0x544   :  { %7166 = vmatmul.msk.bf16.gmra.mxu1 %vm1402_vm14, %v5360_v13  ;;  %v5133_v43 = vmax.f32 %v5125_v32, 0.0  ;;  %v5220_v28 = vor.u32 %v5218_v52, %v5217_v61  ;;  %v5222_v14 = vrot.slane %v5217_v61, 4  ;;  %v5437_v32 = vld [vmem:[#allocation3 + $0x38] sm:$0x1] }
 0x545   :  { %v5489_v51 = vor.u32 %v5488_v25, %v5485_v56 }
 0x546   :  { %v5141_v53 = vsel %vm2397_vm9, %v5133_v43, 0.0  ;;  %v5221_v34 = vsel %vm7946_vm12, %v7112_v15, %v5220_v28 }
 0x547   :  { %v5149_v59 = vpack.c.bf16 %v5141_v53, %v5141_v53  ;;  %v5104_v0 = vpop.f32.mrf.mxu3  ;;  %v7422_v38 = vld [vmem:[#allocation3 + $0x28] sm:$0xff]  ;;  %v5355_v49 = vunpack.c.l.b16 %v5221_v34  ;;  %v5490_v48 = vrot.slane %v5489_v51, 4  ;;  %v5522_v53 = vshll.u32 %v5437_v32, 16  ;;  %v7444_v51 = vld [vmem:[#allocation12 + $0x20] sm:$0xff] }
 0x548   :  { %v5166_v23 = vld [vmem:[#allocation3 + $0x2c] sm:$0xf]  ;;  %7147 = vmatmul.msk.bf16.gmra.mxu0 %vm1402_vm14, %v7422_v38 }
 0x549   :  { %v5434_v35 = vld [vmem:[#allocation3 + $0x2c] sm:$0xf]  ;;  %v5224_v57 = vshrl.u32 %v5166_v23, 16  ;;  %5157 = vst.msk [vmem:[#allocation3 + $0x30] sm:$0xf] %vm1196_vm8, %v5149_v59  ;;  %v5227_v10 = vshll.u32 %v5166_v23, 16 }
 0x54a   :  { %v5492_v16 = vshll.u32 %v5434_v35, 16  ;;  %v5496_v1 = vshrl.u32 %v5434_v35, 16  ;;  %v5524_v38 = vrot.slane %v5522_v53, 5  ;;  %v5520_v35 = vrot.slane %v5519_v44, 4  ;;  %v7441_v34 = vld [vmem:[#allocation12 + $0x8] sm:$0xff] }
 0x54b   :  { %7186 = vmatmul.msk.bf16.gmra.mxu2 %vm1402_vm14, %v5544_v40  ;;  %v5226_v63 = vrot.slane %v5224_v57, 7  ;;  %5910 = vmatpush.bf16.msrb.mxu0 %v7441_v34 }
 0x54c   :  { %v5494_v8 = vrot.slane %v5492_v16, 5  ;;  %v5498_v7 = vrot.slane %v5496_v1, 4  ;;  %v5525_v16 = vsel %vm8141_vm4, %v5520_v35, %v5524_v38 }
 0x54d   :  { %v5229_v31 = vor.u32 %v5227_v10, %v5226_v63  ;;  %v5231_v2 = vrot.slane %v5226_v63, 4  ;;  %v5542_v56 = vunpack.c.l.b16 %v5525_v16  ;;  %v7451_v63 = vld [vmem:[#allocation12 + $0x58] sm:$0xff]  ;;  %v7446_v10 = vld [vmem:[#allocation12 + $0x30] sm:$0xff] }
 0x54e   :  { %v5499_v37 = vor.u32 %v5498_v7, %v5494_v8  ;;  %v5495_v24 = vsel %vm8141_vm4, %v5490_v48, %v5494_v8  ;;  %6092 = vmatpush.bf16.msrb.mxu1 %v7451_v63  ;;  %5832 = vmatpush.bf16.msrb.mxu3 %v7446_v10  ;;  %v7445_v8 = vld [vmem:[#allocation12 + $0x28] sm:$0xff] }
 0x54f   :  { %v5230_v30 = vsel %vm7946_vm12, %v5222_v14, %v5229_v31  ;;  %v5539_v18 = vunpack.c.l.b16 %v5495_v24  ;;  %v7449_v14 = vld [vmem:[#allocation12 + $0x48] sm:$0xff] }
 0x550   :  { %v5356_v55 = vunpack.c.l.b16 %v5230_v30  ;;  %v7423_v20 = vld [vmem:[#allocation3 + $0x30] sm:$0xff]  ;;  %v5500_v5 = vrot.slane %v5499_v37, 4  ;;  %v7440_v30 = vld [vmem:[#allocation12] sm:$0xff] }
 0x551   :  { %v5435_v6 = vld [vmem:[#allocation3 + $0x30] sm:$0xf]  ;;  %6168 = vst.msk [vmem:[#allocation3 + $0x34] sm:$0xf] %vm1196_vm8, %v7739_v29  ;;  %5911 = vmatpush.bf16.msrb.mxu0 %v7440_v30 }
 0x552   :  { %v5167_v22 = vld [vmem:[#allocation3 + $0x30] sm:$0xf]  ;;  %v5361_v50 = vpack.c.b16 %v5356_v55, %v5355_v49  ;;  %v5502_v41 = vshll.u32 %v5435_v6, 16  ;;  %v5506_v17 = vshrl.u32 %v5435_v6, 16  ;;  %6093 = vmatpush.bf16.msrb.mxu1 %v7450_v60  ;;  %5833 = vmatpush.bf16.msrb.mxu3 %v7445_v8  ;;  %v9489_v55 = vld [vmem:[%s9611_s14] ss:$0 sm:$0xff] }
 0x553   :  { %v5233_v4 = vshrl.u32 %v5167_v22, 16  ;;  %v5236_v36 = vshll.u32 %v5167_v22, 16 }
 0x554   :  { %7167 = vmatmul.msk.bf16.gmra.mxu1 %vm1402_vm14, %v5361_v50  ;;  %v5504_v45 = vrot.slane %v5502_v41, 5  ;;  %v5508_v11 = vrot.slane %v5506_v17, 4 }
 0x555   :  { %v5235_v21 = vrot.slane %v5233_v4, 7 }
 0x556   :  { %v5505_v13 = vsel %vm8141_vm4, %v5500_v5, %v5504_v45  ;;  %v5509_v52 = vor.u32 %v5508_v11, %v5504_v45  ;;  %6094 = vmatpush.bf16.msrb.mxu1 %v7449_v14  ;;  %5834 = vmatpush.bf16.msrb.mxu3 %v7444_v51  ;;  %v5936_v51 = vld [vmem:[#allocation2 + $0x14] sm:$0xf] }
 0x557   :  { %v5540_v29 = vunpack.c.l.b16 %v5505_v13  ;;  %v5238_v43 = vor.u32 %v5236_v36, %v5235_v21  ;;  %v5240_v61 = vrot.slane %v5235_v21, 4  ;;  %v5664_v13 = vld [vmem:[#allocation2 + $0x4] sm:$0x8] }
 0x558   :  { %7148 = vmatmul.msk.bf16.gmra.mxu0 %vm1402_vm14, %v7423_v20  ;;  %v5510_v15 = vrot.slane %v5509_v52, 4 }
 0x559   :  { %v5545_v12 = vpack.c.b16 %v5540_v29, %v5539_v18  ;;  %v5239_v59 = vsel %vm7946_vm12, %v5231_v2, %v5238_v43  ;;  %v5248_v0 = vsel %vm7946_vm12, %v5240_v61, %v5247_v9  ;;  %v5675_v61 = vshrl.u32 %v5664_v13, 16 }
 0x55a   :  { %v5357_v40 = vunpack.c.l.b16 %v5239_v59  ;;  %v5358_v23 = vunpack.c.l.b16 %v5248_v0  ;;  %v5515_v57 = vsel %vm8141_vm4, %v5510_v15, %v5514_v47  ;;  %6095 = vmatpush.bf16.msrb.mxu1 %v7448_v58 }
 0x55b   :  { %7187 = vmatmul.msk.bf16.gmra.mxu2 %vm1402_vm14, %v5545_v12  ;;  %v5541_v1 = vunpack.c.l.b16 %v5515_v57  ;;  %v7189_v0 = vrot.slane %v5675_v61, 11 }
 0x55c   :  { %v5362_v28 = vpack.c.b16 %v5358_v23, %v5357_v40 }
 0x55d   :  { %v5546_v25 = vpack.c.b16 %v5542_v56, %v5541_v1 }
 0x564   :  { %7168 = vmatmul.msk.bf16.gmra.mxu1 %vm1402_vm14, %v5362_v28 }
 0x56b   :  { %7188 = vmatmul.msk.bf16.gmra.mxu2 %vm1402_vm14, %v5546_v25 }
 0x5a5   :  { %v5331_v19 = vpop.f32.mrf.mxu0 }
 0x5ad   :  { %v5333_v7 = vpop.f32.mrf.mxu0 }
 0x5b1   :  { %v5408_v31 = vpop.f32.mrf.mxu1 }
 0x5b2   :  { %v5409_v49 = vadd.f32 %v5408_v31, %v5331_v19  ;;  %v5668_v19 = vld [vmem:[#allocation2 + $0x14] sm:$0xf] }
 0x5b3   :  { %v5707_v30 = vshrl.u32 %v5668_v19, 16 }
 0x5b5   :  { %v5336_v3 = vpop.f32.mrf.mxu0 }
 0x5b9   :  { %v5410_v42 = vpop.f32.mrf.mxu1 }
 0x5ba   :  { %v5411_v50 = vadd.f32 %v5410_v42, %v5333_v7 }
 0x5bd   :  { %v5338_v20 = vpop.f32.mrf.mxu0 }
 0x5be   :  { %v5592_v37 = vpop.f32.mrf.mxu2 }
 0x5bf   :  { %v5612_v46 = vadd.f32 %v5592_v37, %v5409_v49 }
 0x5c1   :  { %v5624_v6 = vadd.f32 %v9489_v55, %v5612_v46  ;;  %v5413_v22 = vpop.f32.mrf.mxu1 }
 0x5c2   :  { %v5414_v21 = vadd.f32 %v5413_v22, %v5336_v3  ;;  %v5973_v22 = vshll.u32 %v5936_v51, 16 }
 0x5c3   :  { %v5632_v27 = vmax.f32 %v5624_v6, 0.0 }
 0x5c5   :  { %v5648_v48 = vpack.c.bf16 %v5632_v27, %v5632_v27  ;;  %v5341_v17 = vpop.f32.mrf.mxu0 }
 0x5c6   :  { %v5594_v41 = vpop.f32.mrf.mxu2 }
 0x5c7   :  { %5656 = vst.msk [vmem:[#allocation2 + $0x8] sm:$0xf] %vm1196_vm8, %v5648_v48  ;;  %v5613_v4 = vadd.f32 %v5594_v41, %v5411_v50 }
 0x5c9   :  { %v5625_v24 = vadd.f32 %v9489_v55, %v5613_v4  ;;  %v5415_v5 = vpop.f32.mrf.mxu1  ;;  %v5710_v4 = vshll.u32 %v5668_v19, 16 }
 0x5cb   :  { %v5633_v45 = vmax.f32 %v5625_v24, 0.0  ;;  %v5977_v24 = vshrl.u32 %v5936_v51, 16 }
 0x5cd   :  { %v5649_v36 = vpack.c.bf16 %v5633_v45, %v5633_v45  ;;  %v9495_v47 = vpop.f32.mrf.mxu0 }
 0x5ce   :  { %v5597_v9 = vpop.f32.mrf.mxu2  ;;  %v5665_v32 = vld [vmem:[#allocation2 + $0x8] sm:$0xf] }
 0x5cf   :  { %5657 = vst.msk [vmem:[#allocation2 + $0xc] sm:$0xf] %vm1196_vm8, %v5649_v36  ;;  %v5614_v11 = vadd.f32 %v5597_v9, %v5414_v21  ;;  %v5680_v54 = vshrl.u32 %v5665_v32, 16  ;;  %v5933_v18 = vld [vmem:[#allocation2 + $0x8] sm:$0xf]  ;;  %v5683_v44 = vshll.u32 %v5665_v32, 16 }
 0x5d0   :  { %v5944_v12 = vshrl.u32 %v5933_v18, 16  ;;  %v5947_v53 = vshll.u32 %v5933_v18, 16  ;;  %v5709_v36 = vrot.slane %v5707_v30, 7 }
 0x5d1   :  { %v5626_v29 = vadd.f32 %v9489_v55, %v5614_v11  ;;  %v5418_v43 = vpop.f32.mrf.mxu1  ;;  %v5682_v2 = vrot.slane %v5680_v54, 7 }
 0x5d2   :  { %v5946_v38 = vrot.slane %v5944_v12, 4  ;;  %v5949_v16 = vrot.slane %v5947_v53, 5  ;;  %v5419_v42 = vadd.f32 %v5418_v43, %v5341_v17  ;;  %v5937_v12 = vld [vmem:[#allocation2 + $0x18] sm:$0x1]  ;;  %v5979_v53 = vrot.slane %v5977_v24, 4 }
 0x5d3   :  { %v5634_v52 = vmax.f32 %v5626_v29, 0.0  ;;  %v5685_v28 = vor.u32 %v5683_v44, %v5682_v2  ;;  %v5687_v31 = vrot.slane %v5682_v2, 4  ;;  %v5975_v29 = vrot.slane %v5973_v22, 5 }
 0x5d4   :  { %v5950_v7 = vor.u32 %v5949_v16, %v5946_v38  ;;  %v5983_v16 = vshll.u32 %v5937_v12, 16 }
 0x5d5   :  { %v5642_v59 = vsel %vm2397_vm9, %v5634_v52, 0.0  ;;  %v9500_v1 = vpop.f32.mrf.mxu0  ;;  %v5686_v8 = vsel %vm7946_vm12, %v7189_v0, %v5685_v28  ;;  %v5712_v0 = vor.u32 %v5710_v4, %v5709_v36 }
 0x5d6   :  { %v5650_v40 = vpack.c.bf16 %v5642_v59, %v5642_v59  ;;  %v5599_v23 = vpop.f32.mrf.mxu2  ;;  %v7436_v15 = vld [vmem:[#allocation2 + $0x8] sm:$0xff]  ;;  %v5856_v49 = vunpack.c.l.b16 %v5686_v8  ;;  %v5951_v20 = vrot.slane %v5950_v7, 4 }
 0x5d7   :  { %v5666_v35 = vld [vmem:[#allocation2 + $0xc] sm:$0xf]  ;;  %7223 = vmatmul.msk.bf16.vlgmr.msrb.gmra.mxu3 %vm1402_vm14, %v7436_v15 }
 0x5d8   :  { %v5934_v57 = vld [vmem:[#allocation2 + $0xc] sm:$0xf]  ;;  %v5689_v56 = vshrl.u32 %v5666_v35, 16  ;;  %5658 = vst.msk [vmem:[#allocation2 + $0x10] sm:$0xf] %vm1196_vm8, %v5650_v40  ;;  %v5692_v60 = vshll.u32 %v5666_v35, 16 }
 0x5d9   :  { %v5953_v25 = vshll.u32 %v5934_v57, 16  ;;  %v5957_v63 = vshrl.u32 %v5934_v57, 16  ;;  %v5420_v10 = vpop.f32.mrf.mxu1 }
 0x5da   :  { %v9504_v62 = vrot.slane %v5689_v56, 7  ;;  %v5421_v52 = vadd.f32 %v5420_v10, %v9495_v47  ;;  %v5980_v47 = vor.u32 %v5979_v53, %v5975_v29 }
 0x5db   :  { %v5955_v34 = vrot.slane %v5953_v25, 5  ;;  %v5959_v14 = vrot.slane %v5957_v63, 4 }
 0x5dc   :  { %v5694_v3 = vor.u32 %v5692_v60, %v9504_v62  ;;  %v5696_v57 = vrot.slane %v9504_v62, 4 }
 0x5dd   :  { %v5960_v6 = vor.u32 %v5959_v14, %v5955_v34  ;;  %v5348_v50 = vpop.f32.mrf.mxu0  ;;  %v5956_v13 = vsel %vm8141_vm4, %v5951_v20, %v5955_v34  ;;  %v5981_v34 = vrot.slane %v5980_v47, 4  ;;  %v5985_v14 = vrot.slane %v5983_v16, 5 }
 0x5de   :  { %v5695_v58 = vsel %vm7946_vm12, %v5687_v31, %v5694_v3  ;;  %v5602_v37 = vpop.f32.mrf.mxu2  ;;  %v6040_v59 = vunpack.c.l.b16 %v5956_v13  ;;  %v5673_v13 = vld [vmem:[#allocation2 + $0x34] sm:$0xf] }
 0x5df   :  { %v5857_v46 = vunpack.c.l.b16 %v5695_v58  ;;  %v5616_v27 = vadd.f32 %v5602_v37, %v5419_v42  ;;  %v5935_v48 = vld [vmem:[#allocation2 + $0x10] sm:$0xf]  ;;  %v5961_v11 = vrot.slane %v5960_v6, 4  ;;  %v5669_v58 = vld [vmem:[#allocation2 + $0x24] sm:$0x8]  ;;  %v5986_v6 = vsel %vm8141_vm4, %v5981_v34, %v5985_v14 }
 0x5e0   :  { %v5667_v41 = vld [vmem:[#allocation2 + $0x10] sm:$0xf]  ;;  %v5963_v45 = vshll.u32 %v5935_v48, 16  ;;  %v5967_v32 = vshrl.u32 %v5935_v48, 16  ;;  %v5715_v48 = vshrl.u32 %v5669_v58, 16  ;;  %v6043_v4 = vunpack.c.l.b16 %v5986_v6 }
 0x5e1   :  { %v5864_v5 = vpack.c.b16 %v5857_v46, %v5856_v49  ;;  %v5698_v21 = vshrl.u32 %v5667_v41, 16  ;;  %v5628_v17 = vadd.f32 %v9489_v55, %v5616_v27  ;;  %v5423_v9 = vpop.f32.mrf.mxu1  ;;  %v5701_v61 = vshll.u32 %v5667_v41, 16  ;;  %v7437_v28 = vld [vmem:[#allocation2 + $0x10] sm:$0xff] }
 0x5e2   :  { %v5965_v54 = vrot.slane %v5963_v45, 5  ;;  %v5969_v2 = vrot.slane %v5967_v32, 4  ;;  %v5424_v51 = vadd.f32 %v5423_v9, %v9500_v1  ;;  %v7190_v36 = vrot.slane %v5715_v48, 11 }
 0x5e3   :  { %7243 = vmatmul.msk.bf16.vlgmr.msrb.gmra.mxu0 %vm1402_vm14, %v5864_v5  ;;  %v5700_v18 = vrot.slane %v5698_v21, 7  ;;  %v5636_v43 = vmax.f32 %v5628_v17, 0.0 }
 0x5e4   :  { %v5966_v44 = vsel %vm8141_vm4, %v5961_v11, %v5965_v54  ;;  %v5970_v63 = vor.u32 %v5969_v2, %v5965_v54 }
 0x5e5   :  { %v5652_v38 = vpack.c.bf16 %v5636_v43, %v5636_v43  ;;  %v6041_v40 = vunpack.c.l.b16 %v5966_v44  ;;  %v5703_v23 = vor.u32 %v5701_v61, %v5700_v18  ;;  %v5705_v15 = vrot.slane %v5700_v18, 4 }
 0x5e6   :  { %v5604_v35 = vpop.f32.mrf.mxu2  ;;  %v5971_v7 = vrot.slane %v5970_v63, 4 }
 0x5e7   :  { %5660 = vst.msk [vmem:[#allocation2 + $0x28] sm:$0xf] %vm1196_vm8, %v5652_v38  ;;  %v5617_v56 = vadd.f32 %v5604_v35, %v5421_v52  ;;  %v6048_v25 = vpack.c.b16 %v6041_v40, %v6040_v59  ;;  %7224 = vmatmul.msk.bf16.gmra.mxu3 %vm1402_vm14, %v7437_v28  ;;  %v5704_v19 = vsel %vm7946_vm12, %v5696_v57, %v5703_v23  ;;  %v5747_v59 = vshrl.u32 %v5673_v13, 16  ;;  %v5941_v28 = vld [vmem:[#allocation2 + $0x34] sm:$0xf] }
 0x5e8   :  { %v5713_v62 = vsel %vm7946_vm12, %v5705_v15, %v5712_v0  ;;  %v5858_v31 = vunpack.c.l.b16 %v5704_v19  ;;  %v5976_v20 = vsel %vm8141_vm4, %v5971_v7, %v5975_v29 }
 0x5e9   :  { %v5629_v10 = vadd.f32 %v9489_v55, %v5617_v56  ;;  %v5425_v60 = vpop.f32.mrf.mxu1  ;;  %7263 = vmatmul.msk.bf16.vlgmr.msrb.gmra.mxu1 %vm1402_vm14, %v6048_v25  ;;  %v5859_v3 = vunpack.c.l.b16 %v5713_v62  ;;  %v6042_v41 = vunpack.c.l.b16 %v5976_v20  ;;  %v5749_v16 = vrot.slane %v5747_v59, 7  ;;  %v9564_v59 = vld [vmem:[%s9613_s16] ss:$0 sm:$0xff] }
 0x5ea   :  { %v5750_v56 = vshll.u32 %v5673_v13, 16 }
 0x5eb   :  { %v5637_v8 = vmax.f32 %v5629_v10, 0.0  ;;  %v5865_v27 = vpack.c.b16 %v5859_v3, %v5858_v31  ;;  %v6017_v10 = vshll.u32 %v5941_v28, 16 }
 0x5ed   :  { %v5653_v30 = vpack.c.bf16 %v5637_v8, %v5637_v8  ;;  %v6021_v8 = vshrl.u32 %v5941_v28, 16  ;;  %v6019_v6 = vrot.slane %v6017_v10, 5 }
 0x5ee   :  { %v5607_v42 = vpop.f32.mrf.mxu2  ;;  %v5670_v49 = vld [vmem:[#allocation2 + $0x28] sm:$0xf] }
 0x5ef   :  { %v5938_v37 = vld [vmem:[#allocation2 + $0x28] sm:$0xf]  ;;  %5661 = vst.msk [vmem:[#allocation2 + $0x2c] sm:$0xf] %vm1196_vm8, %v5653_v30  ;;  %v5618_v46 = vadd.f32 %v5607_v42, %v5424_v51  ;;  %v5720_v22 = vshrl.u32 %v5670_v49, 16  ;;  %v5723_v17 = vshll.u32 %v5670_v49, 16  ;;  %v5752_v49 = vor.u32 %v5750_v56, %v5749_v16 }
 0x5f0   :  { %v5988_v1 = vshrl.u32 %v5938_v37, 16  ;;  %v5991_v24 = vshll.u32 %v5938_v37, 16 }
 0x5f1   :  { %v5630_v50 = vadd.f32 %v9489_v55, %v5618_v46  ;;  %v5722_v45 = vrot.slane %v5720_v22, 7  ;;  %v6049_v55 = vpack.c.b16 %v6043_v4, %v6042_v41  ;;  %v5942_v46 = vld [vmem:[#allocation2 + $0x38] sm:$0x1]  ;;  %v6023_v22 = vrot.slane %v6021_v8, 4 }
 0x5f2   :  { %v5990_v9 = vrot.slane %v5988_v1, 4  ;;  %v5993_v43 = vrot.slane %v5991_v24, 5 }
 0x5f3   :  { %7244 = vmatmul.msk.bf16.gmra.mxu0 %vm1402_vm14, %v5865_v27  ;;  %v5638_v5 = vmax.f32 %v5630_v50, 0.0  ;;  %v5725_v61 = vor.u32 %v5723_v17, %v5722_v45  ;;  %v5727_v23 = vrot.slane %v5722_v45, 4 }
 0x5f4   :  { %v5994_v35 = vor.u32 %v5993_v43, %v5990_v9 }
 0x5f5   :  { %v5646_v21 = vsel %vm2397_vm9, %v5638_v5, 0.0  ;;  %v5726_v40 = vsel %vm7946_vm12, %v7190_v36, %v5725_v61  ;;  %v6027_v5 = vshll.u32 %v5942_v46, 16  ;;  %v6215_v46 = vld [vmem:[#allocation13 + $0x10] sm:$0xff] }
 0x5f6   :  { %v5654_v32 = vpack.c.bf16 %v5646_v21, %v5646_v21  ;;  %v5609_v11 = vpop.f32.mrf.mxu2  ;;  %v7438_v54 = vld [vmem:[#allocation2 + $0x28] sm:$0xff]  ;;  %v5860_v25 = vunpack.c.l.b16 %v5726_v40  ;;  %v5995_v19 = vrot.slane %v5994_v35, 4  ;;  %v6024_v21 = vor.u32 %v6023_v22, %v6019_v6 }
 0x5f7   :  { %v5671_v18 = vld [vmem:[#allocation2 + $0x2c] sm:$0xf]  ;;  %7225 = vmatmul.msk.bf16.gmra.mxu3 %vm1402_vm14, %v7438_v54  ;;  %v6029_v9 = vrot.slane %v6027_v5, 5 }
 0x5f8   :  { %v5939_v29 = vld [vmem:[#allocation2 + $0x2c] sm:$0xf]  ;;  %v5729_v12 = vshrl.u32 %v5671_v18, 16  ;;  %5662 = vst.msk [vmem:[#allocation2 + $0x30] sm:$0xf] %vm1196_vm8, %v5654_v32  ;;  %v5732_v44 = vshll.u32 %v5671_v18, 16 }
 0x5f9   :  { %v5997_v2 = vshll.u32 %v5939_v29, 16  ;;  %v6001_v53 = vshrl.u32 %v5939_v29, 16  ;;  %7264 = vmatmul.msk.bf16.gmra.mxu1 %vm1402_vm14, %v6049_v55  ;;  %v6025_v54 = vrot.slane %v6024_v21, 4 }
 0x5fa   :  { %v5731_v52 = vrot.slane %v5729_v12, 7 }
 0x5fb   :  { %v5999_v0 = vrot.slane %v5997_v2, 5  ;;  %v6003_v38 = vrot.slane %v6001_v53, 4  ;;  %v6030_v29 = vsel %vm8141_vm4, %v6025_v54, %v6029_v9  ;;  %v6220_v53 = vld [vmem:[#allocation13 + $0x38] sm:$0xff] }
 0x5fc   :  { %v5734_v15 = vor.u32 %v5732_v44, %v5731_v52  ;;  %v5736_v24 = vrot.slane %v5731_v52, 4  ;;  %v6047_v61 = vunpack.c.l.b16 %v6030_v29  ;;  %6239 = vmatpush.msra.mxu2 %v6220_v53 }
 0x5fd   :  { %v6004_v47 = vor.u32 %v6003_v38, %v5999_v0  ;;  %v6000_v3 = vsel %vm8141_vm4, %v5995_v19, %v5999_v0 }
 0x5fe   :  { %v5735_v57 = vsel %vm7946_vm12, %v5727_v23, %v5734_v15  ;;  %v6044_v27 = vunpack.c.l.b16 %v6000_v3 }
 0x5ff   :  { %v5861_v63 = vunpack.c.l.b16 %v5735_v57  ;;  %v5940_v60 = vld [vmem:[#allocation2 + $0x30] sm:$0xf]  ;;  %v6005_v51 = vrot.slane %v6004_v47, 4 }
 0x600   :  { %v5672_v62 = vld [vmem:[#allocation2 + $0x30] sm:$0xf]  ;;  %v6007_v34 = vshll.u32 %v5940_v60, 16  ;;  %v6011_v14 = vshrl.u32 %v5940_v60, 16 }
 0x601   :  { %v5866_v7 = vpack.c.b16 %v5861_v63, %v5860_v25  ;;  %v5738_v31 = vshrl.u32 %v5672_v62, 16  ;;  %v5741_v58 = vshll.u32 %v5672_v62, 16  ;;  %v7439_v41 = vld [vmem:[#allocation2 + $0x30] sm:$0xff] }
 0x602   :  { %v6009_v30 = vrot.slane %v6007_v34, 5  ;;  %v6013_v20 = vrot.slane %v6011_v14, 4  ;;  %v6219_v25 = vld [vmem:[#allocation13 + $0x30] sm:$0xff]  ;;  %v6218_v34 = vld [vmem:[#allocation13 + $0x28] sm:$0xff] }
 0x603   :  { %7245 = vmatmul.msk.bf16.gmra.mxu0 %vm1402_vm14, %v5866_v7  ;;  %v5740_v42 = vrot.slane %v5738_v31, 7  ;;  %6240 = vmatpush.msra.mxu2 %v6219_v25 }
 0x604   :  { %v6010_v37 = vsel %vm8141_vm4, %v6005_v51, %v6009_v30  ;;  %v6014_v45 = vor.u32 %v6013_v20, %v6009_v30 }
 0x605   :  { %v6045_v50 = vunpack.c.l.b16 %v6010_v37  ;;  %v5743_v48 = vor.u32 %v5741_v58, %v5740_v42  ;;  %v5745_v1 = vrot.slane %v5740_v42, 4  ;;  %6241 = vmatpush.msra.mxu2 %v6218_v34  ;;  %v6216_v37 = vld [vmem:[#allocation13 + $0x18] sm:$0xff] }
 0x606   :  { %v6015_v11 = vrot.slane %v6014_v45, 4 }
 0x607   :  { %v6050_v4 = vpack.c.b16 %v6045_v50, %v6044_v27  ;;  %7226 = vmatmul.msk.bf16.gmra.mxu3 %vm1402_vm14, %v7439_v41  ;;  %v5744_v36 = vsel %vm7946_vm12, %v5736_v24, %v5743_v48  ;;  %v5753_v17 = vsel %vm7946_vm12, %v5745_v1, %v5752_v49  ;;  %v6217_v49 = vld [vmem:[#allocation13 + $0x20] sm:$0xff] }
 0x608   :  { %v5862_v13 = vunpack.c.l.b16 %v5744_v36  ;;  %v5863_v32 = vunpack.c.l.b16 %v5753_v17  ;;  %v6020_v18 = vsel %vm8141_vm4, %v6015_v11, %v6019_v6  ;;  %6242 = vmatpush.msra.mxu2 %v6217_v49  ;;  %v6214_v6 = vld [vmem:[#allocation13 + $0x8] sm:$0xff]  ;;  %v6213_v50 = vld [vmem:[#allocation13] sm:$0xff] }
 0x609   :  { %7265 = vmatmul.msk.bf16.gmra.mxu1 %vm1402_vm14, %v6050_v4  ;;  %v6046_v43 = vunpack.c.l.b16 %v6020_v18 }
 0x60a   :  { %v5867_v55 = vpack.c.b16 %v5863_v32, %v5862_v13  ;;  %6243 = vmatpush.msra.mxu2 %v6216_v37 }
 0x60b   :  { %v6051_v12 = vpack.c.b16 %v6047_v61, %v6046_v43 }
 0x60c   :  { %6244 = vmatpush.msra.mxu2 %v6215_v46 }
 0x60e   :  { %6245 = vmatpush.msra.mxu2 %v6214_v6 }
 0x610   :  { %6246 = vmatpush.msra.mxu2 %v6213_v50 }
 0x613   :  { %7246 = vmatmul.msk.bf16.gmra.mxu0 %vm1402_vm14, %v5867_v55 }
 0x619   :  { %7266 = vmatmul.msk.bf16.gmra.mxu1 %vm1402_vm14, %v6051_v12 }
 0x65a   :  { %v5836_v39 = vpop.f32.mrf.mxu3 }
 0x660   :  { %v5913_v2 = vpop.f32.mrf.mxu0 }
 0x661   :  { %v5914_v44 = vadd.f32 %v5913_v2, %v5836_v39 }
 0x662   :  { %v5838_v52 = vpop.f32.mrf.mxu3 }
 0x666   :  { %v6097_v26 = vpop.f32.mrf.mxu1 }
 0x667   :  { %v6117_v0 = vadd.f32 %v6097_v26, %v5914_v44 }
 0x668   :  { %v5915_v38 = vpop.f32.mrf.mxu0 }
 0x669   :  { %v6129_v40 = vadd.f32 %v9564_v59, %v6117_v0  ;;  %v5916_v28 = vadd.f32 %v5915_v38, %v5838_v52 }
 0x66a   :  { %v5841_v15 = vpop.f32.mrf.mxu3 }
 0x66b   :  { %v6137_v23 = vmax.f32 %v6129_v40, 0.0 }
 0x66d   :  { %v6153_v35 = vpack.c.bf16 %v6137_v23, %v6137_v23 }
 0x66e   :  { %v6099_v57 = vpop.f32.mrf.mxu1 }
 0x66f   :  { %6161 = vst.msk [vmem:[#allocation3 + $0x8] sm:$0xf] %vm1196_vm8, %v6153_v35  ;;  %v6118_v16 = vadd.f32 %v6099_v57, %v5916_v28 }
 0x670   :  { %v5918_v56 = vpop.f32.mrf.mxu0 }
 0x671   :  { %v6130_v63 = vadd.f32 %v9564_v59, %v6118_v16  ;;  %v5919_v19 = vadd.f32 %v5918_v56, %v5841_v15 }
 0x672   :  { %v5843_v10 = vpop.f32.mrf.mxu3 }
 0x673   :  { %v6138_v47 = vmax.f32 %v6130_v63, 0.0 }
 0x675   :  { %v6154_v60 = vpack.c.bf16 %v6138_v47, %v6138_v47 }
 0x676   :  { %v6102_v62 = vpop.f32.mrf.mxu1 }
 0x677   :  { %6162 = vst.msk [vmem:[#allocation3 + $0xc] sm:$0xf] %vm1196_vm8, %v6154_v60  ;;  %v6119_v8 = vadd.f32 %v6102_v62, %v5919_v19 }
 0x678   :  { %v5920_v7 = vpop.f32.mrf.mxu0 }
 0x679   :  { %v6131_v14 = vadd.f32 %v9564_v59, %v6119_v8 }
 0x67a   :  { %v5846_v3 = vpop.f32.mrf.mxu3 }
 0x67b   :  { %v6139_v31 = vmax.f32 %v6131_v14, 0.0 }
 0x67d   :  { %v6147_v51 = vsel %vm2397_vm9, %v6139_v31, 0.0 }
 0x67e   :  { %v6155_v30 = vpack.c.bf16 %v6147_v51, %v6147_v51  ;;  %v6104_v42 = vpop.f32.mrf.mxu1  ;;  %v7516_v9 = vld [vmem:[#allocation3 + $0x8] sm:$0xff]  }
 0x67f   :  { %v7494_v11 = vunpack.c.l.bf16 %v7516_v9  ;;  %v7495_v54 = vunpack.c.h.bf16 %v7516_v9 }
 0x680   :  { %v5923_v58 = vpop.f32.mrf.mxu0  ;;  %6163 = vst.msk [vmem:[#allocation3 + $0x10] sm:$0xf] %vm1196_vm8, %v6155_v30 }
 0x681   :  { %v5924_v22 = vadd.f32 %v5923_v58, %v5846_v3  ;;  %v6185_v39 = vsel %vm1402_vm14, %v7494_v11, 0.0  ;;  %v6186_v2 = vsel %vm1402_vm14, %v7495_v54, 0.0 }
 0x682   :  { %v5848_v20 = vpop.f32.mrf.mxu3  ;;  %v6187_v0 = vadd.f32 %v6186_v2, %v6185_v39 }
 0x686   :  { %v6107_v27 = vpop.f32.mrf.mxu1 }
 0x687   :  { %v6121_v48 = vadd.f32 %v6107_v27, %v5924_v22  ;;  %v7517_v32 = vld [vmem:[#allocation3 + $0x10] sm:$0xff]  }
 0x688   :  { %v5925_v1 = vpop.f32.mrf.mxu0  ;;  %v7498_v29 = vunpack.c.l.bf16 %v7517_v32  ;;  %v7499_v38 = vunpack.c.h.bf16 %v7517_v32 }
 0x689   :  { %v6133_v41 = vadd.f32 %v9564_v59, %v6121_v48  ;;  %v5926_v45 = vadd.f32 %v5925_v1, %v5848_v20  ;;  %v7549_v48 = vld [vmem:[%s9615_s18] ss:$0 sm:$0xff] }
 0x68a   :  { %v5851_v24 = vpop.f32.mrf.mxu3  ;;  %v6188_v44 = vsel %vm1402_vm14, %v7498_v29, 0.0  ;;  %v6190_v57 = vsel %vm1402_vm14, %v7499_v38, 0.0 }
 0x68b   :  { %v6141_v4 = vmax.f32 %v6133_v41, 0.0  ;;  %v6189_v23 = vadd.f32 %v6188_v44, %v6187_v0 }
 0x68d   :  { %v6157_v5 = vpack.c.bf16 %v6141_v4, %v6141_v4  ;;  %v6191_v56 = vadd.f32 %v6190_v57, %v6189_v23 }
 0x68e   :  { %v6109_v21 = vpop.f32.mrf.mxu1 }
 0x68f   :  { %6165 = vst.msk [vmem:[#allocation3 + $0x28] sm:$0xf] %vm1196_vm8, %v6157_v5  ;;  %v6122_v36 = vadd.f32 %v6109_v21, %v5926_v45  ;;  %v6192_v47 = vrot.slane %v6191_v56, 4 }
 0x690   :  { %v5928_v17 = vpop.f32.mrf.mxu0 }
 0x691   :  { %v6134_v13 = vadd.f32 %v9564_v59, %v6122_v36  ;;  %v5929_v61 = vadd.f32 %v5928_v17, %v5851_v24  ;;  %v6193_v19 = vadd.f32 %v6192_v47, %v6191_v56 }
 0x692   :  { %v5853_v18 = vpop.f32.mrf.mxu3 }
 0x693   :  { %v6142_v55 = vmax.f32 %v6134_v13, 0.0  ;;  %v6194_v34 = vrot.slane %v6193_v19, 2 }
 0x695   :  { %v6158_v43 = vpack.c.bf16 %v6142_v55, %v6142_v55  ;;  %v6195_v51 = vadd.f32 %v6194_v34, %v6193_v19 }
 0x696   :  { %v6112_v12 = vpop.f32.mrf.mxu1 }
 0x697   :  { %6166 = vst.msk [vmem:[#allocation3 + $0x2c] sm:$0xf] %vm1196_vm8, %v6158_v43  ;;  %v6123_v53 = vadd.f32 %v6112_v12, %v5929_v61  ;;  %v6196_v58 = vrot.slane %v6195_v51, 1 }
 0x698   :  { %v5930_v52 = vpop.f32.mrf.mxu0 }
 0x699   :  { %v6135_v26 = vadd.f32 %v9564_v59, %v6123_v53  ;;  %v6197_v46 = vadd.f32 %v6196_v58, %v6195_v51 }
 0x69b   :  { %v6143_v40 = vmax.f32 %v6135_v26, 0.0  ;;  %v6211_v22 = vmul.f32 0.055555556, %v6197_v46 }
 0x69d   :  { %v6151_v15 = vsel %vm2397_vm9, %v6143_v40, 0.0 }
 0x69e   :  { %v6159_v35 = vpack.c.bf16 %v6151_v15, %v6151_v15  ;;  %v6114_v28 = vpop.f32.mrf.mxu1  ;;  %v7518_v16 = vld [vmem:[#allocation3 + $0x28] sm:$0xff]  }
 0x69f   :  { %v7502_v25 = vunpack.c.l.bf16 %v7518_v16  ;;  %v7503_v63 = vunpack.c.h.bf16 %v7518_v16 }
 0x6a0   :  { %6167 = vst.msk [vmem:[#allocation3 + $0x30] sm:$0xf] %vm1196_vm8, %v6159_v35 }
 0x6a1   :  { %v6198_v59 = vsel %vm1402_vm14, %v7502_v25, 0.0  ;;  %v6199_v10 = vsel %vm1402_vm14, %v7503_v63, 0.0 }
 0x6a2   :  { %v6200_v8 = vadd.f32 %v6199_v10, %v6198_v59 }
 0x6a7   :  { %v7519_v60 = vld [vmem:[#allocation3 + $0x30] sm:$0xff]  }
 0x6a8   :  { %v7506_v62 = vunpack.c.l.bf16 %v7519_v60  ;;  %v7507_v33 = vunpack.c.h.bf16 %v7519_v60 }
 0x6aa   :  { %v6201_v7 = vsel %vm1402_vm14, %v7506_v62, 0.0  ;;  %v6203_v31 = vsel %vm1402_vm14, %v7507_v33, 0.0 }
 0x6ab   :  { %v6202_v14 = vadd.f32 %v6201_v7, %v6200_v8 }
 0x6ad   :  { %v6204_v3 = vadd.f32 %v6203_v31, %v6202_v14 }
 0x6af   :  { %v6205_v30 = vrot.slane %v6204_v3, 4 }
 0x6b1   :  { %v6206_v42 = vadd.f32 %v6205_v30, %v6204_v3 }
 0x6b3   :  { %v6207_v49 = vrot.slane %v6206_v42, 2 }
 0x6b5   :  { %v6208_v37 = vadd.f32 %v6207_v49, %v6206_v42 }
 0x6b7   :  { %v6209_v20 = vrot.slane %v6208_v37, 1 }
 0x6b9   :  { %v6210_v6 = vadd.f32 %v6209_v20, %v6208_v37 }
 0x6bb   :  { %v6212_v27 = vmul.f32 0.055555556, %v6210_v6 }
 0x6bd   :  { %v6228_v50 = vsel %vm6227_vm2, %v6212_v27, %v6211_v22 }
 0x6be   :  { %7267 = vmatmul.msk.f32.vlgmr.msra.gmra.mxu2 %vm1402_vm14, %v6228_v50 }
 0x741   :  { %v6248_v1 = vpop.f32.mrf.mxu2 }
 0x742   :  { %v6249_v41 = vadd.f32 %v7549_v48, %v6248_v1 }
 0x744   :  { %6251 = vst [vmem:[#allocation15] sm:$0x3] %v6249_v41 }
 0x745   :  { %6262 = dma.vmem_to_hbm [thread:$0]  %s6258_s15, 32, %s6260_s17, [#allocation6]  }
 0x746   :  { %7726 = dma.done.wait [#allocation6], 32  }
 0x747   :  { %7727 = vsyncadd [#allocation6], 4294967264 }
 0x748   :  { %6267 = vsyncpa [#allocation5], 1 }
 0x749   :  { %6268 = vsyncpa [#allocation8], 1 }
 0x74a   :  { %6269 = vsyncpa [#allocation11], 1 }
 0x74b   :  { %6270 = vsyncpa [#allocation14], 1 }
 0x74c   :  { %6271 = vsyncpa [#allocation6], 1 }

</bundles_post_ra>
